<compile_context>
chip_gen: v7x
topology: tpu7x:2x2x1
jax: 0.10.0
libtpu: 0.0.40
codegen_flags: <defaults>
</compile_context>

<pallas_src>
import jax
import jax.numpy as jnp
from jax.experimental import pallas as pl
from jax.experimental.pallas import tpu as pltpu

# ----------------------------- constants ------------------------------------
B = 2                # batch
C = 3                # image channels
H = 224              # image height
REGION_W = 224       # region width (torch slices 448 -> 2 x 224)
N_REGIONS = 2
W_FULL = N_REGIONS * REGION_W            # 448
FEAT = 768           # per-region ViT CLS feature dim (stand-in)
PRED1 = 25           # first_stage_pred dim
PRED2 = 3            # second_stage_pred dim
FC1_IN = N_REGIONS * FEAT                # 1536
FC1_OUT = 512
FC2_IN = FC1_OUT + PRED1 + PRED2         # 540
FC2_OUT = 256
FC3_OUT = 128
FC4_OUT = 3

# Packed f32 constant slab layout: (8, 2560)
#   rows 0..5, cols 0..1535 : block-diagonal projection (mean scale folded)
#   row  6,    cols 0..1535 : [b_proj | b_proj]  (picked up by a "ones" column)
#   row  7                  : zero
#   row  0, cols 1536..2434 : fc1/fc2/fc3/fc4 biases (128-multiple offsets)
_B1_OFF = FC1_IN                        # 1536
_B2_OFF = _B1_OFF + FC1_OUT             # 2048
_B3_OFF = _B2_OFF + FC2_OUT             # 2304
_B4_OFF = _B3_OFF + FC3_OUT             # 2432
_CONST_W = 2560                         # 2435 padded up to a lane multiple
_CONST_ROWS = 8
_PROJ_BIAS_ROW = N_REGIONS * C          # 6


# ----------------------------- fused kernel ---------------------------------
def _fused_forward_kernel(x_ref, preds_ref, w1_ref, w2_ref, w34_ref, const_ref,
                          out_ref):
    consts = const_ref[...]                                        # (8, 2560) f32

    # ---- Stand-in visual extractor for both 224-wide regions, fused --------
    # Image arrives as bf16 (halves the dominant HBM DMA); accumulate in f32.
    col_sum = jnp.sum(x_ref[...].astype(jnp.float32), axis=2)      # (B, C, 448)
    lane = jax.lax.broadcasted_iota(jnp.int32, col_sum.shape, 2)
    left = jnp.sum(jnp.where(lane < REGION_W, col_sum, 0.0), axis=-1)   # (B, C)
    right = jnp.sum(col_sum, axis=-1) - left                            # (B, C)
    b = left.shape[0]
    pooled = jnp.concatenate(
        [left, right,
         jnp.ones((b, 1), jnp.float32),     # multiplies the folded proj-bias row
         jnp.zeros((b, 1), jnp.float32)],   # multiplies the padding row
        axis=-1)                                                    # (B, 8)

    # Block-diagonal projection (1/(224*224) mean scale + per-region bias
    # pre-folded): one tiny f32 dot emits [feat_region0 | feat_region1].
    combined = jnp.dot(pooled, consts[:, 0:FC1_IN],
                       preferred_element_type=jnp.float32)          # (B, 1536)

    b1 = consts[0:1, _B1_OFF:_B1_OFF + FC1_OUT]
    b2 = consts[0:1, _B2_OFF:_B2_OFF + FC2_OUT]
    b3 = consts[0:1, _B3_OFF:_B3_OFF + FC3_OUT]
    b4 = consts[0:1, _B4_OFF:_B4_OFF + FC4_OUT]

    # ---- Head: fc1 -> relu -> [drop] -> cat -> fc2 -> relu -> [drop]
    #      -> fc3 -> relu(fc4) -> sigmoid    (dropout = identity, eval mode)
    h1 = jnp.maximum(
        jnp.dot(combined.astype(jnp.bfloat16), w1_ref[...],
                preferred_element_type=jnp.float32) + b1, 0.0)      # (B, 512)

    # concat([h1, first_pred, second_pred]) @ W2 ==
    #     h1 @ W2[:512] + preds @ W2[512:540]   (aligned sublane slices of W2)
    preds = preds_ref[...].astype(jnp.bfloat16)                     # (B, 28)
    h2 = jnp.maximum(
        jnp.dot(h1.astype(jnp.bfloat16), w2_ref[0:FC1_OUT, :],
                preferred_element_type=jnp.float32)
        + jnp.dot(preds, w2_ref[FC1_OUT:FC2_IN, :],
                  preferred_element_type=jnp.float32)
        + b2, 0.0)                                                  # (B, 256)

    h3 = (jnp.dot(h2.astype(jnp.bfloat16), w34_ref[0:FC2_OUT, :],
                  preferred_element_type=jnp.float32) + b3)         # fc3, no act

    # fc4 packed in the lower 128x128 block of w34 (only cols 0..2 nonzero).
    h4_full = jnp.dot(h3.astype(jnp.bfloat16),
                      w34_ref[FC2_OUT:FC2_OUT + FC3_OUT, :],
                      preferred_element_type=jnp.float32)           # (B, 128)
    h4 = jnp.maximum(h4_full[:, 0:FC4_OUT] + b4, 0.0)               # relu(fc4)

    out_ref[...] = jax.nn.sigmoid(h4)                               # (B, 3)


# ----------------------------- wrappers -------------------------------------
def _vmem_spec():
    return pl.BlockSpec(memory_space=pltpu.MemorySpace.VMEM)


@jax.jit
def forward(packed, x_bf16, first_stage_pred, second_stage_pred):
    b = x_bf16.shape[0]
    # Tiny (B, 28) concat outside the kernel: one pred DMA instead of two and
    # no in-kernel concatenate.
    preds = jnp.concatenate([first_stage_pred, second_stage_pred], axis=-1)
    flops = int(
        2 * b * C * H * W_FULL                                      # pooling
        + 2 * b * (_CONST_ROWS * FC1_IN + FC1_IN * FC1_OUT + FC2_IN * FC2_OUT
                   + FC2_OUT * FC3_OUT + FC3_OUT * FC3_OUT))
    bytes_accessed = int(
        x_bf16.size * 2 + preds.size * 4
        + packed["w1"].size * 2 + packed["w2"].size * 2 + packed["w34"].size * 2
        + packed["consts"].size * 4 + b * FC4_OUT * 4)
    return pl.pallas_call(
        _fused_forward_kernel,
        out_shape=jax.ShapeDtypeStruct((b, FC4_OUT), jnp.float32),
        in_specs=[_vmem_spec() for _ in range(6)],
        out_specs=_vmem_spec(),
        cost_estimate=pl.CostEstimate(flops=flops,
                                      transcendentals=b * FC4_OUT,
                                      bytes_accessed=bytes_accessed),
    )(x_bf16, preds, packed["w1"], packed["w2"], packed["w34"],
      packed["consts"])


def init_params(key):
    """PyTorch nn.Linear-style (uniform +-1/sqrt(fan_in)) f32 parameters."""
    ks = jax.random.split(key, 5)

    def lin(k, fan_in, fan_out):
        kw, kb = jax.random.split(k)
        bound = 1.0 / jnp.sqrt(jnp.float32(fan_in))
        w = jax.random.uniform(kw, (fan_in, fan_out), jnp.float32, -bound, bound)
        b = jax.random.uniform(kb, (1, fan_out), jnp.float32, -bound, bound)
        return w, b

    w_proj, b_proj = lin(ks[0], C, FEAT)        # stand-in extractor projection
    w1, b1 = lin(ks[1], FC1_IN, FC1_OUT)        # fc1: 1536 -> 512
    w2, b2 = lin(ks[2], FC2_IN, FC2_OUT)        # fc2: 540 -> 256 (rows: [x, p1, p2])
    w3, b3 = lin(ks[3], FC2_OUT, FC3_OUT)       # fc3: 256 -> 128
    w4, b4 = lin(ks[4], FC3_OUT, FC4_OUT)       # fc4: 128 -> 3
    return {"w_proj": w_proj, "b_proj": b_proj, "w1": w1, "b1": b1,
            "w2": w2, "b2": b2, "w3": w3, "b3": b3, "w4": w4, "b4": b4}


def pack_params(p):
    """One-time repack into kernel layout (6 device buffers total):
       * large head weights (w1, w2) in bf16,
       * w3 + w4 packed into one bf16 (384, 128) slab,
       * projection (mean scale + bias folded) and all fc biases packed into a
         single lane-aligned (8, 2560) f32 constant slab."""
    wp = p["w_proj"] * (1.0 / (H * REGION_W))                       # (C, 768)
    consts = jnp.zeros((_CONST_ROWS, _CONST_W), jnp.float32)
    consts = consts.at[0:C, 0:FEAT].set(wp)
    consts = consts.at[C:2 * C, FEAT:FC1_IN].set(wp)
    consts = consts.at[_PROJ_BIAS_ROW, 0:FC1_IN].set(
        jnp.concatenate([p["b_proj"][0], p["b_proj"][0]], axis=-1))
    consts = consts.at[0, _B1_OFF:_B1_OFF + FC1_OUT].set(p["b1"][0])
    consts = consts.at[0, _B2_OFF:_B2_OFF + FC2_OUT].set(p["b2"][0])
    consts = consts.at[0, _B3_OFF:_B3_OFF + FC3_OUT].set(p["b3"][0])
    consts = consts.at[0, _B4_OFF:_B4_OFF + FC4_OUT].set(p["b4"][0])

    w34 = jnp.zeros((FC2_OUT + FC3_OUT, FC3_OUT), jnp.float32)      # (384, 128)
    w34 = w34.at[0:FC2_OUT, :].set(p["w3"])
    w34 = w34.at[FC2_OUT:, 0:FC4_OUT].set(p["w4"])

    return {"w1": p["w1"].astype(jnp.bfloat16),
            "w2": p["w2"].astype(jnp.bfloat16),
            "w34": w34.astype(jnp.bfloat16),
            "consts": consts}


def forward_reference(p, x, first_stage_pred, second_stage_pred):
    """Pure-JAX f32 reference of the stand-in forward (no bf16 anywhere)."""
    feats = []
    for r in range(N_REGIONS):
        region = x[:, :, :, r * REGION_W:(r + 1) * REGION_W]
        pooled = jnp.mean(region, axis=(2, 3))                      # (B, C)
        feats.append(pooled @ p["w_proj"] + p["b_proj"])            # (B, 768)
    h = jnp.concatenate(feats, axis=-1)                             # (B, 1536)
    h = jax.nn.relu(h @ p["w1"] + p["b1"])                          # dropout = id
    h = jnp.concatenate([h, first_stage_pred, second_stage_pred], axis=-1)
    h = jax.nn.relu(h @ p["w2"] + p["b2"])                          # dropout = id
    h = h @ p["w3"] + p["b3"]
    h = jax.nn.relu(h @ p["w4"] + p["b4"])
    return jax.nn.sigmoid(h)


if __name__ == "__main__":
    key = jax.random.PRNGKey(0)
    k_in, k_p1, k_p2, k_params = jax.random.split(key, 4)

    x_f32 = jax.random.normal(k_in, (B, C, H, W_FULL), jnp.float32)
    # bf16 image comes from the producer / preprocessing stage, outside the
    # jitted forward (an astype inside the wrapper would add its own full HBM
    # read+write round trip).
    x_bf16 = x_f32.astype(jnp.bfloat16)
    first_stage_pred = jax.random.uniform(k_p1, (B, PRED1), jnp.float32)
    second_stage_pred = jax.random.uniform(k_p2, (B, PRED2), jnp.float32)

    params = init_params(k_params)
    packed = pack_params(params)

    out = forward(packed, x_bf16, first_stage_pred, second_stage_pred)
    out = jax.block_until_ready(out)

    ref = forward_reference(params, x_f32, first_stage_pred, second_stage_pred)
    max_err = float(jnp.max(jnp.abs(out - ref)))

    assert out.shape == (B, FC4_OUT)
    assert bool(jnp.all(jnp.isfinite(out)))
    assert max_err < 2e-2, f"kernel vs f32 reference max abs err {max_err}"
    print("KERNEL_OK")
</pallas_src>

<mosaic_0001>
module attributes {stable_mosaic.version = 11 : i64} {
  func.func @_fused_forward_kernel(%arg0: memref<2x3x224x448xbf16, #tpu.memory_space<vmem>>, %arg1: memref<2x28xf32, #tpu.memory_space<vmem>>, %arg2: memref<1536x512xbf16, #tpu.memory_space<vmem>>, %arg3: memref<540x256xbf16, #tpu.memory_space<vmem>>, %arg4: memref<384x128xbf16, #tpu.memory_space<vmem>>, %arg5: memref<8x2560xf32, #tpu.memory_space<vmem>>, %arg6: memref<2x3xf32, #tpu.memory_space<vmem>>) attributes {dimension_semantics = [], scalar_prefetch = 0 : i64, scratch_operands = 0 : i64, tpu.core_type = #tpu.core_type<tc>} {
    %c0 = arith.constant 0 : index
    %c0_0 = arith.constant 0 : index
    %0 = vector.load %arg5[%c0, %c0_0] : memref<8x2560xf32, #tpu.memory_space<vmem>>, vector<8x2560xf32>
    %c0_1 = arith.constant 0 : index
    %c0_2 = arith.constant 0 : index
    %c0_3 = arith.constant 0 : index
    %c0_4 = arith.constant 0 : index
    %1 = vector.load %arg0[%c0_1, %c0_2, %c0_3, %c0_4] : memref<2x3x224x448xbf16, #tpu.memory_space<vmem>>, vector<2x3x224x448xbf16>
    %2 = arith.extf %1 : vector<2x3x224x448xbf16> to vector<2x3x224x448xf32>
    %cst = arith.constant dense<0.000000e+00> : vector<2x3x448xf32>
    %3 = vector.multi_reduction <add>, %2, %cst [2] : vector<2x3x224x448xf32> to vector<2x3x448xf32>
    %4 = tpu.iota {dimensions = array<i32: 2>} : vector<2x3x448xi32>
    %c224_i32 = arith.constant 224 : i32
    %5 = vector.broadcast %c224_i32 : i32 to vector<2x3x448xi32>
    %6 = arith.cmpi slt, %4, %5 : vector<2x3x448xi32>
    %cst_5 = arith.constant 0.000000e+00 : f32
    %7 = vector.broadcast %cst_5 : f32 to vector<2x3x448xf32>
    %8 = arith.select %6, %3, %7 : vector<2x3x448xi1>, vector<2x3x448xf32>
    %cst_6 = arith.constant dense<0.000000e+00> : vector<2x3xf32>
    %9 = vector.multi_reduction <add>, %8, %cst_6 [2] : vector<2x3x448xf32> to vector<2x3xf32>
    %cst_7 = arith.constant dense<0.000000e+00> : vector<2x3xf32>
    %10 = vector.multi_reduction <add>, %3, %cst_7 [2] : vector<2x3x448xf32> to vector<2x3xf32>
    %11 = arith.subf %10, %9 : vector<2x3xf32>
    %cst_8 = arith.constant 1.000000e+00 : f32
    %12 = vector.broadcast %cst_8 : f32 to vector<2x1xf32>
    %cst_9 = arith.constant 0.000000e+00 : f32
    %13 = vector.broadcast %cst_9 : f32 to vector<2x1xf32>
    %14 = tpu.concatenate %9, %11, %12, %13 in 1 : vector<2x3xf32>, vector<2x3xf32>, vector<2x1xf32>, vector<2x1xf32> -> vector<2x8xf32>
    %15 = vector.extract_strided_slice %0 {offsets = [0, 0], sizes = [8, 1536], strides = [1, 1]} : vector<8x2560xf32> to vector<8x1536xf32>
    %cst_10 = arith.constant dense<0.000000e+00> : vector<2x1536xf32>
    %16 = tpu.matmul %14, %15, %cst_10 {dimension_numbers = #tpu.dot_dimension_numbers<[1], [0], [0], [1], [0, 0, 1, 1], [], []>} : vector<2x8xf32>, vector<8x1536xf32>, vector<2x1536xf32> -> vector<2x1536xf32>
    %17 = vector.extract_strided_slice %0 {offsets = [0, 1536], sizes = [1, 512], strides = [1, 1]} : vector<8x2560xf32> to vector<1x512xf32>
    %18 = vector.extract_strided_slice %0 {offsets = [0, 2048], sizes = [1, 256], strides = [1, 1]} : vector<8x2560xf32> to vector<1x256xf32>
    %19 = vector.extract_strided_slice %0 {offsets = [0, 2304], sizes = [1, 128], strides = [1, 1]} : vector<8x2560xf32> to vector<1x128xf32>
    %20 = vector.extract_strided_slice %0 {offsets = [0, 2432], sizes = [1, 3], strides = [1, 1]} : vector<8x2560xf32> to vector<1x3xf32>
    %21 = arith.truncf %16 : vector<2x1536xf32> to vector<2x1536xbf16>
    %c0_11 = arith.constant 0 : index
    %c0_12 = arith.constant 0 : index
    %22 = vector.load %arg2[%c0_11, %c0_12] : memref<1536x512xbf16, #tpu.memory_space<vmem>>, vector<1536x512xbf16>
    %cst_13 = arith.constant dense<0.000000e+00> : vector<2x512xf32>
    %23 = tpu.matmul %21, %22, %cst_13 {dimension_numbers = #tpu.dot_dimension_numbers<[1], [0], [0], [1], [0, 0, 1, 1], [], []>} : vector<2x1536xbf16>, vector<1536x512xbf16>, vector<2x512xf32> -> vector<2x512xf32>
    %24 = vector.broadcast %17 : vector<1x512xf32> to vector<2x512xf32>
    %25 = arith.addf %23, %24 : vector<2x512xf32>
    %cst_14 = arith.constant 0.000000e+00 : f32
    %26 = vector.broadcast %cst_14 : f32 to vector<2x512xf32>
    %27 = arith.maximumf %25, %26 : vector<2x512xf32>
    %c0_15 = arith.constant 0 : index
    %c0_16 = arith.constant 0 : index
    %28 = vector.load %arg1[%c0_15, %c0_16] : memref<2x28xf32, #tpu.memory_space<vmem>>, vector<2x28xf32>
    %29 = arith.truncf %28 : vector<2x28xf32> to vector<2x28xbf16>
    %30 = arith.truncf %27 : vector<2x512xf32> to vector<2x512xbf16>
    %c0_17 = arith.constant 0 : index
    %c0_18 = arith.constant 0 : index
    %31 = vector.load %arg3[%c0_17, %c0_18] : memref<540x256xbf16, #tpu.memory_space<vmem>>, vector<512x256xbf16>
    %cst_19 = arith.constant dense<0.000000e+00> : vector<2x256xf32>
    %32 = tpu.matmul %30, %31, %cst_19 {dimension_numbers = #tpu.dot_dimension_numbers<[1], [0], [0], [1], [0, 0, 1, 1], [], []>} : vector<2x512xbf16>, vector<512x256xbf16>, vector<2x256xf32> -> vector<2x256xf32>
    %c512 = arith.constant 512 : index
    %c0_20 = arith.constant 0 : index
    %33 = vector.load %arg3[%c512, %c0_20] : memref<540x256xbf16, #tpu.memory_space<vmem>>, vector<28x256xbf16>
    %cst_21 = arith.constant dense<0.000000e+00> : vector<2x256xf32>
    %34 = tpu.matmul %29, %33, %cst_21 {dimension_numbers = #tpu.dot_dimension_numbers<[1], [0], [0], [1], [0, 0, 1, 1], [], []>} : vector<2x28xbf16>, vector<28x256xbf16>, vector<2x256xf32> -> vector<2x256xf32>
    %35 = arith.addf %32, %34 : vector<2x256xf32>
    %36 = vector.broadcast %18 : vector<1x256xf32> to vector<2x256xf32>
    %37 = arith.addf %35, %36 : vector<2x256xf32>
    %cst_22 = arith.constant 0.000000e+00 : f32
    %38 = vector.broadcast %cst_22 : f32 to vector<2x256xf32>
    %39 = arith.maximumf %37, %38 : vector<2x256xf32>
    %40 = arith.truncf %39 : vector<2x256xf32> to vector<2x256xbf16>
    %c0_23 = arith.constant 0 : index
    %c0_24 = arith.constant 0 : index
    %41 = vector.load %arg4[%c0_23, %c0_24] : memref<384x128xbf16, #tpu.memory_space<vmem>>, vector<256x128xbf16>
    %cst_25 = arith.constant dense<0.000000e+00> : vector<2x128xf32>
    %42 = tpu.matmul %40, %41, %cst_25 {dimension_numbers = #tpu.dot_dimension_numbers<[1], [0], [0], [1], [0, 0, 1, 1], [], []>} : vector<2x256xbf16>, vector<256x128xbf16>, vector<2x128xf32> -> vector<2x128xf32>
    %43 = vector.broadcast %19 : vector<1x128xf32> to vector<2x128xf32>
    %44 = arith.addf %42, %43 : vector<2x128xf32>
    %45 = arith.truncf %44 : vector<2x128xf32> to vector<2x128xbf16>
    %c256 = arith.constant 256 : index
    %c0_26 = arith.constant 0 : index
    %46 = vector.load %arg4[%c256, %c0_26] : memref<384x128xbf16, #tpu.memory_space<vmem>>, vector<128x128xbf16>
    %cst_27 = arith.constant dense<0.000000e+00> : vector<2x128xf32>
    %47 = tpu.matmul %45, %46, %cst_27 {dimension_numbers = #tpu.dot_dimension_numbers<[1], [0], [0], [1], [0, 0, 1, 1], [], []>} : vector<2x128xbf16>, vector<128x128xbf16>, vector<2x128xf32> -> vector<2x128xf32>
    %48 = vector.extract_strided_slice %47 {offsets = [0, 0], sizes = [2, 3], strides = [1, 1]} : vector<2x128xf32> to vector<2x3xf32>
    %49 = vector.broadcast %20 : vector<1x3xf32> to vector<2x3xf32>
    %50 = arith.addf %48, %49 : vector<2x3xf32>
    %cst_28 = arith.constant 0.000000e+00 : f32
    %51 = vector.broadcast %cst_28 : f32 to vector<2x3xf32>
    %52 = arith.maximumf %50, %51 : vector<2x3xf32>
    %53 = arith.negf %52 : vector<2x3xf32>
    %54 = math.exp %53 : vector<2x3xf32>
    %cst_29 = arith.constant 1.000000e+00 : f32
    %55 = vector.broadcast %cst_29 : f32 to vector<2x3xf32>
    %56 = arith.addf %55, %54 : vector<2x3xf32>
    %57 = arith.divf %55, %56 : vector<2x3xf32>
    %c0_30 = arith.constant 0 : index
    %c0_31 = arith.constant 0 : index
    %58 = vector.load %arg6[%c0_30, %c0_31] : memref<2x3xf32, #tpu.memory_space<vmem>>, vector<2x3xf32>
    tpu.vector_store %arg6[%c0_30, %c0_31], %57 {strides = array<i32>} : memref<2x3xf32, #tpu.memory_space<vmem>>, vector<2x3xf32>,
    return
  }
}

</mosaic_0001>

<bundles_post_ra>
// kernel: forward.1
= control target key start
LH: loop header
LB: loop body
LE: loop exit
PB: predicated region body
PF: predicated region fallthrough
CT: control target
= control target key end

     0   :  { %11 = vsyncpa [#allocation3], 0  ;;  %s10783_s0 = inlined_call_operand.hbm [shape: bf16[2,3,224,448], index: 0, kind: input, shape index: {}]   ;;  %s10784_s1 = inlined_call_operand.vmem [shape: f32[2,28], index: 1, kind: input, shape index: {}]   ;;  %s10785_s2 = inlined_call_operand.hbm [shape: bf16[1536,512], index: 2, kind: input, shape index: {}]   ;;  %s10786_s3 = inlined_call_operand.hbm [shape: bf16[540,256], index: 3, kind: input, shape index: {}]   ;;  %s10787_s4 = inlined_call_operand.hbm [shape: bf16[384,128], index: 4, kind: input, shape index: {}]   ;;  %s10788_s5 = inlined_call_operand.hbm [shape: f32[8,2560], index: 5, kind: input, shape index: {}]   ;;  %s10789_s6 = inlined_call_operand.hbm [shape: f32[2,3], index: 6, kind: output, shape index: {}]  }
   0x1   :  { %12 = vsyncpa [#allocation6], 0 }
   0x2   :  { %13 = vsyncpa [#allocation9], 0 }
   0x3   :  { %14 = vsyncpa [#allocation4], 0  ;;  %s7785_s21 = smov [#allocation5]   ;;  %s7786_s23 = smov [#allocation8]  }
   0x4   :  { %s34_s22 = sshll.u32 %s7785_s21, 4  ;;  %s58_s24 = sshll.u32 %s7786_s23, 4  ;;  %s35_s22 = int_to_ptr.vmem [resolvable:$true] %s34_s22  ;;  %s7835_s24 = int_to_ptr.vmem [resolvable:$true] %s58_s24 }
   0x5   :  { %s7645_s27 = scalar_lea.hbm %s10785_s2, 49152 }
   0x6   :  { %p7646_p0 = scmp.ne.s32.totalorder %s10785_s2, %s7645_s27  ;;  %p7649_p1 = scmp.lt.u32.totalorder %s7645_s27, %s10785_s2 }
   0x8   :  { %p7651_p2 = pnand %p7649_p1, %p7646_p0 }
   0xa   :  { %7654 = shalt.err (!%p7651_p2)
}
   0xb   :  { %s7655_s8 = scalar_lea.vmem %s35_s22, 49152  ;;  %p7660_p4 = scmp.lt.s32.totalorder %s35_s22, %s35_s22 }
   0xc   :  { %p7656_p3 = scmp.ne.s32.totalorder %s35_s22, %s7655_s8  ;;  %p7661_p5 = scmp.lt.s32.totalorder %s7655_s8, %s7655_s8 }
   0xe   :  { %p7662_p6 = por %p7661_p5, %p7660_p4 }
  0x10   :  { %p7663_p7 = pnand %p7662_p6, %p7656_p3 }
  0x12   :  { %7666 = shalt.err (!%p7663_p7)
}
  0x13   :  { %s7787_s9 = smov 256   ;;  %s7788_s10 = smov 16  }
  0x14   :  { %40 = dma.hbm_to_vmem [thread:$0]  %s10785_s2, 49152, %s35_s22, [#allocation6], %s7787_s9, %s7787_s9, %s7788_s10  }
  0x15   :  { %s7667_s15 = scalar_lea.hbm %s10787_s4, 3072 }
  0x16   :  { %p7668_p8 = scmp.ne.s32.totalorder %s10787_s4, %s7667_s15  ;;  %p7671_p9 = scmp.lt.u32.totalorder %s7667_s15, %s10787_s4 }
  0x18   :  { %p7673_p10 = pnand %p7671_p9, %p7668_p8 }
  0x1a   :  { %7676 = shalt.err (!%p7673_p10)
}
  0x1b   :  { %s7677_s20 = scalar_lea.vmem %s7835_s24, 3072  ;;  %p7682_p12 = scmp.lt.s32.totalorder %s7835_s24, %s7835_s24 }
  0x1c   :  { %p7678_p11 = scmp.ne.s32.totalorder %s7835_s24, %s7677_s20  ;;  %p7683_p13 = scmp.lt.s32.totalorder %s7677_s20, %s7677_s20 }
  0x1e   :  { %p7684_p0 = por %p7683_p13, %p7682_p12 }
  0x20   :  { %p7685_p1 = pnand %p7684_p0, %p7678_p11 }
  0x22   :  { %7688 = shalt.err (!%p7685_p1)
}
  0x23   :  { %s7789_s2 = smov 64   ;;  %s7790_s21 = smov 4  }
  0x24   :  { %64 = dma.hbm_to_vmem [thread:$0]  %s10787_s4, 3072, %s7835_s24, [#allocation9], %s7789_s2, %s7789_s2, %s7790_s21  }
  0x25   :  { %s7791_s25 = smov [#allocation2]   ;;  %s7792_s27 = smov [#allocation7]  }
  0x26   :  { %s20_s26 = sshll.u32 %s7791_s25, 4  ;;  %s46_s28 = sshll.u32 %s7792_s27, 4  ;;  %s21_s26 = int_to_ptr.vmem [resolvable:$true] %s20_s26  ;;  %s7869_s28 = int_to_ptr.vmem [resolvable:$true] %s46_s28 }
  0x27   :  { %s7689_s7 = scalar_lea.hbm %s10783_s0, 43008 }
  0x28   :  { %p7690_p2 = scmp.ne.s32.totalorder %s10783_s0, %s7689_s7  ;;  %p7693_p3 = scmp.lt.u32.totalorder %s7689_s7, %s10783_s0 }
  0x2a   :  { %p7695_p4 = pnand %p7693_p3, %p7690_p2 }
  0x2c   :  { %7698 = shalt.err (!%p7695_p4)
}
  0x2d   :  { %s7699_s4 = scalar_lea.vmem %s21_s26, 43008  ;;  %p7704_p6 = scmp.lt.s32.totalorder %s21_s26, %s21_s26 }
  0x2e   :  { %p7700_p5 = scmp.ne.s32.totalorder %s21_s26, %s7699_s4  ;;  %p7705_p7 = scmp.lt.s32.totalorder %s7699_s4, %s7699_s4 }
  0x30   :  { %p7706_p8 = por %p7705_p7, %p7704_p6 }
  0x32   :  { %p7707_p9 = pnand %p7706_p8, %p7700_p5 }
  0x34   :  { %7710 = shalt.err (!%p7707_p9)
}
  0x35   :  { %26 = dma.hbm_to_vmem [thread:$0]  %s10783_s0, 43008, %s21_s26, [#allocation3], %s7787_s9, %s7787_s9, %s7788_s10  }
  0x36   :  { %s7711_s17 = scalar_lea.hbm %s10786_s3, 8704 }
  0x37   :  { %p7712_p10 = scmp.ne.s32.totalorder %s10786_s3, %s7711_s17  ;;  %p7715_p11 = scmp.lt.u32.totalorder %s7711_s17, %s10786_s3 }
  0x39   :  { %p7717_p12 = pnand %p7715_p11, %p7712_p10 }
  0x3b   :  { %7720 = shalt.err (!%p7717_p12)
}
  0x3c   :  { %s7721_s21 = scalar_lea.vmem %s7869_s28, 8704  ;;  %p7726_p0 = scmp.lt.s32.totalorder %s7869_s28, %s7869_s28 }
  0x3d   :  { %p7722_p13 = scmp.ne.s32.totalorder %s7869_s28, %s7721_s21  ;;  %p7727_p1 = scmp.lt.s32.totalorder %s7721_s21, %s7721_s21 }
  0x3f   :  { %p7728_p2 = por %p7727_p1, %p7726_p0 }
  0x41   :  { %p7729_p3 = pnand %p7728_p2, %p7722_p13 }
  0x43   :  { %7732 = shalt.err (!%p7729_p3)
}
  0x44   :  { %s7793_s0 = smov 128   ;;  %s7794_s9 = smov 8  }
  0x45   :  { %52 = dma.hbm_to_vmem [thread:$0]  %s10786_s3, 8704, %s7869_s28, [#allocation6], %s7793_s0, %s7793_s0, %s7794_s9  }
  0x46   :  { %s7795_s23 = smov [#allocation10]   ;;  %s7733_s29 = scalar_lea.hbm %s10788_s5, 2560 }
  0x47   :  { %s71_s25 = sshll.u32 %s7795_s23, 4  ;;  %p7734_p4 = scmp.ne.s32.totalorder %s10788_s5, %s7733_s29  ;;  %s72_s25 = int_to_ptr.vmem [resolvable:$true] %s71_s25 }
  0x48   :  { %p7737_p5 = scmp.lt.u32.totalorder %s7733_s29, %s10788_s5 }
  0x4a   :  { %p7739_p6 = pnand %p7737_p5, %p7734_p4 }
  0x4c   :  { %7742 = shalt.err (!%p7739_p6)
}
  0x4d   :  { %s7743_s12 = scalar_lea.vmem %s72_s25, 2560  ;;  %p7748_p8 = scmp.lt.s32.totalorder %s72_s25, %s72_s25 }
  0x4e   :  { %p7744_p7 = scmp.ne.s32.totalorder %s72_s25, %s7743_s12  ;;  %p7749_p9 = scmp.lt.s32.totalorder %s7743_s12, %s7743_s12 }
  0x50   :  { %p7750_p10 = por %p7749_p9, %p7748_p8 }
  0x52   :  { %p7751_p11 = pnand %p7750_p10, %p7744_p7 }
  0x54   :  { %7754 = shalt.err (!%p7751_p11)
}
  0x55   :  { %74 = dma.hbm_to_vmem [thread:$0]  %s10788_s5, 2560, %s72_s25, [#allocation9]  }
  0x56   :  { %7777 = dma.done.wait [#allocation3], 43008  }
  0x57   :  { %7778 = vsyncadd [#allocation3], 4294924288 }
  0x58   :  { %7779 = dma.done.wait [#allocation6], 57856  }
  0x59   :  { %7780 = vsyncadd [#allocation6], 4294909440 }
  0x5a   :  { %7781 = dma.done.wait [#allocation9], 5632  }
  0x5b   :  { %7782 = vsyncadd [#allocation9], 4294961664  ;;  %v10790_v0 = vlaneseq  ;;  %v7918_v2 = vld [vmem:[#allocation2] sm:$0xff]  ;;  %v7920_v3 = vld [vmem:[#allocation2 + $0x10] sm:$0xff]  ;;  %vm2113_vm0 = vcmask 1041409   ;;  %vm2115_vm1 = vcmask 1042434  }
  0x5c   :  { %v7922_v4 = vld [vmem:[#allocation2 + $0x20] sm:$0xff]  ;;  %v7924_v5 = vld [vmem:[#allocation2 + $0x30] sm:$0xff]  ;;  %vm2147_vm3 = vcmask 1042432   ;;  %vm1218_vm4 = vcmask 523264   ;;  %vm2153_vm5 = vcmask 518144   ;;  %vm2212_vm6 = vcmask 23552  }
  0x5d   :  { %v7916_v1 = vand.u32 127, %v10790_v0  ;;  %v7926_v6 = vld [vmem:[#allocation2 + $0x40] sm:$0xff]  ;;  %v7928_v7 = vld [vmem:[#allocation2 + $0x50] sm:$0xff]  ;;  %vm2214_vm7 = vcmask 48128   ;;  %vm2216_vm8 = vcmask 56320   ;;  %vm2218_vm9 = vcmask 64512  }
  0x5e   :  { %v7930_v8 = vld [vmem:[#allocation2 + $0x60] sm:$0xff]  ;;  %v7932_v9 = vld [vmem:[#allocation2 + $0x70] sm:$0xff]  ;;  %vm5572_vm10 = vcmask 1045504   ;;  %vm5568_vm11 = vcmask 228352   ;;  %vm7798_vm12 = vmmov 0   ;;  %vm6325_vm13 = vcmask 17408  }
  0x5f   :  { %11007 = vst [vmem:[#allocation16_spill] sm:$0xff] %v7916_v1  ;;  %v7938_v13 = vadd.s32 128, %v7916_v1  ;;  %v7940_v14 = vld [vmem:[#allocation2 + $0x80] sm:$0xff]  ;;  %v7942_v15 = vld [vmem:[#allocation2 + $0x90] sm:$0xff] }
  0x60   :  { %v7948_v20 = vld [vmem:[#allocation2 + $0xa0] sm:$0xff]  ;;  %v7950_v21 = vld [vmem:[#allocation2 + $0xb0] sm:$0xff] }
  0x61   :  { %11008 = vst [vmem:[#allocation17_spill] sm:$0xff] %v7938_v13  ;;  %v7956_v26 = vld [vmem:[#allocation2 + $0xc0] sm:$0xff]  ;;  %v7958_v27 = vld [vmem:[#allocation2 + $0xd0] sm:$0xff] }
  0x62   :  { %v7964_v32 = vld [vmem:[#allocation2 + $0xe0] sm:$0xff]  ;;  %v7966_v33 = vld [vmem:[#allocation2 + $0xf0] sm:$0xff] }
  0x63   :  { %11009 = vst [vmem:[#allocation18_spill] sm:$0xff] %v7966_v33  ;;  %v7972_v38 = vld [vmem:[#allocation2 + $0x100] sm:$0xff]  ;;  %v7974_v39 = vld [vmem:[#allocation2 + $0x110] sm:$0xff] }
  0x64   :  { %11010 = vst [vmem:[#allocation19_spill] sm:$0xff] %v7972_v38  ;;  %11011 = vst [vmem:[#allocation20_spill] sm:$0xff] %v7974_v39  ;;  %v7980_v44 = vld [vmem:[#allocation2 + $0x120] sm:$0xff]  ;;  %v7982_v45 = vld [vmem:[#allocation2 + $0x130] sm:$0xff] }
  0x65   :  { %11012 = vst [vmem:[#allocation21_spill] sm:$0xff] %v7980_v44  ;;  %11013 = vst [vmem:[#allocation22_spill] sm:$0xff] %v7982_v45  ;;  %v7988_v50 = vld [vmem:[#allocation2 + $0x140] sm:$0xff]  ;;  %v7990_v51 = vld [vmem:[#allocation2 + $0x150] sm:$0xff]  ;;  %v11037_v45 = vunpack.c.l.bf16 %v7920_v3 }
  0x66   :  { %11014 = vst [vmem:[#allocation23_spill] sm:$0xff] %v7988_v50  ;;  %11015 = vst [vmem:[#allocation24_spill] sm:$0xff] %v7990_v51  ;;  %v7996_v56 = vld [vmem:[#allocation2 + $0x160] sm:$0xff]  ;;  %v7998_v57 = vld [vmem:[#allocation2 + $0x170] sm:$0xff]  ;;  %v11036_v50 = vunpack.c.l.bf16 %v7918_v2 }
  0x67   :  { %11016 = vst [vmem:[#allocation25_spill] sm:$0xff] %v7996_v56  ;;  %11017 = vst [vmem:[#allocation26_spill] sm:$0xff] %v7998_v57  ;;  %v8004_v62 = vld [vmem:[#allocation2 + $0x180] sm:$0xff]  ;;  %v8006_v63 = vld [vmem:[#allocation2 + $0x190] sm:$0xff] }
  0x68   :  { %11018 = vst [vmem:[#allocation27_spill] sm:$0xff] %v8004_v62  ;;  %11019 = vst [vmem:[#allocation28_spill] sm:$0xff] %v8006_v63  ;;  %v8012_v52 = vld [vmem:[#allocation2 + $0x1a0] sm:$0xff]  ;;  %v8014_v58 = vld [vmem:[#allocation2 + $0x1b0] sm:$0xff]  ;;  %v1119_v39 = vadd.f32 %v11037_v45, %v11036_v50 }
  0x69   :  { %11020 = vst [vmem:[#allocation29_spill] sm:$0xff] %v8012_v52  ;;  %11021 = vst [vmem:[#allocation30_spill] sm:$0xff] %v8014_v58  ;;  %v8020_v48 = vld [vmem:[#allocation2 + $0x1c0] sm:$0xff]  ;;  %v8022_v0 = vld [vmem:[#allocation2 + $0x1d0] sm:$0xff] }
  0x6a   :  { %v8028_v46 = vld [vmem:[#allocation2 + $0x1e0] sm:$0xff]  ;;  %v8030_v60 = vld [vmem:[#allocation2 + $0x1f0] sm:$0xff]  ;;  %v11040_v44 = vunpack.c.l.bf16 %v8020_v48 }
  0x6b   :  { %v8036_v42 = vld [vmem:[#allocation2 + $0x200] sm:$0xff]  ;;  %v8038_v54 = vld [vmem:[#allocation2 + $0x210] sm:$0xff] }
  0x6c   :  { %v8044_v40 = vld [vmem:[#allocation2 + $0x220] sm:$0xff]  ;;  %v8046_v59 = vld [vmem:[#allocation2 + $0x230] sm:$0xff] }
  0x6d   :  { %v8052_v36 = vld [vmem:[#allocation2 + $0x240] sm:$0xff]  ;;  %v8054_v55 = vld [vmem:[#allocation2 + $0x250] sm:$0xff] }
  0x6e   :  { %v8060_v34 = vld [vmem:[#allocation2 + $0x260] sm:$0xff]  ;;  %v8062_v61 = vld [vmem:[#allocation2 + $0x270] sm:$0xff] }
  0x6f   :  { %v8068_v25 = vld [vmem:[#allocation2 + $0x280] sm:$0xff]  ;;  %v8070_v24 = vld [vmem:[#allocation2 + $0x290] sm:$0xff] }
  0x70   :  { %v8076_v47 = vld [vmem:[#allocation2 + $0x2a0] sm:$0xff]  ;;  %v8078_v31 = vld [vmem:[#allocation2 + $0x2b0] sm:$0xff] }
  0x71   :  { %11022 = vst [vmem:[#allocation31_spill] sm:$0xff] %v8076_v47  ;;  %11023 = vst [vmem:[#allocation32_spill] sm:$0xff] %v8078_v31  ;;  %v8084_v18 = vld [vmem:[#allocation2 + $0x2c0] sm:$0xff]  ;;  %v8086_v23 = vld [vmem:[#allocation2 + $0x2d0] sm:$0xff] }
  0x72   :  { %11024 = vst [vmem:[#allocation33_spill] sm:$0xff] %v8084_v18  ;;  %11025 = vst [vmem:[#allocation34_spill] sm:$0xff] %v8086_v23  ;;  %v8092_v53 = vld [vmem:[#allocation2 + $0x2e0] sm:$0xff]  ;;  %v8094_v29 = vld [vmem:[#allocation2 + $0x2f0] sm:$0xff] }
  0x73   :  { %11026 = vst [vmem:[#allocation35_spill] sm:$0xff] %v8092_v53  ;;  %11027 = vst [vmem:[#allocation36_spill] sm:$0xff] %v8094_v29  ;;  %v8100_v37 = vld [vmem:[#allocation2 + $0x300] sm:$0xff]  ;;  %v8102_v22 = vld [vmem:[#allocation2 + $0x310] sm:$0xff]  ;;  %v11039_v53 = vunpack.c.h.bf16 %v7920_v3  ;;  %v11044_v3 = vunpack.c.l.bf16 %v7922_v4 }
  0x74   :  { %11028 = vst [vmem:[#allocation37_spill] sm:$0xff] %v8100_v37  ;;  %11029 = vst [vmem:[#allocation38_spill] sm:$0xff] %v8102_v22  ;;  %v8108_v16 = vld [vmem:[#allocation2 + $0x320] sm:$0xff]  ;;  %v8110_v30 = vld [vmem:[#allocation2 + $0x330] sm:$0xff] }
  0x75   :  { %11030 = vst [vmem:[#allocation39_spill] sm:$0xff] %v8108_v16  ;;  %11031 = vst [vmem:[#allocation40_spill] sm:$0xff] %v8110_v30  ;;  %v8116_v12 = vld [vmem:[#allocation2 + $0x340] sm:$0xff]  ;;  %v8118_v35 = vld [vmem:[#allocation2 + $0x350] sm:$0xff] }
  0x76   :  { %11032 = vst [vmem:[#allocation41_spill] sm:$0xff] %v8116_v12  ;;  %11033 = vst [vmem:[#allocation42_spill] sm:$0xff] %v8118_v35  ;;  %v8124_v1 = vld [vmem:[#allocation2 + $0x360] sm:$0xff]  ;;  %v8126_v28 = vld [vmem:[#allocation2 + $0x370] sm:$0xff] }
  0x77   :  { %11034 = vst [vmem:[#allocation43_spill] sm:$0xff] %v8124_v1  ;;  %11035 = vst [vmem:[#allocation44_spill] sm:$0xff] %v8126_v28  ;;  %v223_v58 = vld [vmem:[#allocation2 + $0x380] sm:$0xff]  ;;  %v225_v19 = vld [vmem:[#allocation2 + $0x390] sm:$0xff] }
  0x78   :  { %v227_v63 = vld [vmem:[#allocation2 + $0x3a0] sm:$0xff]  ;;  %v8136_v62 = vld [vmem:[#allocation2 + $0x3b0] sm:$0xff]  ;;  %v671_v11 = vunpack.c.l.bf16 %v223_v58  ;;  %v672_v13 = vunpack.c.h.bf16 %v223_v58  ;;  %v675_v12 = vunpack.c.l.bf16 %v225_v19  ;;  %v676_v17 = vunpack.c.h.bf16 %v225_v19 }
  0x79   :  { %v8142_v57 = vld [vmem:[#allocation2 + $0x3c0] sm:$0xff]  ;;  %v8144_v43 = vld [vmem:[#allocation2 + $0x3d0] sm:$0xff]  ;;  %v679_v35 = vunpack.c.l.bf16 %v227_v63  ;;  %v680_v10 = vunpack.c.h.bf16 %v227_v63  ;;  %v683_v52 = vunpack.c.l.bf16 %v8136_v62  ;;  %v684_v51 = vunpack.c.h.bf16 %v8136_v62 }
  0x7a   :  { %v8150_v56 = vld [vmem:[#allocation2 + $0x3e0] sm:$0xff]  ;;  %v8152_v41 = vld [vmem:[#allocation2 + $0x3f0] sm:$0xff]  ;;  %v687_v49 = vunpack.c.l.bf16 %v8142_v57  ;;  %v688_v58 = vunpack.c.h.bf16 %v8142_v57  ;;  %v691_v28 = vunpack.c.l.bf16 %v8144_v43  ;;  %v692_v37 = vunpack.c.h.bf16 %v8144_v43 }
  0x7b   :  { %v8155_v30 = vld [vmem:[#allocation2 + $0x400] sm:$0xff]  ;;  %v8157_v22 = vld [vmem:[#allocation2 + $0x410] sm:$0xff]  ;;  %v11038_v62 = vunpack.c.h.bf16 %v7918_v2  ;;  %v11041_v43 = vunpack.c.l.bf16 %v8022_v0  ;;  %v11042_v19 = vunpack.c.h.bf16 %v8020_v48  ;;  %v11043_v63 = vunpack.c.h.bf16 %v8022_v0 }
  0x7c   :  { %v8160_v1 = vld [vmem:[#allocation2 + $0x420] sm:$0xff]  ;;  %v8162_v16 = vld [vmem:[#allocation2 + $0x430] sm:$0xff]  ;;  %v1440_v45 = vadd.f32 %v675_v12, %v671_v11  ;;  %v1473_v50 = vadd.f32 %v676_v17, %v672_v13  ;;  %v11047_v0 = vunpack.c.h.bf16 %v8028_v46  ;;  %v11048_v17 = vunpack.c.l.bf16 %v7924_v5 }
  0x7d   :  { %v8172_v29 = vld [vmem:[#allocation2 + $0x440] sm:$0xff]  ;;  %v8182_v23 = vld [vmem:[#allocation2 + $0x450] sm:$0xff]  ;;  %v1152_v57 = vadd.f32 %v11039_v53, %v11038_v62  ;;  %v1280_v18 = vadd.f32 %v11041_v43, %v11040_v44  ;;  %v1313_v38 = vadd.f32 %v11043_v63, %v11042_v19  ;;  %v716_v31 = vunpack.c.h.bf16 %v8162_v16 }
  0x7e   :  { %v719_v33 = vunpack.c.l.bf16 %v8172_v29  ;;  %v8202_v2 = vld [vmem:[#allocation2 + $0x460] sm:$0xff]  ;;  %v1120_v53 = vadd.f32 %v1119_v39, %v11044_v3  ;;  %v11045_v62 = vunpack.c.h.bf16 %v7922_v4  ;;  %v11046_v44 = vunpack.c.l.bf16 %v8028_v46  ;;  %v8214_v13 = vld [vmem:[#allocation2 + $0x470] sm:$0xff] }
  0x7f   :  { %v1314_v19 = vadd.f32 %v1313_v38, %v11047_v0  ;;  %v720_v63 = vunpack.c.h.bf16 %v8172_v29  ;;  %v723_v43 = vunpack.c.l.bf16 %v8182_v23  ;;  %v1441_v11 = vadd.f32 %v1440_v45, %v679_v35  ;;  %v8226_v45 = vld [vmem:[#allocation2 + $0x480] sm:$0xff] }
  0x80   :  { %v1153_v47 = vadd.f32 %v1152_v57, %v11045_v62  ;;  %v1281_v48 = vadd.f32 %v1280_v18, %v11046_v44  ;;  %v1474_v12 = vadd.f32 %v1473_v50, %v680_v10  ;;  %v1121_v39 = vadd.f32 %v1120_v53, %v11048_v17 }
  0x81   :  { %v11049_v4 = vunpack.c.h.bf16 %v7924_v5  ;;  %v11050_v3 = vunpack.c.l.bf16 %v8030_v60  ;;  %v11051_v46 = vunpack.c.h.bf16 %v8030_v60  ;;  %v724_v62 = vunpack.c.h.bf16 %v8182_v23 }
  0x82   :  { %v727_v44 = vunpack.c.l.bf16 %v8202_v2  ;;  %v1442_v35 = vadd.f32 %v1441_v11, %v683_v52  ;;  %v1475_v10 = vadd.f32 %v1474_v12, %v684_v51  ;;  %v11052_v50 = vunpack.c.l.bf16 %v7926_v6  ;;  %v8238_v11 = vld [vmem:[#allocation2 + $0x490] sm:$0xff] }
  0x83   :  { %v1154_v57 = vadd.f32 %v1153_v47, %v11049_v4  ;;  %v1282_v18 = vadd.f32 %v1281_v48, %v11050_v3  ;;  %v1315_v38 = vadd.f32 %v1314_v19, %v11051_v46  ;;  %v11053_v5 = vunpack.c.h.bf16 %v7926_v6 }
  0x84   :  { %v1122_v53 = vadd.f32 %v1121_v39, %v11052_v50  ;;  %v11054_v0 = vunpack.c.l.bf16 %v8036_v42  ;;  %v11055_v60 = vunpack.c.h.bf16 %v8036_v42  ;;  %v728_v17 = vunpack.c.h.bf16 %v8202_v2 }
  0x85   :  { %v1155_v47 = vadd.f32 %v1154_v57, %v11053_v5  ;;  %v731_v4 = vunpack.c.l.bf16 %v8214_v13  ;;  %v1443_v52 = vadd.f32 %v1442_v35, %v687_v49  ;;  %v1476_v51 = vadd.f32 %v1475_v10, %v688_v58  ;;  %v8250_v35 = vld [vmem:[#allocation2 + $0x4a0] sm:$0xff] }
  0x86   :  { %v1283_v48 = vadd.f32 %v1282_v18, %v11054_v0  ;;  %v1316_v19 = vadd.f32 %v1315_v38, %v11055_v60  ;;  %v11056_v12 = vunpack.c.l.bf16 %v7928_v7  ;;  %v11057_v6 = vunpack.c.h.bf16 %v7928_v7 }
  0x87   :  { %v11058_v3 = vunpack.c.l.bf16 %v8038_v54  ;;  %v11059_v42 = vunpack.c.h.bf16 %v8038_v54  ;;  %v732_v38 = vunpack.c.h.bf16 %v8214_v13  ;;  %v735_v50 = vunpack.c.l.bf16 %v8226_v45 }
  0x88   :  { %v1123_v39 = vadd.f32 %v1122_v53, %v11056_v12  ;;  %v1156_v57 = vadd.f32 %v1155_v47, %v11057_v6  ;;  %v1444_v49 = vadd.f32 %v1443_v52, %v691_v28  ;;  %v1477_v58 = vadd.f32 %v1476_v51, %v692_v37  ;;  %v8266_v12 = vld [vmem:[#allocation2 + $0x4b0] sm:$0xff] }
  0x89   :  { %v1284_v18 = vadd.f32 %v1283_v48, %v11058_v3  ;;  %v1317_v46 = vadd.f32 %v1316_v19, %v11059_v42  ;;  %v11060_v10 = vunpack.c.l.bf16 %v7930_v8  ;;  %v11061_v7 = vunpack.c.h.bf16 %v7930_v8 }
  0x8a   :  { %v11062_v47 = vunpack.c.l.bf16 %v8044_v40  ;;  %v11063_v54 = vunpack.c.h.bf16 %v8044_v40  ;;  %v736_v60 = vunpack.c.h.bf16 %v8226_v45  ;;  %v739_v19 = vunpack.c.l.bf16 %v8238_v11 }
  0x8b   :  { %v1124_v53 = vadd.f32 %v1123_v39, %v11060_v10  ;;  %v1157_v5 = vadd.f32 %v1156_v57, %v11061_v7  ;;  %v11064_v28 = vunpack.c.l.bf16 %v8150_v56  ;;  %v11065_v52 = vunpack.c.h.bf16 %v8150_v56 }
  0x8c   :  { %v1285_v0 = vadd.f32 %v1284_v18, %v11062_v47  ;;  %v1318_v48 = vadd.f32 %v1317_v46, %v11063_v54  ;;  %v11066_v8 = vunpack.c.l.bf16 %v7932_v9  ;;  %v11067_v6 = vunpack.c.h.bf16 %v7932_v9 }
  0x8d   :  { %v1445_v37 = vadd.f32 %v1444_v49, %v11064_v28  ;;  %v1478_v51 = vadd.f32 %v1477_v58, %v11065_v52  ;;  %v11068_v40 = vunpack.c.l.bf16 %v8046_v59  ;;  %v11069_v18 = vunpack.c.h.bf16 %v8046_v59 }
  0x8e   :  { %v1125_v39 = vadd.f32 %v1124_v53, %v11066_v8  ;;  %v1158_v57 = vadd.f32 %v1157_v5, %v11067_v6  ;;  %v740_v46 = vunpack.c.h.bf16 %v8238_v11  ;;  %v743_v49 = vunpack.c.l.bf16 %v8250_v35  ;;  %v8282_v53 = vld [vmem:[#allocation2 + $0x4c0] sm:$0xff] }
  0x8f   :  { %v1286_v3 = vadd.f32 %v1285_v0, %v11068_v40  ;;  %v1319_v42 = vadd.f32 %v1318_v48, %v11069_v18  ;;  %v11070_v56 = vunpack.c.l.bf16 %v8152_v41  ;;  %v11071_v10 = vunpack.c.h.bf16 %v8152_v41 }
  0x90   :  { %v11072_v9 = vunpack.c.l.bf16 %v7940_v14  ;;  %v11073_v47 = vunpack.c.h.bf16 %v7940_v14  ;;  %v11074_v59 = vunpack.c.l.bf16 %v8052_v36  ;;  %v11075_v48 = vunpack.c.h.bf16 %v8052_v36 }
  0x91   :  { %v1446_v58 = vadd.f32 %v1445_v37, %v11070_v56  ;;  %v1479_v7 = vadd.f32 %v1478_v51, %v11071_v10  ;;  %v744_v52 = vunpack.c.h.bf16 %v8250_v35  ;;  %v747_v37 = vunpack.c.l.bf16 %v8266_v12 }
  0x92   :  { %v1126_v5 = vadd.f32 %v1125_v39, %v11072_v9  ;;  %v1159_v0 = vadd.f32 %v1158_v57, %v11073_v47  ;;  %v1287_v54 = vadd.f32 %v1286_v3, %v11074_v59  ;;  %v1320_v28 = vadd.f32 %v1319_v42, %v11075_v48  ;;  %v8298_v39 = vld [vmem:[#allocation2 + $0x4d0] sm:$0xff] }
  0x93   :  { %v11076_v41 = vunpack.c.l.bf16 %v8155_v30  ;;  %v11077_v8 = vunpack.c.h.bf16 %v8155_v30  ;;  %v11078_v14 = vunpack.c.l.bf16 %v7942_v15  ;;  %v11079_v40 = vunpack.c.h.bf16 %v7942_v15 }
  0x94   :  { %v11080_v36 = vunpack.c.l.bf16 %v8054_v55  ;;  %v11081_v42 = vunpack.c.h.bf16 %v8054_v55  ;;  %v748_v10 = vunpack.c.h.bf16 %v8266_v12  ;;  %v11082_v30 = vunpack.c.l.bf16 %v8157_v22 }
  0x95   :  { %v1447_v51 = vadd.f32 %v1446_v58, %v11076_v41  ;;  %v1480_v6 = vadd.f32 %v1479_v7, %v11077_v8  ;;  %v1127_v57 = vadd.f32 %v1126_v5, %v11078_v14  ;;  %v1160_v3 = vadd.f32 %v1159_v0, %v11079_v40  ;;  %v8314_v5 = vld [vmem:[#allocation2 + $0x4e0] sm:$0xff] }
  0x96   :  { %v1288_v18 = vadd.f32 %v1287_v54, %v11080_v36  ;;  %v1321_v56 = vadd.f32 %v1320_v28, %v11081_v42  ;;  %v751_v58 = vunpack.c.l.bf16 %v8282_v53  ;;  %v11083_v9 = vunpack.c.h.bf16 %v8157_v22 }
  0x97   :  { %v1448_v7 = vadd.f32 %v1447_v51, %v11082_v30  ;;  %v11084_v15 = vunpack.c.l.bf16 %v7948_v20  ;;  %v11085_v59 = vunpack.c.h.bf16 %v7948_v20  ;;  %v11086_v55 = vunpack.c.l.bf16 %v8060_v34 }
  0x98   :  { %v1481_v47 = vadd.f32 %v1480_v6, %v11083_v9  ;;  %v11087_v28 = vunpack.c.h.bf16 %v8060_v34  ;;  %v752_v8 = vunpack.c.h.bf16 %v8282_v53  ;;  %v755_v51 = vunpack.c.l.bf16 %v8298_v39 }
  0x99   :  { %v1128_v0 = vadd.f32 %v1127_v57, %v11084_v15  ;;  %v1161_v54 = vadd.f32 %v1160_v3, %v11085_v59  ;;  %v1289_v48 = vadd.f32 %v1288_v18, %v11086_v55  ;;  %v11088_v22 = vunpack.c.l.bf16 %v8160_v1  ;;  %v8330_v57 = vld [vmem:[#allocation2 + $0x4f0] sm:$0xff] }
  0x9a   :  { %v1322_v41 = vadd.f32 %v1321_v56, %v11087_v28  ;;  %v11089_v14 = vunpack.c.h.bf16 %v8160_v1  ;;  %v11090_v20 = vunpack.c.l.bf16 %v7950_v21  ;;  %v11091_v36 = vunpack.c.h.bf16 %v7950_v21 }
  0x9b   :  { %v1449_v6 = vadd.f32 %v1448_v7, %v11088_v22  ;;  %v11092_v34 = vunpack.c.l.bf16 %v8062_v61  ;;  %v11093_v56 = vunpack.c.h.bf16 %v8062_v61  ;;  %v756_v9 = vunpack.c.h.bf16 %v8298_v39  ;;  %v8516_v39 = vld [vmem:[#allocation2 + $0x78] sm:$0xff] }
  0x9c   :  { %v1482_v40 = vadd.f32 %v1481_v47, %v11089_v14  ;;  %v1129_v3 = vadd.f32 %v1128_v0, %v11090_v20  ;;  %v1162_v18 = vadd.f32 %v1161_v54, %v11091_v36  ;;  %v759_v7 = vunpack.c.l.bf16 %v8314_v5  ;;  %v8346_v0 = vld [vmem:[#allocation2 + $0x500] sm:$0xff]  ;;  %v8362_v14 = vld [vmem:[#allocation2 + $0x510] sm:$0xff] }
  0x9d   :  { %v1290_v42 = vadd.f32 %v1289_v48, %v11092_v34  ;;  %v1323_v30 = vadd.f32 %v1322_v41, %v11093_v56  ;;  %v11094_v1 = vunpack.c.l.bf16 %v8162_v16  ;;  %v11095_v21 = vunpack.c.l.bf16 %v7956_v26  ;;  %v8378_v56 = vld [vmem:[#allocation2 + $0x520] sm:$0xff] }
  0x9e   :  { %v1483_v15 = vadd.f32 %v1482_v40, %v716_v31  ;;  %v11096_v54 = vunpack.c.h.bf16 %v7956_v26  ;;  %v11097_v61 = vunpack.c.l.bf16 %v8068_v25  ;;  %v11098_v28 = vunpack.c.h.bf16 %v8068_v25 }
  0x9f   :  { %v1450_v47 = vadd.f32 %v1449_v6, %v11094_v1  ;;  %v1130_v59 = vadd.f32 %v1129_v3, %v11095_v21  ;;  %v760_v22 = vunpack.c.h.bf16 %v8314_v5  ;;  %v763_v6 = vunpack.c.l.bf16 %v8330_v57 }
  0xa0   :  { %v1163_v55 = vadd.f32 %v1162_v18, %v11096_v54  ;;  %v1291_v48 = vadd.f32 %v1290_v42, %v11097_v61  ;;  %v1324_v41 = vadd.f32 %v1323_v30, %v11098_v28  ;;  %v1484_v31 = vadd.f32 %v1483_v15, %v720_v63  ;;  %v8394_v61 = vld [vmem:[#allocation2 + $0x530] sm:$0xff] }
  0xa1   :  { %v1451_v16 = vadd.f32 %v1450_v47, %v719_v33  ;;  %v11099_v26 = vunpack.c.l.bf16 %v7958_v27  ;;  %v11100_v20 = vunpack.c.h.bf16 %v7958_v27  ;;  %v11101_v25 = vunpack.c.l.bf16 %v8070_v24 }
  0xa2   :  { %v11102_v18 = vunpack.c.h.bf16 %v8070_v24  ;;  %v764_v42 = vunpack.c.h.bf16 %v8330_v57  ;;  %v767_v33 = vunpack.c.l.bf16 %v8346_v0  ;;  %v1485_v63 = vadd.f32 %v1484_v31, %v724_v62  ;;  %v11105_v24 = vld [vmem:[#allocation31_spill] sm:$0xff]  ;;  %v11111_v31 = vld [vmem:[#allocation32_spill] sm:$0xff] }
  0xa3   :  { %v1131_v40 = vadd.f32 %v1130_v59, %v11099_v26  ;;  %v1164_v3 = vadd.f32 %v1163_v55, %v11100_v20  ;;  %v1292_v36 = vadd.f32 %v1291_v48, %v11101_v25  ;;  %v1452_v29 = vadd.f32 %v1451_v16, %v723_v43 }
  0xa4   :  { %v1325_v34 = vadd.f32 %v1324_v41, %v11102_v18  ;;  %v11103_v27 = vunpack.c.l.bf16 %v7964_v32  ;;  %v11104_v1 = vunpack.c.h.bf16 %v7964_v32  ;;  %v11106_v15 = vunpack.c.l.bf16 %v11105_v24  ;;  %v11108_v32 = vld [vmem:[#allocation18_spill] sm:$0xff] }
  0xa5   :  { %v11107_v59 = vunpack.c.h.bf16 %v11105_v24  ;;  %v768_v55 = vunpack.c.h.bf16 %v8346_v0  ;;  %v771_v43 = vunpack.c.l.bf16 %v8362_v14  ;;  %v1453_v23 = vadd.f32 %v1452_v29, %v727_v44 }
  0xa6   :  { %v1132_v30 = vadd.f32 %v1131_v40, %v11103_v27  ;;  %v1165_v47 = vadd.f32 %v1164_v3, %v11104_v1  ;;  %v1293_v21 = vadd.f32 %v1292_v36, %v11106_v15  ;;  %v1486_v62 = vadd.f32 %v1485_v63, %v728_v17  ;;  %v11114_v36 = vld [vmem:[#allocation19_spill] sm:$0xff]  ;;  %v11117_v27 = vld [vmem:[#allocation33_spill] sm:$0xff] }
  0xa7   :  { %v1326_v54 = vadd.f32 %v1325_v34, %v11107_v59  ;;  %v11109_v48 = vunpack.c.l.bf16 %v11108_v32  ;;  %v11110_v41 = vunpack.c.h.bf16 %v11108_v32  ;;  %v11112_v26 = vunpack.c.l.bf16 %v11111_v31  ;;  %v8418_v15 = vld [vmem:[#allocation2 + $0x8] sm:$0xff] }
  0xa8   :  { %v11113_v20 = vunpack.c.h.bf16 %v11111_v31  ;;  %v772_v25 = vunpack.c.h.bf16 %v8362_v14  ;;  %v775_v44 = vunpack.c.l.bf16 %v8378_v56  ;;  %v1454_v2 = vadd.f32 %v1453_v23, %v731_v4  ;;  %v11120_v59 = vld [vmem:[#allocation20_spill] sm:$0xff] }
  0xa9   :  { %v1133_v28 = vadd.f32 %v1132_v30, %v11109_v48  ;;  %v1166_v16 = vadd.f32 %v1165_v47, %v11110_v41  ;;  %v1294_v40 = vadd.f32 %v1293_v21, %v11112_v26  ;;  %v1487_v17 = vadd.f32 %v1486_v62, %v732_v38  ;;  %v11123_v48 = vld [vmem:[#allocation34_spill] sm:$0xff] }
  0xaa   :  { %v1327_v3 = vadd.f32 %v1326_v54, %v11113_v20  ;;  %v11115_v18 = vunpack.c.l.bf16 %v11114_v36  ;;  %v11116_v29 = vunpack.c.h.bf16 %v11114_v36  ;;  %v11118_v30 = vunpack.c.l.bf16 %v11117_v27  ;;  %v8434_v26 = vld [vmem:[#allocation2 + $0x18] sm:$0xff]  ;;  %v11126_v20 = vld [vmem:[#allocation21_spill] sm:$0xff] }
  0xab   :  { %v11119_v47 = vunpack.c.h.bf16 %v11117_v27  ;;  %v776_v21 = vunpack.c.h.bf16 %v8378_v56  ;;  %v779_v4 = vunpack.c.l.bf16 %v8394_v61  ;;  %v1455_v13 = vadd.f32 %v1454_v2, %v735_v50 }
  0xac   :  { %v1134_v34 = vadd.f32 %v1133_v28, %v11115_v18  ;;  %v1167_v63 = vadd.f32 %v1166_v16, %v11116_v29  ;;  %v1295_v1 = vadd.f32 %v1294_v40, %v11118_v30  ;;  %v1488_v38 = vadd.f32 %v1487_v17, %v736_v60  ;;  %v11129_v18 = vld [vmem:[#allocation35_spill] sm:$0xff]  ;;  %v8450_v30 = vld [vmem:[#allocation2 + $0x28] sm:$0xff] }
  0xad   :  { %v1328_v24 = vadd.f32 %v1327_v3, %v11119_v47  ;;  %v11121_v54 = vunpack.c.l.bf16 %v11120_v59  ;;  %v11122_v62 = vunpack.c.h.bf16 %v11120_v59  ;;  %v11124_v28 = vunpack.c.l.bf16 %v11123_v48  ;;  %v11132_v47 = vld [vmem:[#allocation22_spill] sm:$0xff]  ;;  %v8764_v60 = vld [vmem:[#allocation2 + $0x368] sm:$0xff] }
  0xae   :  { %v11125_v16 = vunpack.c.h.bf16 %v11123_v48  ;;  %v780_v40 = vunpack.c.h.bf16 %v8394_v61  ;;  %v1456_v45 = vadd.f32 %v1455_v13, %v739_v19  ;;  %v1489_v50 = vadd.f32 %v1488_v38, %v740_v46  ;;  %v8846_v46 = vld [vmem:[#allocation2 + $0x478] sm:$0xff] }
  0xaf   :  { %v1135_v23 = vadd.f32 %v1134_v34, %v11121_v54  ;;  %v1168_v32 = vadd.f32 %v1167_v63, %v11122_v62  ;;  %v1296_v41 = vadd.f32 %v1295_v1, %v11124_v28  ;;  %v11127_v3 = vunpack.c.l.bf16 %v11126_v20  ;;  %v11135_v54 = vld [vmem:[#allocation36_spill] sm:$0xff] }
  0xb0   :  { %v1329_v31 = vadd.f32 %v1328_v24, %v11125_v16  ;;  %v11128_v17 = vunpack.c.h.bf16 %v11126_v20  ;;  %v11130_v34 = vunpack.c.l.bf16 %v11129_v18  ;;  %v11131_v63 = vunpack.c.h.bf16 %v11129_v18  ;;  %v11138_v16 = vld [vmem:[#allocation23_spill] sm:$0xff]  ;;  %v8748_v28 = vld [vmem:[#allocation2 + $0x328] sm:$0xff] }
  0xb1   :  { %v1136_v2 = vadd.f32 %v1135_v23, %v11127_v3  ;;  %v1457_v11 = vadd.f32 %v1456_v45, %v743_v49  ;;  %v1490_v19 = vadd.f32 %v1489_v50, %v744_v52  ;;  %v11133_v24 = vunpack.c.l.bf16 %v11132_v47  ;;  %v8466_v49 = vld [vmem:[#allocation2 + $0x38] sm:$0xff]  ;;  %v11141_v3 = vld [vmem:[#allocation37_spill] sm:$0xff] }
  0xb2   :  { %v1169_v36 = vadd.f32 %v1168_v32, %v11128_v17  ;;  %v1297_v29 = vadd.f32 %v1296_v41, %v11130_v34  ;;  %v1330_v27 = vadd.f32 %v1329_v31, %v11131_v63  ;;  %v11134_v38 = vunpack.c.h.bf16 %v11132_v47  ;;  %v11144_v63 = vld [vmem:[#allocation24_spill] sm:$0xff]  ;;  %v8746_v34 = vld [vmem:[#allocation2 + $0x318] sm:$0xff]  ;;  %11199 = vst [vmem:[#allocation37_spill] sm:$0xff] %v8748_v28 }
  0xb3   :  { %v1137_v13 = vadd.f32 %v1136_v2, %v11133_v24  ;;  %v11136_v23 = vunpack.c.l.bf16 %v11135_v54  ;;  %v11137_v32 = vunpack.c.h.bf16 %v11135_v54  ;;  %v1458_v35 = vadd.f32 %v1457_v11, %v747_v37  ;;  %v8482_v37 = vld [vmem:[#allocation2 + $0x48] sm:$0xff]  ;;  %v11147_v24 = vld [vmem:[#allocation38_spill] sm:$0xff]  ;;  %11198 = vst [vmem:[#allocation23_spill] sm:$0xff] %v8746_v34 }
  0xb4   :  { %v1170_v59 = vadd.f32 %v1169_v36, %v11134_v38  ;;  %v1491_v52 = vadd.f32 %v1490_v19, %v748_v10  ;;  %v11139_v31 = vunpack.c.l.bf16 %v11138_v16  ;;  %v11140_v50 = vunpack.c.h.bf16 %v11138_v16  ;;  %v8744_v41 = vld [vmem:[#allocation2 + $0x308] sm:$0xff]  ;;  %v8806_v28 = vld [vmem:[#allocation2 + $0x3f8] sm:$0xff] }
  0xb5   :  { %v1298_v62 = vadd.f32 %v1297_v29, %v11136_v23  ;;  %v1331_v48 = vadd.f32 %v1330_v27, %v11137_v32  ;;  %v11142_v2 = vunpack.c.l.bf16 %v11141_v3  ;;  %v11143_v36 = vunpack.c.h.bf16 %v11141_v3  ;;  %v8504_v23 = vld [vmem:[#allocation2 + $0x68] sm:$0xff]  ;;  %11197 = vst [vmem:[#allocation36_spill] sm:$0xff] %v8744_v41 }
  0xb6   :  { %v1138_v45 = vadd.f32 %v1137_v13, %v11139_v31  ;;  %v1171_v20 = vadd.f32 %v1170_v59, %v11140_v50  ;;  %v1459_v12 = vadd.f32 %v1458_v35, %v751_v58  ;;  %v1492_v10 = vadd.f32 %v1491_v52, %v752_v8  ;;  %v8498_v58 = vld [vmem:[#allocation2 + $0x58] sm:$0xff]  ;;  %v8724_v32 = vld [vmem:[#allocation2 + $0x2c8] sm:$0xff] }
  0xb7   :  { %v1299_v17 = vadd.f32 %v1298_v62, %v11142_v2  ;;  %v1332_v18 = vadd.f32 %v1331_v48, %v11143_v36  ;;  %v11145_v27 = vunpack.c.l.bf16 %v11144_v63  ;;  %v11146_v19 = vunpack.c.h.bf16 %v11144_v63  ;;  %v11150_v48 = vld [vmem:[#allocation25_spill] sm:$0xff]  ;;  %11193 = vst [vmem:[#allocation34_spill] sm:$0xff] %v8724_v32  ;;  %v8786_v32 = vld [vmem:[#allocation2 + $0x3b8] sm:$0xff] }
  0xb8   :  { %v11148_v13 = vunpack.c.l.bf16 %v11147_v24  ;;  %v11149_v59 = vunpack.c.h.bf16 %v11147_v24  ;;  %v1460_v53 = vadd.f32 %v1459_v12, %v755_v51  ;;  %v1493_v8 = vadd.f32 %v1492_v10, %v756_v9  ;;  %v8716_v36 = vld [vmem:[#allocation2 + $0x2a8] sm:$0xff] }
  0xb9   :  { %v1139_v11 = vadd.f32 %v1138_v45, %v11145_v27  ;;  %v1172_v47 = vadd.f32 %v1171_v20, %v11146_v19  ;;  %v11151_v35 = vunpack.c.l.bf16 %v11150_v48  ;;  %v11152_v16 = vunpack.c.h.bf16 %v11150_v48  ;;  %v11153_v45 = vld [vmem:[#allocation39_spill] sm:$0xff]  ;;  %11191 = vst [vmem:[#allocation33_spill] sm:$0xff] %v8716_v36  ;;  %v8732_v29 = vld [vmem:[#allocation2 + $0x2e8] sm:$0xff] }
  0xba   :  { %v1300_v38 = vadd.f32 %v1299_v17, %v11148_v13  ;;  %v1333_v54 = vadd.f32 %v1332_v18, %v11149_v59  ;;  %v11154_v50 = vunpack.c.l.bf16 %v11153_v45  ;;  %v11155_v51 = vunpack.c.h.bf16 %v11153_v45  ;;  %v11156_v18 = vld [vmem:[#allocation26_spill] sm:$0xff]  ;;  %11195 = vst [vmem:[#allocation35_spill] sm:$0xff] %v8732_v29  ;;  %11203 = vst [vmem:[#allocation39_spill] sm:$0xff] %v8764_v60  ;;  %v8780_v36 = vld [vmem:[#allocation2 + $0x3a8] sm:$0xff] }
  0xbb   :  { %v1140_v52 = vadd.f32 %v1139_v11, %v11151_v35  ;;  %v1173_v31 = vadd.f32 %v1172_v47, %v11152_v16  ;;  %v1461_v9 = vadd.f32 %v1460_v53, %v759_v7  ;;  %v1494_v2 = vadd.f32 %v1493_v8, %v760_v22  ;;  %v11159_v11 = vld [vmem:[#allocation40_spill] sm:$0xff]  ;;  %v8754_v59 = vld [vmem:[#allocation2 + $0x338] sm:$0xff] }
  0xbc   :  { %v1301_v20 = vadd.f32 %v1300_v38, %v11154_v50  ;;  %v1334_v3 = vadd.f32 %v1333_v54, %v11155_v51  ;;  %v11157_v12 = vunpack.c.l.bf16 %v11156_v18  ;;  %v11158_v63 = vunpack.c.h.bf16 %v11156_v18  ;;  %v8532_v7 = vld [vmem:[#allocation2 + $0x88] sm:$0xff]  ;;  %v11162_v54 = vld [vmem:[#allocation27_spill] sm:$0xff]  ;;  %11200 = vst [vmem:[#allocation24_spill] sm:$0xff] %v8754_v59 }
  0xbd   :  { %v11160_v19 = vunpack.c.l.bf16 %v11159_v11  ;;  %v11161_v24 = vunpack.c.h.bf16 %v11159_v11  ;;  %v1462_v5 = vadd.f32 %v1461_v9, %v763_v6  ;;  %v1495_v22 = vadd.f32 %v1494_v2, %v764_v42  ;;  %v8548_v6 = vld [vmem:[#allocation2 + $0x98] sm:$0xff]  ;;  %v8792_v29 = vld [vmem:[#allocation2 + $0x3c8] sm:$0xff]  ;;  %11206 = vst [vmem:[#allocation27_spill] sm:$0xff] %v8806_v28 }
  0xbe   :  { %v1141_v10 = vadd.f32 %v1140_v52, %v11157_v12  ;;  %v1174_v27 = vadd.f32 %v1173_v31, %v11158_v63  ;;  %v11163_v53 = vunpack.c.l.bf16 %v11162_v54  ;;  %v11164_v48 = vunpack.c.h.bf16 %v11162_v54  ;;  %v11165_v52 = vld [vmem:[#allocation41_spill] sm:$0xff]  ;;  %v8766_v38 = vld [vmem:[#allocation2 + $0x378] sm:$0xff] }
  0xbf   :  { %v1302_v47 = vadd.f32 %v1301_v20, %v11160_v19  ;;  %v1335_v13 = vadd.f32 %v1334_v3, %v11161_v24  ;;  %v11166_v16 = vunpack.c.l.bf16 %v11165_v52  ;;  %v11167_v45 = vunpack.c.h.bf16 %v11165_v52  ;;  %v11168_v3 = vld [vmem:[#allocation28_spill] sm:$0xff]  ;;  %11204 = vst [vmem:[#allocation26_spill] sm:$0xff] %v8766_v38 }
  0xc0   :  { %v1142_v8 = vadd.f32 %v1141_v10, %v11163_v53  ;;  %v1175_v35 = vadd.f32 %v1174_v27, %v11164_v48  ;;  %v1463_v57 = vadd.f32 %v1462_v5, %v767_v33  ;;  %v1496_v42 = vadd.f32 %v1495_v22, %v768_v55  ;;  %v11171_v10 = vld [vmem:[#allocation42_spill] sm:$0xff]  ;;  %v8564_v33 = vld [vmem:[#allocation2 + $0xa8] sm:$0xff] }
  0xc1   :  { %v1303_v31 = vadd.f32 %v1302_v47, %v11166_v16  ;;  %v1336_v50 = vadd.f32 %v1335_v13, %v11167_v45  ;;  %v11169_v9 = vunpack.c.l.bf16 %v11168_v3  ;;  %v11170_v18 = vunpack.c.h.bf16 %v11168_v3  ;;  %v11174_v13 = vld [vmem:[#allocation29_spill] sm:$0xff] }
  0xc2   :  { %v11172_v63 = vunpack.c.l.bf16 %v11171_v10  ;;  %v11173_v11 = vunpack.c.h.bf16 %v11171_v10  ;;  %v1464_v0 = vadd.f32 %v1463_v57, %v771_v43  ;;  %v1497_v55 = vadd.f32 %v1496_v42, %v772_v25  ;;  %v8580_v43 = vld [vmem:[#allocation2 + $0xb8] sm:$0xff]  ;;  %v8708_v47 = vld [vmem:[#allocation2 + $0x288] sm:$0xff] }
  0xc3   :  { %v1143_v2 = vadd.f32 %v1142_v8, %v11169_v9  ;;  %v1176_v12 = vadd.f32 %v1175_v35, %v11170_v18  ;;  %v11175_v5 = vunpack.c.l.bf16 %v11174_v13  ;;  %v11176_v54 = vunpack.c.h.bf16 %v11174_v13  ;;  %v11177_v8 = vld [vmem:[#allocation43_spill] sm:$0xff]  ;;  %v8756_v20 = vld [vmem:[#allocation2 + $0x348] sm:$0xff] }
  0xc4   :  { %v1304_v27 = vadd.f32 %v1303_v31, %v11172_v63  ;;  %v1337_v19 = vadd.f32 %v1336_v50, %v11173_v11  ;;  %v11178_v48 = vunpack.c.l.bf16 %v11177_v8  ;;  %v11179_v52 = vunpack.c.h.bf16 %v11177_v8  ;;  %v11180_v50 = vld [vmem:[#allocation30_spill] sm:$0xff]  ;;  %v8700_v31 = vld [vmem:[#allocation2 + $0x268] sm:$0xff]  ;;  %11201 = vst [vmem:[#allocation38_spill] sm:$0xff] %v8756_v20 }
  0xc5   :  { %v1144_v22 = vadd.f32 %v1143_v2, %v11175_v5  ;;  %v1177_v53 = vadd.f32 %v1176_v12, %v11176_v54  ;;  %v1465_v14 = vadd.f32 %v1464_v0, %v775_v44  ;;  %v1498_v25 = vadd.f32 %v1497_v55, %v776_v21  ;;  %v11183_v2 = vld [vmem:[#allocation44_spill] sm:$0xff]  ;;  %v8604_v5 = vld [vmem:[#allocation2 + $0xd8] sm:$0xff] }
  0xc6   :  { %v1305_v35 = vadd.f32 %v1304_v27, %v11178_v48  ;;  %v1338_v16 = vadd.f32 %v1337_v19, %v11179_v52  ;;  %v11181_v57 = vunpack.c.l.bf16 %v11180_v50  ;;  %v11182_v3 = vunpack.c.h.bf16 %v11180_v50  ;;  %v8596_v44 = vld [vmem:[#allocation2 + $0xc8] sm:$0xff]  ;;  %v8671_v50 = vld [vmem:[#allocation2 + $0x1f8] sm:$0xff] }
  0xc7   :  { %v11184_v18 = vunpack.c.l.bf16 %v11183_v2  ;;  %v11185_v10 = vunpack.c.h.bf16 %v11183_v2  ;;  %v1466_v56 = vadd.f32 %v1465_v14, %v779_v4  ;;  %v1499_v21 = vadd.f32 %v1498_v25, %v780_v40  ;;  %v11186_v14 = vld [vmem:[#allocation17_spill] sm:$0xff]  ;;  %v8631_v4 = vld [vmem:[#allocation2 + $0x158] sm:$0xff] }
  0xc8   :  { %v1145_v42 = vadd.f32 %v1144_v22, %v11181_v57  ;;  %v1178_v9 = vadd.f32 %v1177_v53, %v11182_v3  ;;  %vm2086_vm2 = vcmp.lt.s32.totalorder %v11186_v14, 224  ;;  %v8623_v25 = vld [vmem:[#allocation2 + $0x128] sm:$0xff]  ;;  %v8734_v53 = vld [vmem:[#allocation2 + $0x2f8] sm:$0xff]  ;;  %v11213_v14 = vunpack.c.l.bf16 %v8418_v15 }
  0xc9   :  { %v1306_v12 = vadd.f32 %v1305_v35, %v11184_v18  ;;  %v1339_v63 = vadd.f32 %v1338_v16, %v11185_v10  ;;  %v1467_v22 = vrot.slane %v1466_v56, 4  ;;  %v1500_v54 = vrot.slane %v1499_v21, 4  ;;  %v8608_v35 = vld [vmem:[#allocation2 + $0xe8] sm:$0xff]  ;;  %11196 = vst [vmem:[#allocation22_spill] sm:$0xff] %v8734_v53  ;;  %v8758_v27 = vld [vmem:[#allocation2 + $0x358] sm:$0xff] }
  0xca   :  { %v1146_v19 = vrot.slane %v1145_v42, 4  ;;  %v1179_v0 = vrot.slane %v1178_v9, 4  ;;  %11202 = vst [vmem:[#allocation25_spill] sm:$0xff] %v8758_v27  ;;  %v8800_v41 = vld [vmem:[#allocation2 + $0x3e8] sm:$0xff]  ;;  %v8814_v20 = vld [vmem:[#allocation2 + $0x418] sm:$0xff]  ;;  %v11215_v51 = vunpack.c.h.bf16 %v8418_v15  ;;  %v11217_v62 = vunpack.c.h.bf16 %v8450_v30 }
  0xcb   :  { %v1307_v55 = vrot.slane %v1306_v12, 4  ;;  %v1340_v13 = vrot.slane %v1339_v63, 4  ;;  %v1468_v52 = vadd.f32 %v1467_v22, %v1466_v56  ;;  %v1501_v16 = vadd.f32 %v1500_v54, %v1499_v21  ;;  %v8619_v54 = vld [vmem:[#allocation2 + $0x118] sm:$0xff]  ;;  %11205 = vst [vmem:[#allocation40_spill] sm:$0xff] %v8800_v41  ;;  %v8808_v34 = vld [vmem:[#allocation2 + $0x408] sm:$0xff]  ;;  %11208 = vst [vmem:[#allocation28_spill] sm:$0xff] %v8814_v20 }
  0xcc   :  { %v1147_v8 = vadd.f32 %v1146_v19, %v1145_v42  ;;  %v1180_v61 = vadd.f32 %v1179_v0, %v1178_v9  ;;  %v8613_v42 = vld [vmem:[#allocation2 + $0xf8] sm:$0xff]  ;;  %11207 = vst [vmem:[#allocation41_spill] sm:$0xff] %v8808_v34  ;;  %v8820_v60 = vld [vmem:[#allocation2 + $0x428] sm:$0xff]  ;;  %v1219_v17 = vsel %vm1218_vm4, %v11215_v51, 0.0  ;;  %v11219_v1 = vunpack.c.l.bf16 %v8450_v30 }
  0xcd   :  { %v1308_v40 = vadd.f32 %v1307_v55, %v1306_v12  ;;  %v1341_v48 = vadd.f32 %v1340_v13, %v1339_v63  ;;  %v1469_v9 = vrot.slane %v1468_v52, 2  ;;  %v1502_v12 = vrot.slane %v1501_v16, 2  ;;  %v8617_v55 = vld [vmem:[#allocation2 + $0x108] sm:$0xff]  ;;  %11209 = vst [vmem:[#allocation42_spill] sm:$0xff] %v8820_v60  ;;  %v8822_v27 = vld [vmem:[#allocation2 + $0x438] sm:$0xff] }
  0xce   :  { %v1148_v57 = vrot.slane %v1147_v8, 2  ;;  %v1181_v3 = vrot.slane %v1180_v61, 2  ;;  %v8692_v63 = vld [vmem:[#allocation2 + $0x248] sm:$0xff]  ;;  %11210 = vst [vmem:[#allocation29_spill] sm:$0xff] %v8822_v27  ;;  %v8838_v53 = vld [vmem:[#allocation2 + $0x458] sm:$0xff]  ;;  %v11216_v60 = vunpack.c.h.bf16 %v8434_v26  ;;  %v1222_v27 = vsel %vm1218_vm4, %v11217_v62, 0.0 }
  0xcf   :  { %v1309_v2 = vrot.slane %v1308_v40, 2  ;;  %v1342_v18 = vrot.slane %v1341_v48, 2  ;;  %v1470_v13 = vadd.f32 %v1469_v9, %v1468_v52  ;;  %v1503_v22 = vadd.f32 %v1502_v12, %v1501_v16  ;;  %v8629_v12 = vld [vmem:[#allocation2 + $0x148] sm:$0xff]  ;;  %v8866_v20 = vld [vmem:[#allocation2 + $0x498] sm:$0xff] }
  0xd0   :  { %v1149_v56 = vadd.f32 %v1148_v57, %v1147_v8  ;;  %v1182_v21 = vadd.f32 %v1181_v3, %v1180_v61  ;;  %v8828_v38 = vld [vmem:[#allocation2 + $0x448] sm:$0xff]  ;;  %v1220_v59 = vsel %vm1218_vm4, %v11216_v60, 0.0  ;;  %11218 = vst [vmem:[#allocation44_spill] sm:$0xff] %v8866_v20  ;;  %v11220_v62 = vunpack.c.h.bf16 %v8466_v49  ;;  %v8880_v41 = vld [vmem:[#allocation2 + $0x4b8] sm:$0xff] }
  0xd1   :  { %v1310_v19 = vadd.f32 %v1309_v2, %v1308_v40  ;;  %v1343_v0 = vadd.f32 %v1342_v18, %v1341_v48  ;;  %v1471_v8 = vrot.slane %v1470_v13, 1  ;;  %v1504_v61 = vrot.slane %v1503_v22, 1  ;;  %v8627_v2 = vld [vmem:[#allocation2 + $0x138] sm:$0xff]  ;;  %11211 = vst [vmem:[#allocation43_spill] sm:$0xff] %v8828_v38  ;;  %v8872_v28 = vld [vmem:[#allocation2 + $0x4a8] sm:$0xff]  ;;  %11221 = vst [vmem:[#allocation45_spill] sm:$0xff] %v8880_v41 }
  0xd2   :  { %v1150_v11 = vrot.slane %v1149_v56, 1  ;;  %v1183_v45 = vrot.slane %v1182_v21, 1  ;;  %v1221_v15 = vadd.f32 %v1220_v59, %v1219_v17  ;;  %v8886_v59 = vld [vmem:[#allocation2 + $0x4c8] sm:$0xff]  ;;  %v11231_v30 = vunpack.c.h.bf16 %v8516_v39 }
  0xd3   :  { %v1311_v24 = vrot.slane %v1310_v19, 1  ;;  %v1344_v10 = vrot.slane %v1343_v0, 1  ;;  %v1472_v18 = vadd.f32 %v1471_v8, %v1470_v13  ;;  %v1505_v9 = vadd.f32 %v1504_v61, %v1503_v22  ;;  %v8686_v13 = vld [vmem:[#allocation2 + $0x238] sm:$0xff]  ;;  %11223 = vst [vmem:[#allocation46_spill] sm:$0xff] %v8886_v59 }
  0xd4   :  { %v1151_v52 = vadd.f32 %v1150_v11, %v1149_v56  ;;  %v1184_v16 = vadd.f32 %v1183_v45, %v1182_v21  ;;  %v8637_v11 = vld [vmem:[#allocation2 + $0x168] sm:$0xff]  ;;  %v8678_v45 = vld [vmem:[#allocation2 + $0x218] sm:$0xff]  ;;  %v1223_v17 = vadd.f32 %v1222_v27, %v1221_v15  ;;  %v1232_v51 = vsel %vm1218_vm4, %v11231_v30, 0.0 }
  0xd5   :  { %v1312_v57 = vadd.f32 %v1311_v24, %v1310_v19  ;;  %v1345_v3 = vadd.f32 %v1344_v10, %v1343_v0  ;;  %v8639_v24 = vld [vmem:[#allocation2 + $0x178] sm:$0xff]  ;;  %v8645_v19 = vld [vmem:[#allocation2 + $0x188] sm:$0xff]  ;;  %v11238_v59 = vunpack.c.h.bf16 %v8548_v6 }
  0xd6   :  { %v8647_v0 = vld [vmem:[#allocation2 + $0x198] sm:$0xff] }
  0xd7   :  { %v2114_v40 = vsel %vm2113_vm0, %v1312_v57, %v1151_v52  ;;  %v2117_v48 = vsel %vm2113_vm0, %v1345_v3, %v1184_v16  ;;  %v8655_v16 = vld [vmem:[#allocation2 + $0x1a8] sm:$0xff]  ;;  %v8694_v22 = vld [vmem:[#allocation2 + $0x258] sm:$0xff]  ;;  %v1236_v41 = vsel %vm1218_vm4, %v11238_v59, 0.0 }
  0xd8   :  { %v2116_v56 = vsel %vm2115_vm1, %v1472_v18, %v2114_v40  ;;  %v2118_v21 = vsel %vm2115_vm1, %v1505_v9, %v2117_v48  ;;  %11187 = vst [vmem:[#allocation31_spill] sm:$0xff] %v8655_v16  ;;  %v8657_v40 = vld [vmem:[#allocation2 + $0x1b8] sm:$0xff]  ;;  %v8663_v18 = vld [vmem:[#allocation2 + $0x1c8] sm:$0xff] }
  0xd9   :  { %v2140_v8 = vsel %vm2086_vm2, %v2118_v21, 0.0  ;;  %v2148_v61 = vsel %vm2147_vm3, %v2116_v56, 0.0  ;;  %v2168_v52 = vsel %vm2147_vm3, %v2118_v21, 0.0  ;;  %11188 = vst [vmem:[#allocation18_spill] sm:$0xff] %v8657_v40  ;;  %v8665_v9 = vld [vmem:[#allocation2 + $0x1d8] sm:$0xff]  ;;  %v8669_v21 = vld [vmem:[#allocation2 + $0x1e8] sm:$0xff]  ;;  %v11226_v15 = vunpack.c.l.bf16 %v8663_v18 }
  0xda   :  { %v2149_v57 = vsel %vm2147_vm3, %v2140_v8, 0.0  ;;  %v8661_v3 = vadd.f32 %v2168_v52, %v2148_v61  ;;  %v8676_v52 = vld [vmem:[#allocation2 + $0x208] sm:$0xff]  ;;  %v8702_v48 = vld [vmem:[#allocation2 + $0x278] sm:$0xff] }
  0xdb   :  { %v2150_v10 = vadd.f32 %v2149_v57, %v2148_v61  ;;  %v8684_v56 = vld [vmem:[#allocation2 + $0x228] sm:$0xff]  ;;  %v8710_v61 = vld [vmem:[#allocation2 + $0x298] sm:$0xff] }
  0xdc   :  { %11189 = vst [vmem:[#allocation32_spill] sm:$0xff] %v8661_v3  ;;  %11190 = vst [vmem:[#allocation19_spill] sm:$0xff] %v8710_v61  ;;  %v8718_v8 = vld [vmem:[#allocation2 + $0x2b8] sm:$0xff]  ;;  %v8772_v40 = vld [vmem:[#allocation2 + $0x388] sm:$0xff]  ;;  %v11214_v3 = vunpack.c.l.bf16 %v8434_v26  ;;  %v1224_v61 = vsel %vm1218_vm4, %v11220_v62, 0.0  ;;  %v11224_v62 = vunpack.c.h.bf16 %v8482_v37 }
  0xdd   :  { %2156 = vadd.xlane.f32.xlu0 %v2150_v10  ;;  %11192 = vst [vmem:[#allocation20_spill] sm:$0xff] %v8718_v8  ;;  %v8726_v10 = vld [vmem:[#allocation2 + $0x2d8] sm:$0xff]  ;;  %v8844_v8 = vld [vmem:[#allocation2 + $0x468] sm:$0xff]  ;;  %v1225_v27 = vadd.f32 %v1224_v61, %v1223_v17  ;;  %v11229_v61 = vunpack.c.l.bf16 %v8498_v58 }
  0xde   :  { %11194 = vst [vmem:[#allocation21_spill] sm:$0xff] %v8726_v10  ;;  %v8778_v16 = vld [vmem:[#allocation2 + $0x398] sm:$0xff]  ;;  %11212 = vst [vmem:[#allocation30_spill] sm:$0xff] %v8844_v8  ;;  %v1185_v34 = vadd.f32 %v11214_v3, %v11213_v14  ;;  %v8854_v57 = vld [vmem:[#allocation2 + $0x488] sm:$0xff]  ;;  %v1226_v14 = vsel %vm1218_vm4, %v11224_v62, 0.0  ;;  %v11228_v62 = vunpack.c.h.bf16 %v8498_v58 }
  0xdf   :  { %v8794_v10 = vld [vmem:[#allocation2 + $0x3d8] sm:$0xff]  ;;  %v1227_v17 = vadd.f32 %v1226_v14, %v1225_v27  ;;  %v11233_v3 = vunpack.c.l.bf16 %v8778_v16  ;;  %v11235_v14 = vunpack.c.l.bf16 %v8669_v21 }
  0xe0   :  { %v1186_v38 = vadd.f32 %v1185_v34, %v11219_v1  ;;  %v11222_v1 = vunpack.c.l.bf16 %v8466_v49  ;;  %v8894_v8 = vld [vmem:[#allocation2 + $0x4d8] sm:$0xff]  ;;  %v11225_v49 = vunpack.c.l.bf16 %v8482_v37  ;;  %v1228_v20 = vsel %vm1218_vm4, %v11228_v62, 0.0 }
  0xe1   :  { %v11232_v62 = vunpack.c.l.bf16 %v8772_v40  ;;  %v11234_v37 = vunpack.c.l.bf16 %v8504_v23 }
  0xe2   :  { %v1187_v34 = vadd.f32 %v1186_v38, %v11222_v1  ;;  %v11227_v1 = vunpack.c.l.bf16 %v8665_v9 }
  0xe3   :  { %v1506_v26 = vadd.f32 %v11233_v3, %v11232_v62  ;;  %v11239_v3 = vunpack.c.h.bf16 %v8665_v9  ;;  %v11244_v9 = vunpack.c.h.bf16 %v8580_v43 }
  0xe4   :  { %v1188_v38 = vadd.f32 %v1187_v34, %v11225_v49  ;;  %v1346_v60 = vadd.f32 %v11227_v1, %v11226_v15  ;;  %v11230_v15 = vunpack.c.h.bf16 %v8504_v23  ;;  %v11237_v49 = vunpack.c.h.bf16 %v8532_v7 }
  0xe5   :  { %v1380_v23 = vsel %vm1218_vm4, %v11239_v3, 0.0 }
  0xe6   :  { %v1189_v34 = vadd.f32 %v1188_v38, %v11229_v61  ;;  %v1230_v1 = vsel %vm1218_vm4, %v11230_v15, 0.0  ;;  %v1229_v38 = vadd.f32 %v1228_v20, %v1227_v17  ;;  %v1347_v27 = vadd.f32 %v1346_v60, %v11235_v14 }
  0xe7   :  { %v11236_v61 = vunpack.c.h.bf16 %v8663_v18  ;;  %v1234_v30 = vsel %vm1218_vm4, %v11237_v49, 0.0  ;;  %v11240_v20 = vunpack.c.h.bf16 %v8669_v21  ;;  %v11241_v18 = vunpack.c.l.bf16 %v8516_v39 }
  0xe8   :  { %v1190_v58 = vadd.f32 %v1189_v34, %v11234_v37  ;;  %v1231_v34 = vadd.f32 %v1230_v1, %v1229_v38  ;;  %v11242_v17 = vunpack.c.l.bf16 %v8671_v50  ;;  %v11243_v14 = vunpack.c.h.bf16 %v8564_v33 }
  0xe9   :  { %v1379_v15 = vsel %vm1218_vm4, %v11236_v61, 0.0  ;;  %v1382_v60 = vsel %vm1218_vm4, %v11240_v20, 0.0  ;;  %v1240_v61 = vsel %vm1218_vm4, %v11244_v9, 0.0  ;;  %v11245_v21 = vunpack.c.h.bf16 %v8596_v44 }
  0xea   :  { %v1191_v37 = vadd.f32 %v1190_v58, %v11241_v18  ;;  %v1348_v62 = vadd.f32 %v1347_v27, %v11242_v17  ;;  %v1381_v49 = vadd.f32 %v1380_v23, %v1379_v15  ;;  %v1238_v59 = vsel %vm1218_vm4, %v11243_v14, 0.0 }
  0xeb   :  { %v1242_v3 = vsel %vm1218_vm4, %v11245_v21, 0.0  ;;  %v11246_v39 = vunpack.c.h.bf16 %v8671_v50  ;;  %v11247_v58 = vunpack.c.l.bf16 %v8532_v7  ;;  %v1233_v27 = vadd.f32 %v1232_v51, %v1231_v34 }
  0xec   :  { %v11248_v15 = vunpack.c.l.bf16 %v8676_v52  ;;  %v1383_v20 = vadd.f32 %v1382_v60, %v1381_v49  ;;  %v11249_v18 = vunpack.c.h.bf16 %v8604_v5  ;;  %v11250_v14 = vunpack.c.h.bf16 %v8608_v35 }
  0xed   :  { %v1384_v1 = vsel %vm1218_vm4, %v11246_v39, 0.0  ;;  %v1192_v38 = vadd.f32 %v1191_v37, %v11247_v58  ;;  %v11251_v50 = vunpack.c.h.bf16 %v8613_v42  ;;  %v11252_v7 = vunpack.c.h.bf16 %v8676_v52 }
  0xee   :  { %v1349_v23 = vadd.f32 %v1348_v62, %v11248_v15  ;;  %v1244_v17 = vsel %vm1218_vm4, %v11249_v18, 0.0  ;;  %v1246_v9 = vsel %vm1218_vm4, %v11250_v14, 0.0  ;;  %v11253_v37 = vunpack.c.l.bf16 %v8548_v6 }
  0xef   :  { %v1248_v21 = vsel %vm1218_vm4, %v11251_v50, 0.0  ;;  %v1386_v51 = vsel %vm1218_vm4, %v11252_v7, 0.0  ;;  %v1235_v60 = vadd.f32 %v1234_v30, %v1233_v27  ;;  %v11254_v62 = vunpack.c.l.bf16 %v8678_v45 }
  0xf0   :  { %v1193_v34 = vadd.f32 %v1192_v38, %v11253_v37  ;;  %v1385_v39 = vadd.f32 %v1384_v1, %v1383_v20  ;;  %v11255_v58 = vunpack.c.h.bf16 %v8617_v55  ;;  %v11256_v18 = vunpack.c.h.bf16 %v8619_v54 }
  0xf1   :  { %v1350_v49 = vadd.f32 %v1349_v23, %v11254_v62  ;;  %v11257_v52 = vunpack.c.h.bf16 %v8623_v25  ;;  %v11258_v6 = vunpack.c.h.bf16 %v8678_v45  ;;  %v11259_v1 = vunpack.c.l.bf16 %v8564_v33 }
  0xf2   :  { %v1250_v15 = vsel %vm1218_vm4, %v11255_v58, 0.0  ;;  %v8985_v14 = vsel %vm1218_vm4, %v11256_v18, 0.0  ;;  %v1237_v27 = vadd.f32 %v1236_v41, %v1235_v60  ;;  %v11260_v23 = vunpack.c.l.bf16 %v8684_v56 }
  0xf3   :  { %v8990_v50 = vsel %vm1218_vm4, %v11257_v52, 0.0  ;;  %v1388_v30 = vsel %vm1218_vm4, %v11258_v6, 0.0  ;;  %v1194_v38 = vadd.f32 %v1193_v34, %v11259_v1  ;;  %v1387_v7 = vadd.f32 %v1386_v51, %v1385_v39 }
  0xf4   :  { %v1351_v20 = vadd.f32 %v1350_v49, %v11260_v23  ;;  %v11261_v37 = vunpack.c.h.bf16 %v8627_v2  ;;  %v11262_v58 = vunpack.c.h.bf16 %v8629_v12  ;;  %v11263_v45 = vunpack.c.h.bf16 %v8631_v4 }
  0xf5   :  { %v11264_v41 = vunpack.c.h.bf16 %v8684_v56  ;;  %v11265_v51 = vunpack.c.l.bf16 %v8580_v43  ;;  %v1239_v49 = vadd.f32 %v1238_v59, %v1237_v27  ;;  %v11266_v39 = vunpack.c.l.bf16 %v8686_v13 }
  0xf6   :  { %v9002_v62 = vsel %vm1218_vm4, %v11261_v37, 0.0  ;;  %v9007_v18 = vsel %vm1218_vm4, %v11262_v58, 0.0  ;;  %v9012_v33 = vsel %vm1218_vm4, %v11263_v45, 0.0  ;;  %v1389_v6 = vadd.f32 %v1388_v30, %v1387_v7 }
  0xf7   :  { %v1390_v34 = vsel %vm1218_vm4, %v11264_v41, 0.0  ;;  %v1195_v60 = vadd.f32 %v1194_v38, %v11265_v51  ;;  %v1352_v52 = vadd.f32 %v1351_v20, %v11266_v39  ;;  %v11267_v1 = vunpack.c.h.bf16 %v8637_v11 }
  0xf8   :  { %v11268_v37 = vunpack.c.h.bf16 %v8639_v24  ;;  %v11269_v56 = vunpack.c.h.bf16 %v8645_v19  ;;  %v11270_v59 = vunpack.c.h.bf16 %v8686_v13  ;;  %v11271_v30 = vunpack.c.l.bf16 %v8596_v44 }
  0xf9   :  { %v9024_v23 = vsel %vm1218_vm4, %v11267_v1, 0.0  ;;  %v1241_v20 = vadd.f32 %v1240_v61, %v1239_v49  ;;  %v11272_v7 = vunpack.c.l.bf16 %v8692_v63  ;;  %v1391_v41 = vadd.f32 %v1390_v34, %v1389_v6 }
  0xfa   :  { %v9029_v58 = vsel %vm1218_vm4, %v11268_v37, 0.0  ;;  %v9034_v43 = vsel %vm1218_vm4, %v11269_v56, 0.0  ;;  %v1392_v38 = vsel %vm1218_vm4, %v11270_v59, 0.0  ;;  %v1196_v27 = vadd.f32 %v1195_v60, %v11271_v30 }
  0xfb   :  { %v1353_v45 = vadd.f32 %v1352_v52, %v11272_v7  ;;  %v11273_v51 = vunpack.c.h.bf16 %v8647_v0  ;;  %v11274_v1 = vunpack.c.h.bf16 %v8692_v63  ;;  %v11275_v13 = vunpack.c.h.bf16 %v8694_v22 }
  0xfc   :  { %v11276_v44 = vunpack.c.l.bf16 %v8780_v36  ;;  %v11277_v60 = vunpack.c.l.bf16 %v8604_v5  ;;  %v1243_v34 = vadd.f32 %v1242_v3, %v1241_v20  ;;  %v11278_v52 = vunpack.c.l.bf16 %v8694_v22 }
  0xfd   :  { %v9046_v39 = vsel %vm1218_vm4, %v11273_v51, 0.0  ;;  %v1394_v37 = vsel %vm1218_vm4, %v11274_v1, 0.0  ;;  %v1396_v56 = vsel %vm1218_vm4, %v11275_v13, 0.0  ;;  %v1393_v59 = vadd.f32 %v1392_v38, %v1391_v41 }
  0xfe   :  { %v1507_v61 = vadd.f32 %v1506_v26, %v11276_v44  ;;  %v1197_v49 = vadd.f32 %v1196_v27, %v11277_v60  ;;  %v1354_v6 = vadd.f32 %v1353_v45, %v11278_v52  ;;  %v11279_v30 = vunpack.c.l.bf16 %v8786_v32 }
  0xff   :  { %v11280_v7 = vunpack.c.h.bf16 %v8772_v40  ;;  %v11281_v1 = vunpack.c.h.bf16 %v8778_v16  ;;  %v11282_v26 = vunpack.c.h.bf16 %v8780_v36  ;;  %v11283_v3 = vunpack.c.l.bf16 %v8608_v35 }
 0x100   :  { %v1508_v63 = vadd.f32 %v1507_v61, %v11279_v30  ;;  %v1245_v27 = vadd.f32 %v1244_v17, %v1243_v34  ;;  %v11284_v38 = vunpack.c.l.bf16 %v8700_v31  ;;  %v1395_v45 = vadd.f32 %v1394_v37, %v1393_v59 }
 0x101   :  { %v1539_v51 = vsel %vm1218_vm4, %v11280_v7, 0.0  ;;  %v1540_v13 = vsel %vm1218_vm4, %v11281_v1, 0.0  ;;  %v1542_v5 = vsel %vm1218_vm4, %v11282_v26, 0.0  ;;  %v1198_v22 = vadd.f32 %v1197_v49, %v11283_v3  ;;  %v11296_v3 = vld [vmem:[#allocation40_spill] sm:$0xff] }
 0x102   :  { %v1355_v20 = vadd.f32 %v1354_v6, %v11284_v38  ;;  %v11285_v40 = vunpack.c.h.bf16 %v8700_v31  ;;  %v11286_v16 = vunpack.c.l.bf16 %v8792_v29  ;;  %v1541_v61 = vadd.f32 %v1540_v13, %v1539_v51 }
 0x103   :  { %v11287_v36 = vunpack.c.h.bf16 %v8786_v32  ;;  %v11288_v35 = vunpack.c.l.bf16 %v8613_v42  ;;  %v1247_v17 = vadd.f32 %v1246_v9, %v1245_v27  ;;  %v11289_v34 = vunpack.c.l.bf16 %v8702_v48 }
 0x104   :  { %v1398_v41 = vsel %vm1218_vm4, %v11285_v40, 0.0  ;;  %v1509_v44 = vadd.f32 %v1508_v63, %v11286_v16  ;;  %v1397_v37 = vadd.f32 %v1396_v56, %v1395_v45  ;;  %v11290_v31 = vunpack.c.h.bf16 %v8702_v48  ;;  %v11300_v45 = vld [vmem:[#allocation19_spill] sm:$0xff] }
 0x105   :  { %v1544_v60 = vsel %vm1218_vm4, %v11287_v36, 0.0  ;;  %v1199_v49 = vadd.f32 %v1198_v22, %v11288_v35  ;;  %v1356_v52 = vadd.f32 %v1355_v20, %v11289_v34  ;;  %v11291_v59 = vunpack.c.l.bf16 %v8794_v10  ;;  %v11307_v34 = vld [vmem:[#allocation33_spill] sm:$0xff] }
 0x106   :  { %v1400_v6 = vsel %vm1218_vm4, %v11290_v31, 0.0  ;;  %v1543_v63 = vadd.f32 %v1542_v5, %v1541_v61  ;;  %v11292_v32 = vunpack.c.h.bf16 %v8792_v29  ;;  %v11293_v42 = vunpack.c.l.bf16 %v8617_v55  ;;  %v11303_v61 = vld [vmem:[#allocation27_spill] sm:$0xff] }
 0x107   :  { %v1510_v30 = vadd.f32 %v1509_v44, %v11291_v59  ;;  %v1249_v9 = vadd.f32 %v1248_v21, %v1247_v17  ;;  %v11294_v1 = vunpack.c.l.bf16 %v8708_v47  ;;  %v1399_v56 = vadd.f32 %v1398_v41, %v1397_v37 }
 0x108   :  { %v1546_v7 = vsel %vm1218_vm4, %v11292_v32, 0.0  ;;  %v1200_v51 = vadd.f32 %v1199_v49, %v11293_v42  ;;  %v11295_v48 = vunpack.c.h.bf16 %v8708_v47  ;;  %v11297_v22 = vunpack.c.l.bf16 %v11296_v3 }
 0x109   :  { %v1357_v13 = vadd.f32 %v1356_v52, %v11294_v1  ;;  %v1545_v5 = vadd.f32 %v1544_v60, %v1543_v63  ;;  %v11298_v29 = vunpack.c.h.bf16 %v8794_v10  ;;  %v11299_v55 = vunpack.c.l.bf16 %v8619_v54  ;;  %v11314_v1 = vld [vmem:[#allocation20_spill] sm:$0xff] }
 0x10a   :  { %v1402_v26 = vsel %vm1218_vm4, %v11295_v48, 0.0  ;;  %v1511_v27 = vadd.f32 %v1510_v30, %v11297_v22  ;;  %v1251_v21 = vadd.f32 %v1250_v15, %v1249_v9  ;;  %v11301_v40 = vunpack.c.l.bf16 %v11300_v45  ;;  %v11310_v30 = vld [vmem:[#allocation41_spill] sm:$0xff]  ;;  %v11317_v22 = vld [vmem:[#allocation28_spill] sm:$0xff] }
 0x10b   :  { %v1548_v38 = vsel %vm1218_vm4, %v11298_v29, 0.0  ;;  %v1201_v20 = vadd.f32 %v1200_v51, %v11299_v55  ;;  %v1401_v41 = vadd.f32 %v1400_v6, %v1399_v56  ;;  %v11302_v47 = vunpack.c.h.bf16 %v11300_v45 }
 0x10c   :  { %v1358_v16 = vadd.f32 %v1357_v13, %v11301_v40  ;;  %v11304_v36 = vunpack.c.l.bf16 %v11303_v61  ;;  %v1547_v60 = vadd.f32 %v1546_v7, %v1545_v5  ;;  %v11305_v10 = vunpack.c.h.bf16 %v11296_v3 }
 0x10d   :  { %v1404_v44 = vsel %vm1218_vm4, %v11302_v47, 0.0  ;;  %v11306_v54 = vunpack.c.l.bf16 %v8623_v25  ;;  %v1253_v15 = vadd.f32 %v8985_v14, %v1251_v21  ;;  %v11308_v52 = vunpack.c.l.bf16 %v11307_v34  ;;  %v11321_v21 = vld [vmem:[#allocation34_spill] sm:$0xff] }
 0x10e   :  { %v1512_v35 = vadd.f32 %v1511_v27, %v11304_v36  ;;  %v1550_v49 = vsel %vm1218_vm4, %v11305_v10, 0.0  ;;  %v1403_v31 = vadd.f32 %v1402_v26, %v1401_v41  ;;  %v11309_v6 = vunpack.c.h.bf16 %v11307_v34 }
 0x10f   :  { %v1202_v17 = vadd.f32 %v1201_v20, %v11306_v54  ;;  %v1359_v37 = vadd.f32 %v1358_v16, %v11308_v52  ;;  %v11311_v63 = vunpack.c.l.bf16 %v11310_v30  ;;  %v1549_v7 = vadd.f32 %v1548_v38, %v1547_v60  ;;  %v11328_v54 = vld [vmem:[#allocation21_spill] sm:$0xff] }
 0x110   :  { %v1406_v59 = vsel %vm1218_vm4, %v11309_v6, 0.0  ;;  %v11312_v42 = vunpack.c.h.bf16 %v11303_v61  ;;  %v11313_v25 = vunpack.c.l.bf16 %v8627_v2  ;;  %v1255_v14 = vadd.f32 %v8990_v50, %v1253_v15 }
 0x111   :  { %v1513_v32 = vadd.f32 %v1512_v35, %v11311_v63  ;;  %v11315_v13 = vunpack.c.l.bf16 %v11314_v1  ;;  %v1405_v48 = vadd.f32 %v1404_v44, %v1403_v31  ;;  %v11316_v26 = vunpack.c.h.bf16 %v11314_v1  ;;  %v11324_v44 = vld [vmem:[#allocation42_spill] sm:$0xff]  ;;  %v11331_v31 = vld [vmem:[#allocation29_spill] sm:$0xff] }
 0x112   :  { %v1552_v51 = vsel %vm1218_vm4, %v11312_v42, 0.0  ;;  %v1203_v9 = vadd.f32 %v1202_v17, %v11313_v25  ;;  %v11318_v27 = vunpack.c.l.bf16 %v11317_v22  ;;  %v1551_v29 = vadd.f32 %v1550_v49, %v1549_v7  ;;  %v11335_v42 = vld [vmem:[#allocation35_spill] sm:$0xff] }
 0x113   :  { %v1360_v56 = vadd.f32 %v1359_v37, %v11315_v13  ;;  %v1408_v3 = vsel %vm1218_vm4, %v11316_v26, 0.0  ;;  %v11319_v38 = vunpack.c.h.bf16 %v11310_v30  ;;  %v11320_v2 = vunpack.c.l.bf16 %v8629_v12  ;;  %v11338_v13 = vld [vmem:[#allocation43_spill] sm:$0xff] }
 0x114   :  { %v1514_v5 = vadd.f32 %v1513_v32, %v11318_v27  ;;  %v1257_v50 = vadd.f32 %v9002_v62, %v1255_v14  ;;  %v11322_v45 = vunpack.c.l.bf16 %v11321_v21  ;;  %v1407_v16 = vadd.f32 %v1406_v59, %v1405_v48 }
 0x115   :  { %v1554_v55 = vsel %vm1218_vm4, %v11319_v38, 0.0  ;;  %v1204_v20 = vadd.f32 %v1203_v9, %v11320_v2  ;;  %v11323_v41 = vunpack.c.h.bf16 %v11321_v21  ;;  %v11325_v61 = vunpack.c.l.bf16 %v11324_v44 }
 0x116   :  { %v1361_v40 = vadd.f32 %v1360_v56, %v11322_v45  ;;  %v1553_v35 = vadd.f32 %v1552_v51, %v1551_v29  ;;  %v11326_v60 = vunpack.c.h.bf16 %v11317_v22  ;;  %v11327_v12 = vunpack.c.l.bf16 %v8631_v4 }
 0x117   :  { %v1410_v47 = vsel %vm1218_vm4, %v11323_v41, 0.0  ;;  %v1515_v36 = vadd.f32 %v1514_v5, %v11325_v61  ;;  %v1259_v62 = vadd.f32 %v9007_v18, %v1257_v50  ;;  %v11329_v17 = vunpack.c.l.bf16 %v11328_v54  ;;  %v11342_v5 = vld [vmem:[#allocation22_spill] sm:$0xff] }
 0x118   :  { %v1556_v10 = vsel %vm1218_vm4, %v11326_v60, 0.0  ;;  %v1205_v49 = vadd.f32 %v1204_v20, %v11327_v12  ;;  %v1409_v34 = vadd.f32 %v1408_v3, %v1407_v16  ;;  %v11330_v52 = vunpack.c.h.bf16 %v11328_v54 }
 0x119   :  { %v1362_v15 = vadd.f32 %v1361_v40, %v11329_v17  ;;  %v11332_v6 = vunpack.c.l.bf16 %v11331_v31  ;;  %v1555_v30 = vadd.f32 %v1554_v55, %v1553_v35  ;;  %v11333_v63 = vunpack.c.h.bf16 %v11324_v44 }
 0x11a   :  { %v1412_v37 = vsel %vm1218_vm4, %v11330_v52, 0.0  ;;  %v11334_v4 = vunpack.c.l.bf16 %v8637_v11  ;;  %v1261_v18 = vadd.f32 %v9012_v33, %v1259_v62  ;;  %v11336_v51 = vunpack.c.l.bf16 %v11335_v42 }
 0x11b   :  { %v1516_v59 = vadd.f32 %v1515_v36, %v11332_v6  ;;  %v1558_v32 = vsel %vm1218_vm4, %v11333_v63, 0.0  ;;  %v1411_v9 = vadd.f32 %v1410_v47, %v1409_v34  ;;  %v11337_v14 = vunpack.c.h.bf16 %v11335_v42  ;;  %v11348_v47 = vld [vmem:[#allocation36_spill] sm:$0xff]  ;;  %v11355_v34 = vld [vmem:[#allocation23_spill] sm:$0xff] }
 0x11c   :  { %v1206_v7 = vadd.f32 %v1205_v49, %v11334_v4  ;;  %v1363_v25 = vadd.f32 %v1362_v15, %v11336_v51  ;;  %v11339_v56 = vunpack.c.l.bf16 %v11338_v13  ;;  %v1557_v26 = vadd.f32 %v1556_v10, %v1555_v30  ;;  %v11351_v10 = vld [vmem:[#allocation30_spill] sm:$0xff]  ;;  %v11357_v6 = vld [vmem:[#allocation31_spill] sm:$0xff] }
 0x11d   :  { %v1414_v1 = vsel %vm1218_vm4, %v11337_v14, 0.0  ;;  %v11340_v3 = vunpack.c.h.bf16 %v11331_v31  ;;  %v11341_v11 = vunpack.c.l.bf16 %v8639_v24  ;;  %v1263_v33 = vadd.f32 %v9024_v23, %v1261_v18  ;;  %v11361_v18 = vld [vmem:[#allocation37_spill] sm:$0xff] }
 0x11e   :  { %v1517_v48 = vadd.f32 %v1516_v59, %v11339_v56  ;;  %v11343_v29 = vunpack.c.l.bf16 %v11342_v5  ;;  %v1413_v55 = vadd.f32 %v1412_v37, %v1411_v9  ;;  %v11344_v2 = vunpack.c.h.bf16 %v11342_v5 }
 0x11f   :  { %v1560_v22 = vsel %vm1218_vm4, %v11340_v3, 0.0  ;;  %v1207_v27 = vadd.f32 %v1206_v7, %v11341_v11  ;;  %v11345_v50 = vunpack.c.l.bf16 %v8838_v53  ;;  %v1559_v45 = vadd.f32 %v1558_v32, %v1557_v26  ;;  %v11367_v11 = vld [vmem:[#allocation24_spill] sm:$0xff] }
 0x120   :  { %v1364_v38 = vadd.f32 %v1363_v25, %v11343_v29  ;;  %v1416_v20 = vsel %vm1218_vm4, %v11344_v2, 0.0  ;;  %v11346_v40 = vunpack.c.h.bf16 %v11338_v13  ;;  %v11347_v24 = vunpack.c.l.bf16 %v8645_v19 }
 0x121   :  { %v1518_v21 = vadd.f32 %v1517_v48, %v11345_v50  ;;  %v1265_v23 = vadd.f32 %v9029_v58, %v1263_v33  ;;  %v11349_v44 = vunpack.c.l.bf16 %v11348_v47  ;;  %v1415_v36 = vadd.f32 %v1414_v1, %v1413_v55  ;;  %v11370_v55 = vld [vmem:[#allocation18_spill] sm:$0xff] }
 0x122   :  { %v1562_v16 = vsel %vm1218_vm4, %v11346_v40, 0.0  ;;  %v1208_v41 = vadd.f32 %v1207_v27, %v11347_v24  ;;  %v11350_v35 = vunpack.c.h.bf16 %v11348_v47  ;;  %v11352_v12 = vunpack.c.l.bf16 %v11351_v10 }
 0x123   :  { %v1365_v61 = vadd.f32 %v1364_v38, %v11349_v44  ;;  %v1561_v62 = vadd.f32 %v1560_v22, %v1559_v45  ;;  %v11353_v54 = vunpack.c.h.bf16 %v8838_v53  ;;  %v11354_v19 = vunpack.c.l.bf16 %v8647_v0  ;;  %v11373_v45 = vld [vmem:[#allocation44_spill] sm:$0xff] }
 0x124   :  { %v1418_v60 = vsel %vm1218_vm4, %v11350_v35, 0.0  ;;  %v1519_v49 = vadd.f32 %v1518_v21, %v11352_v12  ;;  %v1267_v58 = vadd.f32 %v9034_v43, %v1265_v23  ;;  %v11356_v52 = vunpack.c.l.bf16 %v11355_v34  ;;  %v11375_v23 = vld [vmem:[#allocation38_spill] sm:$0xff] }
 0x125   :  { %v1564_v17 = vsel %vm1218_vm4, %v11353_v54, 0.0  ;;  %v1209_v15 = vadd.f32 %v1208_v41, %v11354_v19  ;;  %v1417_v31 = vadd.f32 %v1416_v20, %v1415_v36  ;;  %v11358_v59 = vunpack.c.h.bf16 %v11357_v6 }
 0x126   :  { %v1366_v37 = vadd.f32 %v1365_v61, %v11356_v52  ;;  %v11359_v63 = vunpack.c.h.bf16 %v11355_v34  ;;  %v11360_v53 = vunpack.c.l.bf16 %v8846_v46  ;;  %v1563_v7 = vadd.f32 %v1562_v16, %v1561_v62 }
 0x127   :  { %v1270_v30 = vsel %vm1218_vm4, %v11358_v59, 0.0  ;;  %v1269_v0 = vadd.f32 %v9046_v39, %v1267_v58  ;;  %v11362_v43 = vunpack.c.l.bf16 %v11361_v18  ;;  %v1419_v51 = vadd.f32 %v1418_v60, %v1417_v31  ;;  %v9236_v39 = vld [vmem:[#allocation2 + $0x4e8] sm:$0xff] }
 0x128   :  { %v1420_v32 = vsel %vm1218_vm4, %v11359_v63, 0.0  ;;  %v1520_v4 = vadd.f32 %v1519_v49, %v11360_v53  ;;  %v11363_v25 = vunpack.c.h.bf16 %v11351_v10  ;;  %v11364_v14 = vunpack.c.l.bf16 %v11357_v6 }
 0x129   :  { %v1367_v42 = vadd.f32 %v1366_v37, %v11362_v43  ;;  %v11365_v13 = vunpack.c.h.bf16 %v11361_v18  ;;  %v11366_v48 = vunpack.c.l.bf16 %v8854_v57  ;;  %v1565_v3 = vadd.f32 %v1564_v17, %v1563_v7  ;;  %v270_v17 = vld [vmem:[#allocation2 + $0x4f8] sm:$0xff] }
 0x12a   :  { %v1566_v9 = vsel %vm1218_vm4, %v11363_v25, 0.0  ;;  %v1210_v1 = vadd.f32 %v1209_v15, %v11364_v14  ;;  %v1271_v22 = vadd.f32 %v1270_v30, %v1269_v0  ;;  %v11368_v27 = vunpack.c.l.bf16 %v11367_v11  ;;  %v11381_v15 = vld [vmem:[#allocation25_spill] sm:$0xff]  ;;  %v11387_v0 = vld [vmem:[#allocation39_spill] sm:$0xff] }
 0x12b   :  { %v1422_v56 = vsel %vm1218_vm4, %v11365_v13, 0.0  ;;  %v1521_v26 = vadd.f32 %v1520_v4, %v11366_v48  ;;  %v1421_v5 = vadd.f32 %v1420_v32, %v1419_v51  ;;  %v11369_v29 = vunpack.c.h.bf16 %v8846_v46  ;;  %v11385_v30 = vld [vmem:[#allocation45_spill] sm:$0xff]  ;;  %v11391_v13 = vld [vmem:[#allocation46_spill] sm:$0xff] }
 0x12c   :  { %v1368_v33 = vadd.f32 %v1367_v42, %v11368_v27  ;;  %v11371_v2 = vunpack.c.h.bf16 %v11370_v55  ;;  %v11372_v50 = vunpack.c.h.bf16 %v11367_v11  ;;  %v11374_v40 = vunpack.c.l.bf16 %v11373_v45  ;;  %v272_v4 = vld [vmem:[#allocation2 + $0x508] sm:$0xff] }
 0x12d   :  { %v1568_v38 = vsel %vm1218_vm4, %v11369_v29, 0.0  ;;  %v1567_v24 = vadd.f32 %v1566_v9, %v1565_v3  ;;  %v758_v41 = vunpack.c.h.bf16 %v8894_v8  ;;  %v11376_v47 = vunpack.c.l.bf16 %v11375_v23  ;;  %v274_v3 = vld [vmem:[#allocation2 + $0x518] sm:$0xff] }
 0x12e   :  { %v1272_v20 = vsel %vm1218_vm4, %v11371_v2, 0.0  ;;  %v1424_v21 = vsel %vm1218_vm4, %v11372_v50, 0.0  ;;  %v1522_v16 = vadd.f32 %v1521_v26, %v11374_v40  ;;  %v1423_v46 = vadd.f32 %v1422_v56, %v1421_v5 }
 0x12f   :  { %v1369_v44 = vadd.f32 %v1368_v33, %v11376_v47  ;;  %v11377_v61 = vunpack.c.h.bf16 %v8854_v57  ;;  %v11378_v35 = vunpack.c.l.bf16 %v11370_v55  ;;  %v11379_v10 = vunpack.c.h.bf16 %v11375_v23 }
 0x130   :  { %v11380_v49 = vunpack.c.l.bf16 %v8872_v28  ;;  %v1569_v54 = vadd.f32 %v1568_v38, %v1567_v24  ;;  %v1273_v19 = vadd.f32 %v1272_v20, %v1271_v22  ;;  %v11382_v58 = vunpack.c.l.bf16 %v11381_v15 }
 0x131   :  { %v1570_v36 = vsel %vm1218_vm4, %v11377_v61, 0.0  ;;  %v1211_v60 = vadd.f32 %v1210_v1, %v11378_v35  ;;  %v1426_v12 = vsel %vm1218_vm4, %v11379_v10, 0.0  ;;  %v1425_v52 = vadd.f32 %v1424_v21, %v1423_v46  ;;  %v276_v21 = vld [vmem:[#allocation2 + $0x528] sm:$0xff] }
 0x132   :  { %v1523_v62 = vadd.f32 %v1522_v16, %v11380_v49  ;;  %v1370_v34 = vadd.f32 %v1369_v44, %v11382_v58  ;;  %v11383_v57 = vunpack.c.h.bf16 %v11373_v45  ;;  %v761_v31 = vunpack.c.l.bf16 %v9236_v39 }
 0x133   :  { %v11384_v6 = vunpack.c.h.bf16 %v11381_v15  ;;  %v11386_v63 = vunpack.c.l.bf16 %v11385_v30  ;;  %v1571_v53 = vadd.f32 %v1570_v36, %v1569_v54  ;;  %v762_v7 = vunpack.c.h.bf16 %v9236_v39  ;;  %v11393_v39 = vld [vmem:[#allocation26_spill] sm:$0xff] }
 0x134   :  { %v1572_v37 = vsel %vm1218_vm4, %v11383_v57, 0.0  ;;  %v11388_v18 = vunpack.c.l.bf16 %v11387_v0  ;;  %v1427_v42 = vadd.f32 %v1426_v12, %v1425_v52  ;;  %v11389_v51 = vunpack.c.h.bf16 %v8872_v28  ;;  %v278_v36 = vld [vmem:[#allocation2 + $0x538] sm:$0xff] }
 0x135   :  { %v1428_v59 = vsel %vm1218_vm4, %v11384_v6, 0.0  ;;  %v1524_v32 = vadd.f32 %v1523_v62, %v11386_v63  ;;  %v1212_v9 = vrot.slane %v1211_v60, 4  ;;  %v11390_v14 = vunpack.c.h.bf16 %v11387_v0 }
 0x136   :  { %v1371_v43 = vadd.f32 %v1370_v34, %v11388_v18  ;;  %v1574_v25 = vsel %vm1218_vm4, %v11389_v51, 0.0  ;;  %v11392_v56 = vunpack.c.l.bf16 %v11391_v13  ;;  %v1573_v26 = vadd.f32 %v1572_v37, %v1571_v53  ;;  %v9307_v18 = vld [vmem:[#allocation2 + $0x560] sm:$0xff] }
 0x137   :  { %v1430_v1 = vsel %vm1218_vm4, %v11390_v14, 0.0  ;;  %v1274_v22 = vrot.slane %v1273_v19, 4  ;;  %v11394_v11 = vunpack.c.l.bf16 %v11393_v39  ;;  %v1429_v33 = vadd.f32 %v1428_v59, %v1427_v42 }
 0x138   :  { %v1525_v48 = vadd.f32 %v1524_v32, %v11392_v56  ;;  %v11395_v5 = vunpack.c.h.bf16 %v11385_v30  ;;  %v765_v29 = vunpack.c.l.bf16 %v270_v17  ;;  %v11396_v38 = vunpack.c.h.bf16 %v11393_v39  ;;  %v9302_v30 = vld [vmem:[#allocation2 + $0x540] sm:$0xff] }
 0x139   :  { %v1372_v27 = vadd.f32 %v1371_v43, %v11394_v11  ;;  %v11397_v2 = vunpack.c.l.bf16 %v8894_v8  ;;  %v1575_v50 = vadd.f32 %v1574_v25, %v1573_v26  ;;  %v766_v45 = vunpack.c.h.bf16 %v270_v17  ;;  %v9309_v25 = vld [vmem:[#allocation2 + $0x570] sm:$0xff]  ;;  %v9313_v56 = vld [vmem:[#allocation2 + $0x580] sm:$0xff] }
 0x13a   :  { %v1576_v28 = vsel %vm1218_vm4, %v11395_v5, 0.0  ;;  %v1432_v55 = vsel %vm1218_vm4, %v11396_v38, 0.0  ;;  %v1431_v16 = vadd.f32 %v1430_v1, %v1429_v33  ;;  %v11398_v24 = vunpack.c.h.bf16 %v11391_v13  ;;  %v9509_v5 = vld [vmem:[#allocation2 + $0x8a0] sm:$0xff]  ;;  %v9547_v33 = vld [vmem:[#allocation2 + $0x950] sm:$0xff] }
 0x13b   :  { %v1526_v20 = vadd.f32 %v1525_v48, %v11397_v2  ;;  %v1373_v40 = vrot.slane %v1372_v27, 4  ;;  %v769_v47 = vunpack.c.l.bf16 %v272_v4  ;;  %v1213_v44 = vadd.f32 %v1212_v9, %v1211_v60  ;;  %v9324_v2 = vld [vmem:[#allocation2 + $0x5b0] sm:$0xff]  ;;  %11425 = vst [vmem:[#allocation39_spill] sm:$0xff] %v9509_v5 }
 0x13c   :  { %v1578_v23 = vsel %vm1218_vm4, %v11398_v24, 0.0  ;;  %v1577_v61 = vadd.f32 %v1576_v28, %v1575_v50  ;;  %v1275_v35 = vadd.f32 %v1274_v22, %v1273_v19  ;;  %v1433_v12 = vadd.f32 %v1432_v55, %v1431_v16  ;;  %v9316_v22 = vld [vmem:[#allocation2 + $0x590] sm:$0xff]  ;;  %v9501_v28 = vld [vmem:[#allocation2 + $0x880] sm:$0xff] }
 0x13d   :  { %v1527_v46 = vadd.f32 %v1526_v20, %v761_v31  ;;  %v1374_v10 = vadd.f32 %v1373_v40, %v1372_v27  ;;  %v1580_v8 = vsel %vm1218_vm4, %v758_v41, 0.0  ;;  %v773_v49 = vunpack.c.l.bf16 %v274_v3  ;;  %v9319_v27 = vld [vmem:[#allocation2 + $0x5a0] sm:$0xff]  ;;  %v9471_v16 = vld [vmem:[#allocation2 + $0x810] sm:$0xff]  ;;  %11423 = vst [vmem:[#allocation25_spill] sm:$0xff] %v9501_v28 }
 0x13e   :  { %v1579_v54 = vadd.f32 %v1578_v23, %v1577_v61  ;;  %v770_v17 = vunpack.c.h.bf16 %v272_v4  ;;  %v774_v15 = vunpack.c.h.bf16 %v274_v3  ;;  %v1434_v58 = vrot.slane %v1433_v12, 4  ;;  %v9304_v4 = vld [vmem:[#allocation2 + $0x550] sm:$0xff]  ;;  %11416 = vst [vmem:[#allocation23_spill] sm:$0xff] %v9471_v16  ;;  %v9477_v40 = vld [vmem:[#allocation2 + $0x820] sm:$0xff] }
 0x13f   :  { %v1528_v62 = vadd.f32 %v1527_v46, %v765_v29  ;;  %v1582_v34 = vsel %vm1218_vm4, %v762_v7, 0.0  ;;  %v777_v52 = vunpack.c.l.bf16 %v276_v21  ;;  %v1214_v57 = vrot.slane %v1213_v44, 2  ;;  %11417 = vst [vmem:[#allocation31_spill] sm:$0xff] %v9477_v40  ;;  %v9553_v28 = vld [vmem:[#allocation2 + $0x960] sm:$0xff] }
 0x140   :  { %v1581_v60 = vadd.f32 %v1580_v8, %v1579_v54  ;;  %v778_v31 = vunpack.c.h.bf16 %v276_v21  ;;  %v1276_v6 = vrot.slane %v1275_v35, 2  ;;  %v1375_v59 = vrot.slane %v1374_v10, 2  ;;  %v9340_v54 = vld [vmem:[#allocation2 + $0x5f0] sm:$0xff] }
 0x141   :  { %v1529_v37 = vadd.f32 %v1528_v62, %v769_v47  ;;  %v1584_v19 = vsel %vm1218_vm4, %v766_v45, 0.0  ;;  %v781_v41 = vunpack.c.l.bf16 %v278_v36  ;;  %v782_v63 = vunpack.c.h.bf16 %v278_v36  ;;  %v9327_v45 = vld [vmem:[#allocation2 + $0x5c0] sm:$0xff]  ;;  %v9331_v47 = vld [vmem:[#allocation2 + $0x5d0] sm:$0xff] }
 0x142   :  { %v1583_v53 = vadd.f32 %v1582_v34, %v1581_v60  ;;  %v1435_v0 = vadd.f32 %v1434_v58, %v1433_v12  ;;  %v1586_v7 = vsel %vm1218_vm4, %v770_v17, 0.0  ;;  %v1215_v43 = vadd.f32 %v1214_v57, %v1213_v44  ;;  %v9335_v36 = vld [vmem:[#allocation2 + $0x5e0] sm:$0xff]  ;;  %v9463_v12 = vld [vmem:[#allocation2 + $0x7f0] sm:$0xff] }
 0x143   :  { %v1530_v32 = vadd.f32 %v1529_v37, %v773_v49  ;;  %v1277_v9 = vadd.f32 %v1276_v6, %v1275_v35  ;;  %v1376_v14 = vadd.f32 %v1375_v59, %v1374_v10  ;;  %v1588_v1 = vsel %vm1218_vm4, %v774_v15, 0.0  ;;  %v9342_v17 = vld [vmem:[#allocation2 + $0x600] sm:$0xff]  ;;  %v9447_v59 = vld [vmem:[#allocation2 + $0x7b0] sm:$0xff]  ;;  %11414 = vst [vmem:[#allocation36_spill] sm:$0xff] %v9463_v12 }
 0x144   :  { %v1585_v51 = vadd.f32 %v1584_v19, %v1583_v53  ;;  %v1590_v13 = vsel %vm1218_vm4, %v778_v31, 0.0  ;;  %v1592_v3 = vsel %vm1218_vm4, %v782_v63, 0.0  ;;  %v1436_v11 = vrot.slane %v1435_v0, 2  ;;  %v9349_v6 = vld [vmem:[#allocation2 + $0x620] sm:$0xff]  ;;  %v9353_v63 = vld [vmem:[#allocation2 + $0x630] sm:$0xff] }
 0x145   :  { %v1531_v42 = vadd.f32 %v1530_v32, %v777_v52  ;;  %v1216_v29 = vrot.slane %v1215_v43, 1  ;;  %v1278_v50 = vrot.slane %v1277_v9, 1  ;;  %v1377_v21 = vrot.slane %v1376_v14, 1  ;;  %v9345_v52 = vld [vmem:[#allocation2 + $0x610] sm:$0xff]  ;;  %11399 = vst [vmem:[#allocation40_spill] sm:$0xff] %v9353_v63  ;;  %v9431_v53 = vld [vmem:[#allocation2 + $0x760] sm:$0xff] }
 0x146   :  { %v1587_v26 = vadd.f32 %v1586_v7, %v1585_v51  ;;  %v1437_v61 = vadd.f32 %v1436_v11, %v1435_v0  ;;  %v9360_v51 = vld [vmem:[#allocation2 + $0x650] sm:$0xff]  ;;  %v9438_v32 = vld [vmem:[#allocation2 + $0x780] sm:$0xff]  ;;  %v11428_v16 = vunpack.c.l.bf16 %v9304_v4  ;;  %v1047_v12 = vunpack.c.l.bf16 %v9553_v28 }
 0x147   :  { %v1532_v48 = vadd.f32 %v1531_v42, %v781_v41  ;;  %v1217_v8 = vadd.f32 %v1216_v29, %v1215_v43  ;;  %v1279_v58 = vadd.f32 %v1278_v50, %v1277_v9  ;;  %v1378_v34 = vadd.f32 %v1377_v21, %v1376_v14  ;;  %v9358_v42 = vld [vmem:[#allocation2 + $0x640] sm:$0xff]  ;;  %11401 = vst [vmem:[#allocation27_spill] sm:$0xff] %v9360_v51  ;;  %v9440_v21 = vld [vmem:[#allocation2 + $0x790] sm:$0xff] }
 0x148   :  { %v1589_v55 = vadd.f32 %v1588_v1, %v1587_v26  ;;  %v1438_v41 = vrot.slane %v1437_v61, 1  ;;  %11400 = vst [vmem:[#allocation19_spill] sm:$0xff] %v9358_v42  ;;  %v9408_v9 = vld [vmem:[#allocation2 + $0x700] sm:$0xff]  ;;  %v9455_v50 = vld [vmem:[#allocation2 + $0x7d0] sm:$0xff]  ;;  %v1048_v63 = vunpack.c.h.bf16 %v9553_v28 }
 0x149   :  { %v1533_v38 = vrot.slane %v1532_v48, 4  ;;  %v2119_v1 = vsel %vm2113_vm0, %v1378_v34, %v1217_v8  ;;  %v9445_v19 = vld [vmem:[#allocation2 + $0x7a0] sm:$0xff]  ;;  %v9479_v10 = vld [vmem:[#allocation2 + $0x830] sm:$0xff] }
 0x14a   :  { %v1591_v23 = vadd.f32 %v1590_v13, %v1589_v55  ;;  %v9365_v13 = vld [vmem:[#allocation2 + $0x660] sm:$0xff]  ;;  %11418 = vst [vmem:[#allocation37_spill] sm:$0xff] %v9479_v10  ;;  %v9487_v37 = vld [vmem:[#allocation2 + $0x850] sm:$0xff] }
 0x14b   :  { %v1534_v24 = vadd.f32 %v1533_v38, %v1532_v48  ;;  %11402 = vst [vmem:[#allocation33_spill] sm:$0xff] %v9365_v13  ;;  %v9370_v38 = vld [vmem:[#allocation2 + $0x670] sm:$0xff]  ;;  %v9372_v55 = vld [vmem:[#allocation2 + $0x680] sm:$0xff]  ;;  %11420 = vst [vmem:[#allocation18_spill] sm:$0xff] %v9487_v37 }
 0x14c   :  { %v1593_v62 = vadd.f32 %v1592_v3, %v1591_v23  ;;  %11403 = vst [vmem:[#allocation41_spill] sm:$0xff] %v9370_v38  ;;  %11404 = vst [vmem:[#allocation20_spill] sm:$0xff] %v9372_v55  ;;  %v9376_v23 = vld [vmem:[#allocation2 + $0x690] sm:$0xff]  ;;  %v11412_v48 = vld [vmem:[#allocation32_spill] sm:$0xff] }
 0x14d   :  { %v1535_v49 = vrot.slane %v1534_v24, 2  ;;  %11405 = vst [vmem:[#allocation28_spill] sm:$0xff] %v9376_v23  ;;  %v9402_v3 = vld [vmem:[#allocation2 + $0x6f0] sm:$0xff]  ;;  %v9461_v15 = vld [vmem:[#allocation2 + $0x7e0] sm:$0xff] }
 0x14e   :  { %v1594_v31 = vrot.slane %v1593_v62, 4  ;;  %11411 = vst [vmem:[#allocation43_spill] sm:$0xff] %v9402_v3  ;;  %11413 = vst [vmem:[#allocation22_spill] sm:$0xff] %v9461_v15  ;;  %v9469_v44 = vld [vmem:[#allocation2 + $0x800] sm:$0xff]  ;;  %v9495_v35 = vld [vmem:[#allocation2 + $0x870] sm:$0xff] }
 0x14f   :  { %v1536_v60 = vadd.f32 %v1535_v49, %v1534_v24  ;;  %v1439_v24 = vadd.f32 %v1438_v41, %v1437_v61  ;;  %v9389_v41 = vld [vmem:[#allocation2 + $0x6c0] sm:$0xff]  ;;  %v9433_v49 = vld [vmem:[#allocation2 + $0x770] sm:$0xff]  ;;  %11415 = vst [vmem:[#allocation30_spill] sm:$0xff] %v9469_v44  ;;  %11422 = vst [vmem:[#allocation38_spill] sm:$0xff] %v9495_v35 }
 0x150   :  { %v1595_v43 = vadd.f32 %v1594_v31, %v1593_v62  ;;  %v9382_v31 = vld [vmem:[#allocation2 + $0x6a0] sm:$0xff]  ;;  %11408 = vst [vmem:[#allocation21_spill] sm:$0xff] %v9389_v41  ;;  %v9410_v62 = vld [vmem:[#allocation2 + $0x710] sm:$0xff] }
 0x151   :  { %v1537_v7 = vrot.slane %v1536_v60, 1  ;;  %11406 = vst [vmem:[#allocation34_spill] sm:$0xff] %v9382_v31  ;;  %v391_v3 = vld [vmem:[#allocation2 + $0x8c0] sm:$0xff]  ;;  %v393_v57 = vld [vmem:[#allocation2 + $0x8d0] sm:$0xff]  ;;  %v11432_v38 = vunpack.c.l.bf16 %v9410_v62  ;;  %v11434_v40 = vunpack.c.h.bf16 %v9410_v62 }
 0x152   :  { %v1596_v29 = vrot.slane %v1595_v43, 2  ;;  %v9523_v41 = vld [vmem:[#allocation2 + $0x8f0] sm:$0xff]  ;;  %v9537_v23 = vld [vmem:[#allocation2 + $0x920] sm:$0xff]  ;;  %v1008_v39 = vunpack.c.h.bf16 %v391_v3  ;;  %v1011_v55 = vunpack.c.l.bf16 %v393_v57  ;;  %v1012_v46 = vunpack.c.h.bf16 %v393_v57 }
 0x153   :  { %v1538_v11 = vadd.f32 %v1537_v7, %v1536_v60  ;;  %v9384_v7 = vld [vmem:[#allocation2 + $0x6b0] sm:$0xff]  ;;  %v1020_v0 = vunpack.c.h.bf16 %v9523_v41  ;;  %v1031_v57 = vunpack.c.l.bf16 %v9537_v23  ;;  %v1032_v5 = vunpack.c.h.bf16 %v9537_v23  ;;  %v9573_v13 = vld [vmem:[#allocation2 + $0x980] sm:$0xff] }
 0x154   :  { %v1597_v34 = vadd.f32 %v1596_v29, %v1595_v43  ;;  %11407 = vst [vmem:[#allocation42_spill] sm:$0xff] %v9384_v7  ;;  %v9425_v43 = vld [vmem:[#allocation2 + $0x750] sm:$0xff]  ;;  %v9529_v7 = vld [vmem:[#allocation2 + $0x900] sm:$0xff]  ;;  %v11429_v23 = vunpack.c.h.bf16 %v9302_v30 }
 0x155   :  { %v2120_v60 = vsel %vm2115_vm1, %v1538_v11, %v2119_v1  ;;  %v9394_v1 = vld [vmem:[#allocation2 + $0x6d0] sm:$0xff]  ;;  %v9396_v11 = vld [vmem:[#allocation2 + $0x6e0] sm:$0xff]  ;;  %v1023_v31 = vunpack.c.l.bf16 %v9529_v7 }
 0x156   :  { %v2170_v61 = vsel %vm2147_vm3, %v2120_v60, 0.0  ;;  %v1598_v29 = vrot.slane %v1597_v34, 1  ;;  %11409 = vst [vmem:[#allocation29_spill] sm:$0xff] %v9394_v1  ;;  %11410 = vst [vmem:[#allocation35_spill] sm:$0xff] %v9396_v11  ;;  %v2121_v60 = vsel %vm2113_vm0, %v1439_v24, %v1279_v58  ;;  %v9414_v58 = vld [vmem:[#allocation2 + $0x720] sm:$0xff]  ;;  %v9416_v24 = vld [vmem:[#allocation2 + $0x730] sm:$0xff]  ;;  %v1024_v11 = vunpack.c.h.bf16 %v9529_v7 }
 0x157   :  { %v2171_v14 = vadd.f32 %v2170_v61, %v11412_v48  ;;  %v9521_v1 = vld [vmem:[#allocation2 + $0x8e0] sm:$0xff]  ;;  %v9539_v48 = vld [vmem:[#allocation2 + $0x930] sm:$0xff]  ;;  %v11433_v7 = vunpack.c.h.bf16 %v9408_v9  ;;  %v11438_v62 = vunpack.c.h.bf16 %v9414_v58 }
 0x158   :  { %v1599_v26 = vadd.f32 %v1598_v29, %v1597_v34  ;;  %v9423_v29 = vld [vmem:[#allocation2 + $0x740] sm:$0xff]  ;;  %v1015_v37 = vunpack.c.l.bf16 %v9521_v1  ;;  %v1016_v20 = vunpack.c.h.bf16 %v9521_v1  ;;  %v11430_v1 = vunpack.c.h.bf16 %v9304_v4 }
 0x159   :  { %v1793_v42 = vadd.f32 %v11434_v40, %v11433_v7  ;;  %v11435_v4 = vunpack.c.l.bf16 %v9307_v18 }
 0x15a   :  { %v2122_v61 = vsel %vm2115_vm1, %v1599_v26, %v2121_v60  ;;  %v9453_v60 = vld [vmem:[#allocation2 + $0x7c0] sm:$0xff]  ;;  %v9531_v26 = vld [vmem:[#allocation2 + $0x910] sm:$0xff]  ;;  %v1633_v10 = vadd.f32 %v11430_v1, %v11429_v23  ;;  %v11436_v23 = vunpack.c.h.bf16 %v9307_v18  ;;  %v11440_v18 = vunpack.c.h.bf16 %v9309_v25 }
 0x15b   :  { %v2172_v8 = vsel %vm2153_vm5, %v2122_v61, 0.0  ;;  %v9503_v61 = vld [vmem:[#allocation2 + $0x890] sm:$0xff]  ;;  %v1027_v35 = vunpack.c.l.bf16 %v9531_v26  ;;  %v1794_v40 = vadd.f32 %v1793_v42, %v11438_v62  ;;  %v11445_v62 = vunpack.c.l.bf16 %v9423_v29 }
 0x15c   :  { %v2173_v34 = vadd.f32 %v2172_v8, %v2171_v14  ;;  %v9485_v8 = vld [vmem:[#allocation2 + $0x840] sm:$0xff]  ;;  %11424 = vst [vmem:[#allocation45_spill] sm:$0xff] %v9503_v61  ;;  %v1019_v61 = vunpack.c.l.bf16 %v9523_v41  ;;  %v11431_v41 = vunpack.c.l.bf16 %v9408_v9  ;;  %v1634_v15 = vadd.f32 %v1633_v10, %v11436_v23 }
 0x15d   :  { %11419 = vst [vmem:[#allocation24_spill] sm:$0xff] %v9485_v8  ;;  %v9493_v14 = vld [vmem:[#allocation2 + $0x860] sm:$0xff]  ;;  %v1055_v23 = vunpack.c.l.bf16 %v9573_v13 }
 0x15e   :  { %2174 = vadd.xlane.f32.xlu1 %v2173_v34  ;;  %11421 = vst [vmem:[#allocation44_spill] sm:$0xff] %v9493_v14  ;;  %v9511_v34 = vld [vmem:[#allocation2 + $0x8b0] sm:$0xff]  ;;  %v9545_v8 = vld [vmem:[#allocation2 + $0x940] sm:$0xff]  ;;  %v1007_v14 = vunpack.c.l.bf16 %v391_v3  ;;  %v1028_v3 = vunpack.c.h.bf16 %v9531_v26  ;;  %v11427_v26 = vunpack.c.l.bf16 %v9302_v30  ;;  %v1760_v44 = vadd.f32 %v11432_v38, %v11431_v41 }
 0x15f   :  { %11426 = vst [vmem:[#allocation46_spill] sm:$0xff] %v9511_v34  ;;  %v9563_v34 = vld [vmem:[#allocation2 + $0x970] sm:$0xff]  ;;  %v11437_v38 = vunpack.c.l.bf16 %v9414_v58  ;;  %v1635_v10 = vadd.f32 %v1634_v15, %v11440_v18  ;;  %v11442_v58 = vunpack.c.h.bf16 %v9416_v24 }
 0x160   :  { %v1600_v51 = vadd.f32 %v11428_v16, %v11427_v26  ;;  %v1920_v16 = vadd.f32 %v1011_v55, %v1007_v14  ;;  %v1953_v26 = vadd.f32 %v1012_v46, %v1008_v39  ;;  %v9593_v30 = vld [vmem:[#allocation2 + $0x990] sm:$0xff]  ;;  %v1051_v41 = vunpack.c.l.bf16 %v9563_v34  ;;  %v9605_v46 = vld [vmem:[#allocation2 + $0x9a0] sm:$0xff] }
 0x161   :  { %v1761_v9 = vadd.f32 %v1760_v44, %v11437_v38  ;;  %v1052_v7 = vunpack.c.h.bf16 %v9563_v34  ;;  %v11439_v14 = vunpack.c.l.bf16 %v9309_v25  ;;  %v1795_v42 = vadd.f32 %v1794_v40, %v11442_v58 }
 0x162   :  { %v1601_v1 = vadd.f32 %v1600_v51, %v11435_v4  ;;  %v1921_v55 = vadd.f32 %v1920_v16, %v1015_v37  ;;  %v1954_v39 = vadd.f32 %v1953_v26, %v1016_v20  ;;  %v11441_v4 = vunpack.c.l.bf16 %v9416_v24  ;;  %v9617_v16 = vld [vmem:[#allocation2 + $0x9b0] sm:$0xff] }
 0x163   :  { %v1056_v38 = vunpack.c.h.bf16 %v9573_v13  ;;  %v11443_v26 = vunpack.c.l.bf16 %v9313_v56  ;;  %v11444_v25 = vunpack.c.h.bf16 %v9313_v56  ;;  %v11446_v24 = vunpack.c.h.bf16 %v9423_v29 }
 0x164   :  { %v1602_v51 = vadd.f32 %v1601_v1, %v11439_v14  ;;  %v1762_v44 = vadd.f32 %v1761_v9, %v11441_v4  ;;  %v1922_v37 = vadd.f32 %v1921_v55, %v1019_v61  ;;  %v1955_v20 = vadd.f32 %v1954_v39, %v1020_v0  ;;  %v9629_v55 = vld [vmem:[#allocation2 + $0x9c0] sm:$0xff] }
 0x165   :  { %v1636_v15 = vadd.f32 %v1635_v10, %v11444_v25  ;;  %v1796_v40 = vadd.f32 %v1795_v42, %v11446_v24  ;;  %v1059_v14 = vunpack.c.l.bf16 %v9593_v30  ;;  %v1060_v18 = vunpack.c.h.bf16 %v9593_v30 }
 0x166   :  { %v1603_v1 = vadd.f32 %v1602_v51, %v11443_v26  ;;  %v1763_v9 = vadd.f32 %v1762_v44, %v11445_v62  ;;  %v1923_v61 = vadd.f32 %v1922_v37, %v1023_v31  ;;  %v1956_v0 = vadd.f32 %v1955_v20, %v1024_v11  ;;  %v9641_v37 = vld [vmem:[#allocation2 + $0x9d0] sm:$0xff] }
 0x167   :  { %v11447_v39 = vunpack.c.l.bf16 %v9316_v22  ;;  %v11448_v56 = vunpack.c.h.bf16 %v9316_v22  ;;  %v11449_v4 = vunpack.c.l.bf16 %v9425_v43  ;;  %v11450_v29 = vunpack.c.h.bf16 %v9425_v43 }
 0x168   :  { %v1063_v42 = vunpack.c.l.bf16 %v9605_v46  ;;  %v1064_v26 = vunpack.c.h.bf16 %v9605_v46  ;;  %v1924_v31 = vadd.f32 %v1923_v61, %v1027_v35  ;;  %v1957_v11 = vadd.f32 %v1956_v0, %v1028_v3  ;;  %v9653_v61 = vld [vmem:[#allocation2 + $0x9e0] sm:$0xff] }
 0x169   :  { %v1604_v51 = vadd.f32 %v1603_v1, %v11447_v39  ;;  %v1637_v10 = vadd.f32 %v1636_v15, %v11448_v56  ;;  %v1764_v44 = vadd.f32 %v1763_v9, %v11449_v4  ;;  %v1797_v58 = vadd.f32 %v1796_v40, %v11450_v29 }
 0x16a   :  { %v11451_v20 = vunpack.c.l.bf16 %v9319_v27  ;;  %v11452_v22 = vunpack.c.h.bf16 %v9319_v27  ;;  %v11453_v15 = vunpack.c.l.bf16 %v9431_v53  ;;  %v11454_v43 = vunpack.c.h.bf16 %v9431_v53 }
 0x16b   :  { %v1067_v24 = vunpack.c.l.bf16 %v9617_v16  ;;  %v1068_v40 = vunpack.c.h.bf16 %v9617_v16  ;;  %v1925_v35 = vadd.f32 %v1924_v31, %v1031_v57  ;;  %v1958_v3 = vadd.f32 %v1957_v11, %v1032_v5  ;;  %v9669_v11 = vld [vmem:[#allocation2 + $0x9f0] sm:$0xff] }
 0x16c   :  { %v1605_v1 = vadd.f32 %v1604_v51, %v11451_v20  ;;  %v1638_v25 = vadd.f32 %v1637_v10, %v11452_v22  ;;  %v1765_v62 = vadd.f32 %v1764_v44, %v11453_v15  ;;  %v1798_v9 = vadd.f32 %v1797_v58, %v11454_v43 }
 0x16d   :  { %v11455_v0 = vunpack.c.l.bf16 %v9324_v2  ;;  %v11456_v27 = vunpack.c.h.bf16 %v9324_v2  ;;  %v11457_v56 = vunpack.c.l.bf16 %v9433_v49  ;;  %v11458_v53 = vunpack.c.h.bf16 %v9433_v49 }
 0x16e   :  { %v1071_v44 = vunpack.c.l.bf16 %v9629_v55  ;;  %v1072_v29 = vunpack.c.h.bf16 %v9629_v55  ;;  %v11459_v5 = vunpack.c.l.bf16 %v9539_v48  ;;  %v11460_v58 = vunpack.c.h.bf16 %v9539_v48 }
 0x16f   :  { %v1606_v39 = vadd.f32 %v1605_v1, %v11455_v0  ;;  %v1639_v51 = vadd.f32 %v1638_v25, %v11456_v27  ;;  %v1766_v10 = vadd.f32 %v1765_v62, %v11457_v56  ;;  %v1799_v4 = vadd.f32 %v1798_v9, %v11458_v53 }
 0x170   :  { %v1926_v57 = vadd.f32 %v1925_v35, %v11459_v5  ;;  %v1959_v31 = vadd.f32 %v1958_v3, %v11460_v58  ;;  %v11461_v2 = vunpack.c.l.bf16 %v9327_v45  ;;  %v11462_v1 = vunpack.c.h.bf16 %v9327_v45 }
 0x171   :  { %v11463_v49 = vunpack.c.l.bf16 %v9438_v32  ;;  %v11464_v15 = vunpack.c.h.bf16 %v9438_v32  ;;  %v1075_v43 = vunpack.c.l.bf16 %v9641_v37  ;;  %v1076_v9 = vunpack.c.h.bf16 %v9641_v37 }
 0x172   :  { %v1607_v20 = vadd.f32 %v1606_v39, %v11461_v2  ;;  %v1640_v22 = vadd.f32 %v1639_v51, %v11462_v1  ;;  %v11465_v48 = vunpack.c.l.bf16 %v9545_v8  ;;  %v11466_v3 = vunpack.c.h.bf16 %v9545_v8  ;;  %v9685_v39 = vld [vmem:[#allocation2 + $0xa00] sm:$0xff] }
 0x173   :  { %v1767_v25 = vadd.f32 %v1766_v10, %v11463_v49  ;;  %v1800_v62 = vadd.f32 %v1799_v4, %v11464_v15  ;;  %v11467_v45 = vunpack.c.l.bf16 %v9331_v47  ;;  %v11468_v51 = vunpack.c.h.bf16 %v9331_v47 }
 0x174   :  { %v1927_v35 = vadd.f32 %v1926_v57, %v11465_v48  ;;  %v1960_v0 = vadd.f32 %v1959_v31, %v11466_v3  ;;  %v11469_v32 = vunpack.c.l.bf16 %v9440_v21  ;;  %v11470_v53 = vunpack.c.h.bf16 %v9440_v21 }
 0x175   :  { %v1608_v27 = vadd.f32 %v1607_v20, %v11467_v45  ;;  %v1641_v56 = vadd.f32 %v1640_v22, %v11468_v51  ;;  %v1079_v5 = vunpack.c.l.bf16 %v9653_v61  ;;  %v1080_v57 = vunpack.c.h.bf16 %v9653_v61  ;;  %v9701_v20 = vld [vmem:[#allocation2 + $0xa10] sm:$0xff] }
 0x176   :  { %v1768_v10 = vadd.f32 %v1767_v25, %v11469_v32  ;;  %v1801_v4 = vadd.f32 %v1800_v62, %v11470_v53  ;;  %v11471_v8 = vunpack.c.l.bf16 %v9547_v33  ;;  %v11472_v31 = vunpack.c.h.bf16 %v9547_v33 }
 0x177   :  { %v11473_v47 = vunpack.c.l.bf16 %v9335_v36  ;;  %v11474_v22 = vunpack.c.h.bf16 %v9335_v36  ;;  %v11475_v21 = vunpack.c.l.bf16 %v9445_v19  ;;  %v11476_v15 = vunpack.c.h.bf16 %v9445_v19 }
 0x178   :  { %v1928_v58 = vadd.f32 %v1927_v35, %v11471_v8  ;;  %v1961_v2 = vadd.f32 %v1960_v0, %v11472_v31  ;;  %v1083_v48 = vunpack.c.l.bf16 %v9669_v11  ;;  %v1084_v35 = vunpack.c.h.bf16 %v9669_v11  ;;  %v9717_v0 = vld [vmem:[#allocation2 + $0xa20] sm:$0xff] }
 0x179   :  { %v1609_v1 = vadd.f32 %v1608_v27, %v11473_v47  ;;  %v1642_v49 = vadd.f32 %v1641_v56, %v11474_v22  ;;  %v1769_v25 = vadd.f32 %v1768_v10, %v11475_v21  ;;  %v1802_v62 = vadd.f32 %v1801_v4, %v11476_v15  ;;  %v9733_v4 = vld [vmem:[#allocation2 + $0xa30] sm:$0xff] }
 0x17a   :  { %v1929_v33 = vadd.f32 %v1928_v58, %v1047_v12  ;;  %v1962_v3 = vadd.f32 %v1961_v2, %v1048_v63  ;;  %v11477_v36 = vunpack.c.l.bf16 %v9340_v54  ;;  %v11478_v27 = vunpack.c.h.bf16 %v9340_v54 }
 0x17b   :  { %v11479_v19 = vunpack.c.l.bf16 %v9447_v59  ;;  %v11480_v32 = vunpack.c.h.bf16 %v9447_v59  ;;  %v1087_v53 = vunpack.c.l.bf16 %v9685_v39  ;;  %v1088_v12 = vunpack.c.h.bf16 %v9685_v39 }
 0x17c   :  { %v1610_v45 = vadd.f32 %v1609_v1, %v11477_v36  ;;  %v1643_v51 = vadd.f32 %v1642_v49, %v11478_v27  ;;  %v1930_v28 = vadd.f32 %v1929_v33, %v1051_v41  ;;  %v1963_v63 = vadd.f32 %v1962_v3, %v1052_v7  ;;  %v9749_v49 = vld [vmem:[#allocation2 + $0xa40] sm:$0xff] }
 0x17d   :  { %v1770_v56 = vadd.f32 %v1769_v25, %v11479_v19  ;;  %v1803_v10 = vadd.f32 %v1802_v62, %v11480_v32  ;;  %v11481_v54 = vunpack.c.l.bf16 %v9342_v17  ;;  %v11482_v58 = vunpack.c.h.bf16 %v9342_v17 }
 0x17e   :  { %v11483_v59 = vunpack.c.l.bf16 %v9453_v60  ;;  %v11484_v47 = vunpack.c.h.bf16 %v9453_v60  ;;  %v1091_v22 = vunpack.c.l.bf16 %v9701_v20  ;;  %v1092_v41 = vunpack.c.h.bf16 %v9701_v20 }
 0x17f   :  { %v1611_v8 = vadd.f32 %v1610_v45, %v11481_v54  ;;  %v1644_v31 = vadd.f32 %v1643_v51, %v11482_v58  ;;  %v1931_v34 = vadd.f32 %v1930_v28, %v1055_v23  ;;  %v1964_v7 = vadd.f32 %v1963_v63, %v1056_v38  ;;  %v9765_v45 = vld [vmem:[#allocation2 + $0xa50] sm:$0xff]  ;;  %v9781_v54 = vld [vmem:[#allocation2 + $0xa60] sm:$0xff] }
 0x180   :  { %v1771_v2 = vadd.f32 %v1770_v56, %v11483_v59  ;;  %v1804_v1 = vadd.f32 %v1803_v10, %v11484_v47  ;;  %v11485_v17 = vunpack.c.l.bf16 %v9345_v52  ;;  %v11486_v25 = vunpack.c.h.bf16 %v9345_v52 }
 0x181   :  { %v11487_v60 = vunpack.c.l.bf16 %v9455_v50  ;;  %v11488_v33 = vunpack.c.h.bf16 %v9455_v50  ;;  %v1095_v36 = vunpack.c.l.bf16 %v9717_v0  ;;  %v1096_v23 = vunpack.c.h.bf16 %v9717_v0  ;;  %v11491_v50 = vld [vmem:[#allocation22_spill] sm:$0xff] }
 0x182   :  { %v1612_v21 = vadd.f32 %v1611_v8, %v11485_v17  ;;  %v1645_v15 = vadd.f32 %v1644_v31, %v11486_v25  ;;  %v1932_v13 = vadd.f32 %v1931_v34, %v1059_v14  ;;  %v1965_v38 = vadd.f32 %v1964_v7, %v1060_v18 }
 0x183   :  { %v1772_v62 = vadd.f32 %v1771_v2, %v11487_v60  ;;  %v1805_v3 = vadd.f32 %v1804_v1, %v11488_v33  ;;  %v11489_v52 = vunpack.c.l.bf16 %v9349_v6  ;;  %v11490_v51 = vunpack.c.h.bf16 %v9349_v6  ;;  %v11494_v6 = vld [vmem:[#allocation40_spill] sm:$0xff]  ;;  %v11503_v33 = vld [vmem:[#allocation30_spill] sm:$0xff] }
 0x184   :  { %v11492_v56 = vunpack.c.l.bf16 %v11491_v50  ;;  %v11493_v10 = vunpack.c.h.bf16 %v11491_v50  ;;  %v1099_v63 = vunpack.c.l.bf16 %v9733_v4  ;;  %v1100_v14 = vunpack.c.h.bf16 %v9733_v4  ;;  %v11497_v2 = vld [vmem:[#allocation36_spill] sm:$0xff] }
 0x185   :  { %v1613_v27 = vadd.f32 %v1612_v21, %v11489_v52  ;;  %v1646_v19 = vadd.f32 %v1645_v15, %v11490_v51  ;;  %v1933_v30 = vadd.f32 %v1932_v13, %v1063_v42  ;;  %v1966_v18 = vadd.f32 %v1965_v38, %v1064_v26  ;;  %v11500_v21 = vld [vmem:[#allocation19_spill] sm:$0xff] }
 0x186   :  { %v1773_v32 = vadd.f32 %v1772_v62, %v11492_v56  ;;  %v1806_v28 = vadd.f32 %v1805_v3, %v11493_v10  ;;  %v11495_v8 = vunpack.c.l.bf16 %v11494_v6  ;;  %v11496_v31 = vunpack.c.h.bf16 %v11494_v6 }
 0x187   :  { %v11498_v47 = vunpack.c.l.bf16 %v11497_v2  ;;  %v11499_v34 = vunpack.c.h.bf16 %v11497_v2  ;;  %v1103_v17 = vunpack.c.l.bf16 %v9749_v49  ;;  %v1104_v42 = vunpack.c.h.bf16 %v9749_v49 }
 0x188   :  { %v1614_v58 = vadd.f32 %v1613_v27, %v11495_v8  ;;  %v1647_v59 = vadd.f32 %v1646_v19, %v11496_v31  ;;  %v1934_v46 = vadd.f32 %v1933_v30, %v1067_v24  ;;  %v1967_v26 = vadd.f32 %v1966_v18, %v1068_v40  ;;  %v9811_v40 = vld [vmem:[#allocation2 + $0xa70] sm:$0xff]  ;;  %v11506_v19 = vld [vmem:[#allocation27_spill] sm:$0xff] }
 0x189   :  { %v1774_v1 = vadd.f32 %v1773_v32, %v11498_v47  ;;  %v1807_v7 = vadd.f32 %v1806_v28, %v11499_v34  ;;  %v11501_v25 = vunpack.c.l.bf16 %v11500_v21  ;;  %v11502_v60 = vunpack.c.h.bf16 %v11500_v21  ;;  %v11509_v28 = vld [vmem:[#allocation23_spill] sm:$0xff]  ;;  %v11512_v31 = vld [vmem:[#allocation33_spill] sm:$0xff] }
 0x18a   :  { %v11504_v3 = vunpack.c.l.bf16 %v11503_v33  ;;  %v11505_v38 = vunpack.c.h.bf16 %v11503_v33  ;;  %v1107_v27 = vunpack.c.l.bf16 %v9765_v45  ;;  %v1108_v51 = vunpack.c.h.bf16 %v9765_v45  ;;  %v11515_v34 = vld [vmem:[#allocation31_spill] sm:$0xff] }
 0x18b   :  { %v1615_v15 = vadd.f32 %v1614_v58, %v11501_v25  ;;  %v1648_v62 = vadd.f32 %v1647_v59, %v11502_v60  ;;  %v1935_v16 = vadd.f32 %v1934_v46, %v1071_v44  ;;  %v1968_v24 = vadd.f32 %v1967_v26, %v1072_v29  ;;  %v9835_v25 = vld [vmem:[#allocation2 + $0x548] sm:$0xff] }
 0x18c   :  { %v1775_v13 = vadd.f32 %v1774_v1, %v11504_v3  ;;  %v1808_v52 = vadd.f32 %v1807_v7, %v11505_v38  ;;  %v11507_v50 = vunpack.c.l.bf16 %v11506_v19  ;;  %v11508_v32 = vunpack.c.h.bf16 %v11506_v19  ;;  %v11518_v60 = vld [vmem:[#allocation41_spill] sm:$0xff] }
 0x18d   :  { %v11510_v30 = vunpack.c.l.bf16 %v11509_v28  ;;  %v11511_v6 = vunpack.c.h.bf16 %v11509_v28  ;;  %v1111_v58 = vunpack.c.l.bf16 %v9781_v54  ;;  %v1112_v44 = vunpack.c.h.bf16 %v9781_v54  ;;  %v11521_v38 = vld [vmem:[#allocation37_spill] sm:$0xff] }
 0x18e   :  { %v1616_v56 = vadd.f32 %v1615_v15, %v11507_v50  ;;  %v1649_v10 = vadd.f32 %v1648_v62, %v11508_v32  ;;  %v1936_v55 = vadd.f32 %v1935_v16, %v1075_v43  ;;  %v1969_v29 = vadd.f32 %v1968_v24, %v1076_v9  ;;  %v9851_v50 = vld [vmem:[#allocation2 + $0x558] sm:$0xff]  ;;  %v11524_v32 = vld [vmem:[#allocation20_spill] sm:$0xff] }
 0x18f   :  { %v1776_v18 = vadd.f32 %v1775_v13, %v11510_v30  ;;  %v1809_v8 = vadd.f32 %v1808_v52, %v11511_v6  ;;  %v11513_v59 = vunpack.c.l.bf16 %v11512_v31  ;;  %v11514_v47 = vunpack.c.h.bf16 %v11512_v31  ;;  %v11527_v6 = vld [vmem:[#allocation24_spill] sm:$0xff] }
 0x190   :  { %v11516_v7 = vunpack.c.l.bf16 %v11515_v34  ;;  %v11517_v26 = vunpack.c.h.bf16 %v11515_v34  ;;  %v1115_v15 = vunpack.c.l.bf16 %v9811_v40  ;;  %v1116_v43 = vunpack.c.h.bf16 %v9811_v40 }
 0x191   :  { %v1617_v2 = vadd.f32 %v1616_v56, %v11513_v59  ;;  %v1650_v1 = vadd.f32 %v1649_v10, %v11514_v47  ;;  %v1937_v37 = vadd.f32 %v1936_v55, %v1079_v5  ;;  %v1970_v9 = vadd.f32 %v1969_v29, %v1080_v57  ;;  %v11530_v47 = vld [vmem:[#allocation28_spill] sm:$0xff] }
 0x192   :  { %v1777_v46 = vadd.f32 %v1776_v18, %v11516_v7  ;;  %v1810_v21 = vadd.f32 %v1809_v8, %v11517_v26  ;;  %v11519_v62 = vunpack.c.l.bf16 %v11518_v60  ;;  %v11520_v3 = vunpack.c.h.bf16 %v11518_v60  ;;  %v11533_v26 = vld [vmem:[#allocation18_spill] sm:$0xff]  ;;  %v10156_v56 = vld [vmem:[#allocation2 + $0x888] sm:$0xff] }
 0x193   :  { %v11522_v52 = vunpack.c.l.bf16 %v11521_v38  ;;  %v11523_v24 = vunpack.c.h.bf16 %v11521_v38  ;;  %v1938_v5 = vadd.f32 %v1937_v37, %v1083_v48  ;;  %v1971_v61 = vadd.f32 %v1970_v9, %v1084_v35  ;;  %v9867_v48 = vld [vmem:[#allocation2 + $0x568] sm:$0xff]  ;;  %11588 = vst [vmem:[#allocation28_spill] sm:$0xff] %v10156_v56 }
 0x194   :  { %v1618_v33 = vadd.f32 %v1617_v2, %v11519_v62  ;;  %v1651_v13 = vadd.f32 %v1650_v1, %v11520_v3  ;;  %v11525_v10 = vunpack.c.l.bf16 %v11524_v32  ;;  %v11526_v30 = vunpack.c.h.bf16 %v11524_v32  ;;  %v11536_v3 = vld [vmem:[#allocation34_spill] sm:$0xff]  ;;  %v10164_v57 = vld [vmem:[#allocation2 + $0x8a8] sm:$0xff] }
 0x195   :  { %v1778_v16 = vadd.f32 %v1777_v46, %v11522_v52  ;;  %v1811_v19 = vadd.f32 %v1810_v21, %v11523_v24  ;;  %v11528_v8 = vunpack.c.l.bf16 %v11527_v6  ;;  %v11529_v29 = vunpack.c.h.bf16 %v11527_v6  ;;  %v11539_v24 = vld [vmem:[#allocation44_spill] sm:$0xff]  ;;  %11590 = vst [vmem:[#allocation34_spill] sm:$0xff] %v10164_v57  ;;  %v10206_v62 = vld [vmem:[#allocation2 + $0x958] sm:$0xff] }
 0x196   :  { %v1619_v28 = vadd.f32 %v1618_v33, %v11525_v10  ;;  %v1652_v18 = vadd.f32 %v1651_v13, %v11526_v30  ;;  %v1939_v11 = vadd.f32 %v1938_v5, %v1087_v53  ;;  %v1972_v35 = vadd.f32 %v1971_v61, %v1088_v12  ;;  %v9883_v53 = vld [vmem:[#allocation2 + $0x578] sm:$0xff]  ;;  %v10148_v33 = vld [vmem:[#allocation2 + $0x868] sm:$0xff] }
 0x197   :  { %v1779_v55 = vadd.f32 %v1778_v16, %v11528_v8  ;;  %v1812_v31 = vadd.f32 %v1811_v19, %v11529_v29  ;;  %v11531_v1 = vunpack.c.l.bf16 %v11530_v47  ;;  %v11532_v7 = vunpack.c.h.bf16 %v11530_v47  ;;  %v11542_v30 = vld [vmem:[#allocation42_spill] sm:$0xff]  ;;  %11586 = vst [vmem:[#allocation20_spill] sm:$0xff] %v10148_v33  ;;  %v10196_v33 = vld [vmem:[#allocation2 + $0x928] sm:$0xff] }
 0x198   :  { %v11534_v21 = vunpack.c.l.bf16 %v11533_v26  ;;  %v11535_v9 = vunpack.c.h.bf16 %v11533_v26  ;;  %v1940_v39 = vadd.f32 %v1939_v11, %v1091_v22  ;;  %v1973_v12 = vadd.f32 %v1972_v35, %v1092_v41  ;;  %v9899_v22 = vld [vmem:[#allocation2 + $0x588] sm:$0xff]  ;;  %v11545_v29 = vld [vmem:[#allocation38_spill] sm:$0xff] }
 0x199   :  { %v1620_v34 = vadd.f32 %v1619_v28, %v11531_v1  ;;  %v1653_v46 = vadd.f32 %v1652_v18, %v11532_v7  ;;  %v11537_v13 = vunpack.c.l.bf16 %v11536_v3  ;;  %v11538_v52 = vunpack.c.h.bf16 %v11536_v3  ;;  %v11548_v7 = vld [vmem:[#allocation21_spill] sm:$0xff]  ;;  %v10190_v1 = vld [vmem:[#allocation2 + $0x918] sm:$0xff] }
 0x19a   :  { %v1780_v37 = vadd.f32 %v1779_v55, %v11534_v21  ;;  %v1813_v60 = vadd.f32 %v1812_v31, %v11535_v9  ;;  %v11540_v19 = vunpack.c.l.bf16 %v11539_v24  ;;  %v11541_v61 = vunpack.c.h.bf16 %v11539_v24  ;;  %v11551_v9 = vld [vmem:[#allocation25_spill] sm:$0xff]  ;;  %v10198_v10 = vld [vmem:[#allocation2 + $0x938] sm:$0xff]  ;;  %11594 = vst [vmem:[#allocation21_spill] sm:$0xff] %v10206_v62 }
 0x19b   :  { %v1621_v38 = vadd.f32 %v1620_v34, %v11537_v13  ;;  %v1654_v16 = vadd.f32 %v1653_v46, %v11538_v52  ;;  %v1941_v20 = vadd.f32 %v1940_v39, %v1095_v36  ;;  %v1974_v41 = vadd.f32 %v1973_v12, %v1096_v23  ;;  %v9915_v36 = vld [vmem:[#allocation2 + $0x598] sm:$0xff]  ;;  %v11554_v52 = vld [vmem:[#allocation29_spill] sm:$0xff]  ;;  %11592 = vst [vmem:[#allocation42_spill] sm:$0xff] %v10198_v10 }
 0x19c   :  { %v1781_v5 = vadd.f32 %v1780_v37, %v11540_v19  ;;  %v1814_v32 = vadd.f32 %v1813_v60, %v11541_v61  ;;  %v11543_v18 = vunpack.c.l.bf16 %v11542_v30  ;;  %v11544_v8 = vunpack.c.h.bf16 %v11542_v30  ;;  %v11557_v61 = vld [vmem:[#allocation45_spill] sm:$0xff]  ;;  %v10182_v13 = vld [vmem:[#allocation2 + $0x8f8] sm:$0xff] }
 0x19d   :  { %v11546_v31 = vunpack.c.l.bf16 %v11545_v29  ;;  %v11547_v35 = vunpack.c.h.bf16 %v11545_v29  ;;  %v1942_v0 = vadd.f32 %v1941_v20, %v1099_v63  ;;  %v1975_v23 = vadd.f32 %v1974_v41, %v1100_v14  ;;  %v9931_v63 = vld [vmem:[#allocation2 + $0x5a8] sm:$0xff] }
 0x19e   :  { %v1622_v6 = vadd.f32 %v1621_v38, %v11543_v18  ;;  %v1655_v55 = vadd.f32 %v1654_v16, %v11544_v8  ;;  %v11549_v46 = vunpack.c.l.bf16 %v11548_v7  ;;  %v11550_v21 = vunpack.c.h.bf16 %v11548_v7  ;;  %v11560_v8 = vld [vmem:[#allocation35_spill] sm:$0xff]  ;;  %v10124_v38 = vld [vmem:[#allocation2 + $0x808] sm:$0xff] }
 0x19f   :  { %v1782_v11 = vadd.f32 %v1781_v5, %v11546_v31  ;;  %v1815_v47 = vadd.f32 %v1814_v32, %v11547_v35  ;;  %v11552_v60 = vunpack.c.l.bf16 %v11551_v9  ;;  %v11553_v12 = vunpack.c.h.bf16 %v11551_v9  ;;  %v11563_v35 = vld [vmem:[#allocation39_spill] sm:$0xff]  ;;  %11580 = vst [vmem:[#allocation27_spill] sm:$0xff] %v10124_v38  ;;  %v10132_v34 = vld [vmem:[#allocation2 + $0x828] sm:$0xff] }
 0x1a0   :  { %v1623_v26 = vadd.f32 %v1622_v6, %v11549_v46  ;;  %v1656_v37 = vadd.f32 %v1655_v55, %v11550_v21  ;;  %v1943_v4 = vadd.f32 %v1942_v0, %v1103_v17  ;;  %v1976_v14 = vadd.f32 %v1975_v23, %v1104_v42  ;;  %v9947_v17 = vld [vmem:[#allocation2 + $0x5b8] sm:$0xff]  ;;  %v10116_v6 = vld [vmem:[#allocation2 + $0x7e8] sm:$0xff]  ;;  %11582 = vst [vmem:[#allocation33_spill] sm:$0xff] %v10132_v34 }
 0x1a1   :  { %v1783_v39 = vadd.f32 %v1782_v11, %v11552_v60  ;;  %v1816_v3 = vadd.f32 %v1815_v47, %v11553_v12  ;;  %v11555_v16 = vunpack.c.l.bf16 %v11554_v52  ;;  %v11556_v19 = vunpack.c.h.bf16 %v11554_v52  ;;  %v11566_v21 = vld [vmem:[#allocation43_spill] sm:$0xff]  ;;  %v11569_v12 = vld [vmem:[#allocation46_spill] sm:$0xff]  ;;  %11578 = vst [vmem:[#allocation19_spill] sm:$0xff] %v10116_v6  ;;  %v10140_v28 = vld [vmem:[#allocation2 + $0x848] sm:$0xff] }
 0x1a2   :  { %v11558_v32 = vunpack.c.l.bf16 %v11557_v61  ;;  %v11559_v41 = vunpack.c.h.bf16 %v11557_v61  ;;  %v1944_v49 = vadd.f32 %v1943_v4, %v1107_v27  ;;  %v1977_v42 = vadd.f32 %v1976_v14, %v1108_v51  ;;  %v9963_v27 = vld [vmem:[#allocation2 + $0x5c8] sm:$0xff]  ;;  %v10102_v46 = vld [vmem:[#allocation2 + $0x7b8] sm:$0xff]  ;;  %11584 = vst [vmem:[#allocation41_spill] sm:$0xff] %v10140_v28 }
 0x1a3   :  { %v1624_v24 = vadd.f32 %v1623_v26, %v11555_v16  ;;  %v1657_v5 = vadd.f32 %v1656_v37, %v11556_v19  ;;  %v11561_v55 = vunpack.c.l.bf16 %v11560_v8  ;;  %v11562_v31 = vunpack.c.h.bf16 %v11560_v8  ;;  %v10118_v26 = vld [vmem:[#allocation2 + $0x7f8] sm:$0xff]  ;;  %v10188_v28 = vld [vmem:[#allocation2 + $0x908] sm:$0xff] }
 0x1a4   :  { %v1784_v20 = vadd.f32 %v1783_v39, %v11558_v32  ;;  %v1817_v30 = vadd.f32 %v1816_v3, %v11559_v41  ;;  %v11564_v47 = vunpack.c.l.bf16 %v11563_v35  ;;  %v11565_v23 = vunpack.c.h.bf16 %v11563_v35  ;;  %v10092_v35 = vld [vmem:[#allocation2 + $0x788] sm:$0xff]  ;;  %11579 = vst [vmem:[#allocation30_spill] sm:$0xff] %v10118_v26  ;;  %v10134_v18 = vld [vmem:[#allocation2 + $0x838] sm:$0xff] }
 0x1a5   :  { %v1625_v29 = vadd.f32 %v1624_v24, %v11561_v55  ;;  %v1658_v11 = vadd.f32 %v1657_v5, %v11562_v31  ;;  %v1945_v45 = vadd.f32 %v1944_v49, %v1111_v58  ;;  %v1978_v51 = vadd.f32 %v1977_v42, %v1112_v44  ;;  %v9979_v58 = vld [vmem:[#allocation2 + $0x5d8] sm:$0xff]  ;;  %v10017_v49 = vld [vmem:[#allocation2 + $0x668] sm:$0xff]  ;;  %11583 = vst [vmem:[#allocation31_spill] sm:$0xff] %v10134_v18 }
 0x1a6   :  { %v1785_v0 = vadd.f32 %v1784_v20, %v11564_v47  ;;  %v1818_v7 = vadd.f32 %v1817_v30, %v11565_v23  ;;  %v11567_v37 = vunpack.c.l.bf16 %v11566_v21  ;;  %v11568_v60 = vunpack.c.h.bf16 %v11566_v21  ;;  %v9987_v20 = vld [vmem:[#allocation2 + $0x5e8] sm:$0xff]  ;;  %v9991_v55 = vld [vmem:[#allocation2 + $0x5f8] sm:$0xff] }
 0x1a7   :  { %v11570_v3 = vunpack.c.l.bf16 %v11569_v12  ;;  %v11571_v14 = vunpack.c.h.bf16 %v11569_v12  ;;  %v1946_v54 = vadd.f32 %v1945_v45, %v1115_v15  ;;  %v1979_v44 = vadd.f32 %v1978_v51, %v1116_v43  ;;  %v9995_v45 = vld [vmem:[#allocation2 + $0x608] sm:$0xff]  ;;  %v10150_v16 = vld [vmem:[#allocation2 + $0x878] sm:$0xff] }
 0x1a8   :  { %v1626_v9 = vadd.f32 %v1625_v29, %v11567_v37  ;;  %v1659_v39 = vadd.f32 %v1658_v11, %v11568_v60  ;;  %v10100_v24 = vld [vmem:[#allocation2 + $0x7a8] sm:$0xff]  ;;  %11587 = vst [vmem:[#allocation24_spill] sm:$0xff] %v10150_v16  ;;  %v10158_v42 = vld [vmem:[#allocation2 + $0x898] sm:$0xff]  ;;  %v11597_v59 = vunpack.c.l.bf16 %v9835_v25  ;;  %v11598_v16 = vunpack.c.l.bf16 %v9851_v50 }
 0x1a9   :  { %v1786_v4 = vadd.f32 %v1785_v0, %v11570_v3  ;;  %v1819_v52 = vadd.f32 %v1818_v7, %v11571_v14  ;;  %v1947_v41 = vrot.slane %v1946_v54, 4  ;;  %v1980_v30 = vrot.slane %v1979_v44, 4  ;;  %11589 = vst [vmem:[#allocation18_spill] sm:$0xff] %v10158_v42  ;;  %v10204_v56 = vld [vmem:[#allocation2 + $0x948] sm:$0xff]  ;;  %v10230_v34 = vld [vmem:[#allocation2 + $0x998] sm:$0xff] }
 0x1aa   :  { %v1627_v19 = vrot.slane %v1626_v9, 4  ;;  %v1660_v5 = vrot.slane %v1659_v39, 4  ;;  %11593 = vst [vmem:[#allocation38_spill] sm:$0xff] %v10204_v56  ;;  %v10216_v57 = vld [vmem:[#allocation2 + $0x968] sm:$0xff]  ;;  %v11600_v38 = vunpack.c.h.bf16 %v9851_v50  ;;  %v11603_v26 = vunpack.c.l.bf16 %v9867_v48  ;;  %v10261_v6 = vld [vmem:[#allocation2 + $0x9d8] sm:$0xff] }
 0x1ab   :  { %v1787_v61 = vrot.slane %v1786_v4, 4  ;;  %v1820_v32 = vrot.slane %v1819_v52, 4  ;;  %v1948_v29 = vadd.f32 %v1947_v41, %v1946_v54  ;;  %v1981_v31 = vadd.f32 %v1980_v30, %v1979_v44  ;;  %v10003_v41 = vld [vmem:[#allocation2 + $0x628] sm:$0xff]  ;;  %v10142_v44 = vld [vmem:[#allocation2 + $0x858] sm:$0xff]  ;;  %11595 = vst [vmem:[#allocation25_spill] sm:$0xff] %v10216_v57 }
 0x1ac   :  { %v1628_v15 = vadd.f32 %v1627_v19, %v1626_v9  ;;  %v1661_v8 = vadd.f32 %v1660_v5, %v1659_v39  ;;  %v10084_v9 = vld [vmem:[#allocation2 + $0x768] sm:$0xff]  ;;  %11585 = vst [vmem:[#allocation37_spill] sm:$0xff] %v10142_v44  ;;  %v10166_v54 = vld [vmem:[#allocation2 + $0x8b8] sm:$0xff]  ;;  %v1700_v2 = vsel %vm1218_vm4, %v11600_v38, 0.0  ;;  %v11604_v10 = vunpack.c.h.bf16 %v9883_v53 }
 0x1ad   :  { %v1788_v40 = vadd.f32 %v1787_v61, %v1786_v4  ;;  %v1821_v43 = vadd.f32 %v1820_v32, %v1819_v52  ;;  %v1949_v51 = vrot.slane %v1948_v29, 2  ;;  %v1982_v21 = vrot.slane %v1981_v31, 2  ;;  %v9999_v4 = vld [vmem:[#allocation2 + $0x618] sm:$0xff]  ;;  %11591 = vst [vmem:[#allocation44_spill] sm:$0xff] %v10166_v54  ;;  %v10224_v18 = vld [vmem:[#allocation2 + $0x988] sm:$0xff] }
 0x1ae   :  { %v1629_v47 = vrot.slane %v1628_v15, 2  ;;  %v1662_v0 = vrot.slane %v1661_v8, 2  ;;  %v10245_v44 = vld [vmem:[#allocation2 + $0x9a8] sm:$0xff]  ;;  %v1704_v62 = vsel %vm1218_vm4, %v11604_v10, 0.0  ;;  %v11606_v10 = vunpack.c.h.bf16 %v9899_v22 }
 0x1af   :  { %v1789_v23 = vrot.slane %v1788_v40, 2  ;;  %v1822_v7 = vrot.slane %v1821_v43, 2  ;;  %v1950_v14 = vadd.f32 %v1949_v51, %v1948_v29  ;;  %v1983_v52 = vadd.f32 %v1982_v21, %v1981_v31  ;;  %v10011_v51 = vld [vmem:[#allocation2 + $0x658] sm:$0xff]  ;;  %v10068_v21 = vld [vmem:[#allocation2 + $0x728] sm:$0xff] }
 0x1b0   :  { %v1630_v60 = vadd.f32 %v1629_v47, %v1628_v15  ;;  %v1663_v39 = vadd.f32 %v1662_v0, %v1661_v8  ;;  %v10005_v15 = vld [vmem:[#allocation2 + $0x638] sm:$0xff]  ;;  %v10009_v0 = vld [vmem:[#allocation2 + $0x648] sm:$0xff]  ;;  %v1706_v50 = vsel %vm1218_vm4, %v11606_v10, 0.0  ;;  %v11608_v10 = vunpack.c.h.bf16 %v9915_v36 }
 0x1b1   :  { %v1790_v12 = vadd.f32 %v1789_v23, %v1788_v40  ;;  %v1823_v3 = vadd.f32 %v1822_v7, %v1821_v43  ;;  %v1951_v30 = vrot.slane %v1950_v14, 1  ;;  %v1984_v37 = vrot.slane %v1983_v52, 1  ;;  %v10076_v40 = vld [vmem:[#allocation2 + $0x748] sm:$0xff] }
 0x1b2   :  { %v1631_v19 = vrot.slane %v1630_v60, 1  ;;  %v1664_v5 = vrot.slane %v1663_v39, 1  ;;  %v10266_v57 = vld [vmem:[#allocation2 + $0x9e8] sm:$0xff]  ;;  %v11614_v38 = vunpack.c.l.bf16 %v9931_v63 }
 0x1b3   :  { %v1791_v61 = vrot.slane %v1790_v12, 1  ;;  %v1824_v32 = vrot.slane %v1823_v3, 1  ;;  %v1952_v23 = vadd.f32 %v1951_v30, %v1950_v14  ;;  %v1985_v7 = vadd.f32 %v1984_v37, %v1983_v52  ;;  %v10031_v30 = vld [vmem:[#allocation2 + $0x688] sm:$0xff]  ;;  %v10062_v14 = vld [vmem:[#allocation2 + $0x718] sm:$0xff] }
 0x1b4   :  { %v1632_v43 = vadd.f32 %v1631_v19, %v1630_v60  ;;  %v1665_v29 = vadd.f32 %v1664_v5, %v1663_v39  ;;  %v10047_v19 = vld [vmem:[#allocation2 + $0x6d8] sm:$0xff] }
 0x1b5   :  { %v1792_v31 = vadd.f32 %v1791_v61, %v1790_v12  ;;  %v1825_v47 = vadd.f32 %v1824_v32, %v1823_v3  ;;  %v10023_v3 = vld [vmem:[#allocation2 + $0x678] sm:$0xff]  ;;  %11575 = vst [vmem:[#allocation22_spill] sm:$0xff] %v10047_v19  ;;  %v10180_v19 = vld [vmem:[#allocation2 + $0x8e8] sm:$0xff] }
 0x1b6   :  { %v10054_v60 = vld [vmem:[#allocation2 + $0x6f8] sm:$0xff] }
 0x1b7   :  { %v2123_v11 = vsel %vm2113_vm0, %v1792_v31, %v1632_v43  ;;  %v2125_v8 = vsel %vm2113_vm0, %v1825_v47, %v1665_v29  ;;  %v10033_v43 = vld [vmem:[#allocation2 + $0x698] sm:$0xff]  ;;  %v10039_v31 = vld [vmem:[#allocation2 + $0x6a8] sm:$0xff]  ;;  %11577 = vst [vmem:[#allocation36_spill] sm:$0xff] %v10054_v60 }
 0x1b8   :  { %v2124_v12 = vsel %vm2115_vm1, %v1952_v23, %v2123_v11  ;;  %v2126_v37 = vsel %vm2115_vm1, %v1985_v7, %v2125_v8  ;;  %v10041_v47 = vld [vmem:[#allocation2 + $0x6b8] sm:$0xff]  ;;  %v10060_v7 = vld [vmem:[#allocation2 + $0x708] sm:$0xff] }
 0x1b9   :  { %v2144_v5 = vsel %vm2086_vm2, %v2126_v37, 0.0  ;;  %v2158_v61 = vsel %vm2147_vm3, %v2124_v12, 0.0  ;;  %v2177_v32 = vsel %vm2147_vm3, %v2126_v37, 0.0  ;;  %v10045_v37 = vld [vmem:[#allocation2 + $0x6c8] sm:$0xff]  ;;  %v10070_v23 = vld [vmem:[#allocation2 + $0x738] sm:$0xff] }
 0x1ba   :  { %v2159_v8 = vsel %vm2147_vm3, %v2144_v5, 0.0  ;;  %v10037_v29 = vadd.f32 %v2177_v32, %v2158_v61  ;;  %11574 = vst [vmem:[#allocation32_spill] sm:$0xff] %v10045_v37  ;;  %v10052_v32 = vld [vmem:[#allocation2 + $0x6e8] sm:$0xff]  ;;  %v10078_v11 = vld [vmem:[#allocation2 + $0x758] sm:$0xff] }
 0x1bb   :  { %v2160_v12 = vadd.f32 %v2159_v8, %v2158_v61  ;;  %11576 = vst [vmem:[#allocation40_spill] sm:$0xff] %v10052_v32  ;;  %v10086_v61 = vld [vmem:[#allocation2 + $0x778] sm:$0xff]  ;;  %v10172_v60 = vld [vmem:[#allocation2 + $0x8c8] sm:$0xff]  ;;  %v11599_v32 = vunpack.c.h.bf16 %v9835_v25 }
 0x1bc   :  { %11573 = vst [vmem:[#allocation26_spill] sm:$0xff] %v10037_v29  ;;  %v10094_v52 = vld [vmem:[#allocation2 + $0x798] sm:$0xff]  ;;  %v11601_v29 = vunpack.c.h.bf16 %v9867_v48  ;;  %v1708_v48 = vsel %vm1218_vm4, %v11608_v10, 0.0 }
 0x1bd   :  { %2165 = vadd.xlane.f32.xlu0 %v2160_v12  ;;  %v10108_v12 = vld [vmem:[#allocation2 + $0x7c8] sm:$0xff]  ;;  %v10110_v5 = vld [vmem:[#allocation2 + $0x7d8] sm:$0xff]  ;;  %v1699_v54 = vsel %vm1218_vm4, %v11599_v32, 0.0 }
 0x1be   :  { %v10126_v39 = vld [vmem:[#allocation2 + $0x818] sm:$0xff]  ;;  %v1702_v42 = vsel %vm1218_vm4, %v11601_v29, 0.0  ;;  %v10252_v32 = vld [vmem:[#allocation2 + $0x9c8] sm:$0xff] }
 0x1bf   :  { %11581 = vst [vmem:[#allocation23_spill] sm:$0xff] %v10126_v39  ;;  %v10174_v8 = vld [vmem:[#allocation2 + $0x8d8] sm:$0xff]  ;;  %v1666_v39 = vadd.f32 %v11598_v16, %v11597_v59  ;;  %v1701_v16 = vadd.f32 %v1700_v2, %v1699_v54  ;;  %11602 = vst [vmem:[#allocation45_spill] sm:$0xff] %v10252_v32  ;;  %v10280_v59 = vld [vmem:[#allocation2 + $0xa08] sm:$0xff]  ;;  %v11611_v2 = vunpack.c.l.bf16 %v10060_v7  ;;  %v11612_v54 = vunpack.c.l.bf16 %v10062_v14 }
 0x1c0   :  { %v10218_v37 = vld [vmem:[#allocation2 + $0x978] sm:$0xff] }
 0x1c1   :  { %11596 = vst [vmem:[#allocation29_spill] sm:$0xff] %v10218_v37  ;;  %v10250_v25 = vld [vmem:[#allocation2 + $0x9b8] sm:$0xff]  ;;  %v1667_v29 = vadd.f32 %v1666_v39, %v11603_v26  ;;  %v1703_v56 = vadd.f32 %v1702_v42, %v1701_v16  ;;  %v11605_v26 = vunpack.c.l.bf16 %v9883_v53  ;;  %v11609_v53 = vunpack.c.l.bf16 %v9915_v36 }
 0x1c2   :  { %v10275_v37 = vld [vmem:[#allocation2 + $0x9f8] sm:$0xff]  ;;  %v1826_v42 = vadd.f32 %v11612_v54, %v11611_v2  ;;  %v11618_v54 = vunpack.c.l.bf16 %v10068_v21 }
 0x1c3   :  { %v1668_v39 = vadd.f32 %v1667_v29, %v11605_v26  ;;  %v1705_v16 = vadd.f32 %v1704_v62, %v1703_v56  ;;  %v11607_v29 = vunpack.c.l.bf16 %v9899_v22  ;;  %v11610_v22 = vunpack.c.h.bf16 %v9931_v63 }
 0x1c5   :  { %v1669_v26 = vadd.f32 %v1668_v39, %v11607_v29  ;;  %v1707_v56 = vadd.f32 %v1706_v50, %v1705_v16  ;;  %v1710_v39 = vsel %vm1218_vm4, %v11610_v22, 0.0  ;;  %v11613_v50 = vunpack.c.h.bf16 %v10060_v7 }
 0x1c6   :  { %v11616_v22 = vunpack.c.h.bf16 %v10062_v14 }
 0x1c7   :  { %v1670_v32 = vadd.f32 %v1669_v26, %v11609_v53  ;;  %v1709_v10 = vadd.f32 %v1708_v48, %v1707_v56  ;;  %v1859_v16 = vsel %vm1218_vm4, %v11613_v50, 0.0  ;;  %v11615_v53 = vunpack.c.h.bf16 %v9947_v17 }
 0x1c8   :  { %v1860_v48 = vsel %vm1218_vm4, %v11616_v22, 0.0  ;;  %v11617_v56 = vunpack.c.h.bf16 %v10068_v21  ;;  %v1827_v50 = vadd.f32 %v1826_v42, %v11618_v54  ;;  %v11621_v22 = vunpack.c.h.bf16 %v9979_v58 }
 0x1c9   :  { %v1671_v36 = vadd.f32 %v1670_v32, %v11614_v38  ;;  %v1712_v26 = vsel %vm1218_vm4, %v11615_v53, 0.0  ;;  %v1711_v7 = vadd.f32 %v1710_v39, %v1709_v10  ;;  %v1861_v63 = vadd.f32 %v1860_v48, %v1859_v16 }
 0x1ca   :  { %v1862_v29 = vsel %vm1218_vm4, %v11617_v56, 0.0  ;;  %v11619_v32 = vunpack.c.l.bf16 %v9947_v17  ;;  %v11620_v53 = vunpack.c.h.bf16 %v9963_v27  ;;  %v1716_v62 = vsel %vm1218_vm4, %v11621_v22, 0.0 }
 0x1cb   :  { %v11622_v56 = vunpack.c.h.bf16 %v10070_v23  ;;  %v1713_v39 = vadd.f32 %v1712_v26, %v1711_v7  ;;  %v11623_v21 = vunpack.c.h.bf16 %v9987_v20  ;;  %v11624_v17 = vunpack.c.l.bf16 %v10070_v23 }
 0x1cc   :  { %v1672_v38 = vadd.f32 %v1671_v36, %v11619_v32  ;;  %v1714_v14 = vsel %vm1218_vm4, %v11620_v53, 0.0  ;;  %v1863_v16 = vadd.f32 %v1862_v29, %v1861_v63  ;;  %v11625_v36 = vunpack.c.l.bf16 %v9963_v27 }
 0x1cd   :  { %v1864_v2 = vsel %vm1218_vm4, %v11622_v56, 0.0  ;;  %v1718_v42 = vsel %vm1218_vm4, %v11623_v21, 0.0  ;;  %v1828_v10 = vadd.f32 %v1827_v50, %v11624_v17  ;;  %v11626_v54 = vunpack.c.h.bf16 %v9991_v55 }
 0x1ce   :  { %v1673_v48 = vadd.f32 %v1672_v38, %v11625_v36  ;;  %v11627_v53 = vunpack.c.h.bf16 %v9995_v45  ;;  %v11628_v26 = vunpack.c.h.bf16 %v10076_v40  ;;  %v1715_v56 = vadd.f32 %v1714_v14, %v1713_v39 }
 0x1cf   :  { %v1720_v32 = vsel %vm1218_vm4, %v11626_v54, 0.0  ;;  %v11629_v23 = vunpack.c.h.bf16 %v9999_v4  ;;  %v11630_v27 = vunpack.c.l.bf16 %v10076_v40  ;;  %v1865_v63 = vadd.f32 %v1864_v2, %v1863_v16 }
 0x1d0   :  { %v1722_v22 = vsel %vm1218_vm4, %v11627_v53, 0.0  ;;  %v1866_v7 = vsel %vm1218_vm4, %v11628_v26, 0.0  ;;  %v11631_v38 = vunpack.c.l.bf16 %v9979_v58  ;;  %v11632_v17 = vunpack.c.h.bf16 %v10003_v41 }
 0x1d1   :  { %v1724_v29 = vsel %vm1218_vm4, %v11629_v23, 0.0  ;;  %v1829_v50 = vadd.f32 %v1828_v10, %v11630_v27  ;;  %v11633_v54 = vunpack.c.h.bf16 %v10005_v15  ;;  %v11634_v14 = vunpack.c.h.bf16 %v10078_v11 }
 0x1d2   :  { %v1674_v21 = vadd.f32 %v1673_v48, %v11631_v38  ;;  %v1726_v36 = vsel %vm1218_vm4, %v11632_v17, 0.0  ;;  %v1717_v26 = vadd.f32 %v1716_v62, %v1715_v56  ;;  %v11635_v40 = vunpack.c.h.bf16 %v10009_v0 }
 0x1d3   :  { %v1728_v53 = vsel %vm1218_vm4, %v11633_v54, 0.0  ;;  %v1868_v39 = vsel %vm1218_vm4, %v11634_v14, 0.0  ;;  %v11636_v58 = vunpack.c.l.bf16 %v10078_v11  ;;  %v1867_v16 = vadd.f32 %v1866_v7, %v1865_v63 }
 0x1d4   :  { %v1730_v2 = vsel %vm1218_vm4, %v11635_v40, 0.0  ;;  %v11637_v48 = vunpack.c.l.bf16 %v9987_v20  ;;  %v11638_v27 = vunpack.c.h.bf16 %v10011_v51  ;;  %v11639_v17 = vunpack.c.h.bf16 %v10017_v49 }
 0x1d5   :  { %v1830_v10 = vadd.f32 %v1829_v50, %v11636_v58  ;;  %v11640_v62 = vunpack.c.h.bf16 %v10084_v9  ;;  %v1719_v14 = vadd.f32 %v1718_v42, %v1717_v26  ;;  %v11641_v11 = vunpack.c.h.bf16 %v10023_v3 }
 0x1d6   :  { %v1675_v23 = vadd.f32 %v1674_v21, %v11637_v48  ;;  %v1732_v38 = vsel %vm1218_vm4, %v11638_v27, 0.0  ;;  %v10377_v54 = vsel %vm1218_vm4, %v11639_v17, 0.0  ;;  %v11642_v20 = vunpack.c.l.bf16 %v10084_v9 }
 0x1d7   :  { %v1870_v56 = vsel %vm1218_vm4, %v11640_v62, 0.0  ;;  %v10385_v7 = vsel %vm1218_vm4, %v11641_v11, 0.0  ;;  %v1869_v63 = vadd.f32 %v1868_v39, %v1867_v16  ;;  %v11643_v21 = vunpack.c.l.bf16 %v9991_v55 }
 0x1d8   :  { %v1831_v50 = vadd.f32 %v1830_v10, %v11642_v20  ;;  %v11644_v58 = vunpack.c.h.bf16 %v10031_v30  ;;  %v11645_v27 = vunpack.c.h.bf16 %v10033_v43  ;;  %v11646_v26 = vunpack.c.h.bf16 %v10086_v61 }
 0x1d9   :  { %v1676_v40 = vadd.f32 %v1675_v23, %v11643_v21  ;;  %v1721_v9 = vadd.f32 %v1720_v32, %v1719_v14  ;;  %v11647_v39 = vunpack.c.h.bf16 %v10039_v31  ;;  %v11648_v10 = vunpack.c.l.bf16 %v10086_v61 }
 0x1da   :  { %v10394_v48 = vsel %vm1218_vm4, %v11644_v58, 0.0  ;;  %v10399_v42 = vsel %vm1218_vm4, %v11645_v27, 0.0  ;;  %v1872_v17 = vsel %vm1218_vm4, %v11646_v26, 0.0  ;;  %v1871_v23 = vadd.f32 %v1870_v56, %v1869_v63 }
 0x1db   :  { %v10407_v55 = vsel %vm1218_vm4, %v11647_v39, 0.0  ;;  %v1832_v16 = vadd.f32 %v1831_v50, %v11648_v10  ;;  %v11649_v62 = vunpack.c.l.bf16 %v9995_v45  ;;  %v11650_v20 = vunpack.c.h.bf16 %v10041_v47 }
 0x1dc   :  { %v11651_v58 = vunpack.c.h.bf16 %v10092_v35  ;;  %v11652_v14 = vunpack.c.h.bf16 %v10094_v52  ;;  %v1723_v26 = vadd.f32 %v1722_v22, %v1721_v9  ;;  %v11653_v61 = vunpack.c.l.bf16 %v10092_v35 }
 0x1dd   :  { %v1677_v11 = vadd.f32 %v1676_v40, %v11649_v62  ;;  %v10416_v21 = vsel %vm1218_vm4, %v11650_v20, 0.0  ;;  %v1873_v50 = vadd.f32 %v1872_v17, %v1871_v23  ;;  %v11654_v45 = vunpack.c.l.bf16 %v10172_v60 }
 0x1de   :  { %v1874_v32 = vsel %vm1218_vm4, %v11651_v58, 0.0  ;;  %v1876_v27 = vsel %vm1218_vm4, %v11652_v14, 0.0  ;;  %v1833_v56 = vadd.f32 %v1832_v16, %v11653_v61  ;;  %v11655_v63 = vunpack.c.l.bf16 %v10174_v8 }
 0x1df   :  { %v11656_v39 = vunpack.c.l.bf16 %v9999_v4  ;;  %v11657_v62 = vunpack.c.h.bf16 %v10172_v60  ;;  %v11658_v58 = vunpack.c.h.bf16 %v10174_v8  ;;  %v11659_v35 = vunpack.c.h.bf16 %v10180_v19 }
 0x1e0   :  { %v1986_v40 = vadd.f32 %v11655_v63, %v11654_v45  ;;  %v1725_v9 = vadd.f32 %v1724_v29, %v1723_v26  ;;  %v11660_v16 = vunpack.c.l.bf16 %v10094_v52  ;;  %v1875_v14 = vadd.f32 %v1874_v32, %v1873_v50 }
 0x1e1   :  { %v1678_v10 = vadd.f32 %v1677_v11, %v11656_v39  ;;  %v2019_v20 = vsel %vm1218_vm4, %v11657_v62, 0.0  ;;  %v2020_v22 = vsel %vm1218_vm4, %v11658_v58, 0.0  ;;  %v2022_v17 = vsel %vm1218_vm4, %v11659_v35, 0.0 }
 0x1e2   :  { %v1834_v23 = vadd.f32 %v1833_v56, %v11660_v16  ;;  %v11661_v4 = vunpack.c.l.bf16 %v10180_v19  ;;  %v11662_v60 = vunpack.c.l.bf16 %v10003_v41  ;;  %v11663_v45 = vunpack.c.h.bf16 %v10100_v24 }
 0x1e3   :  { %v2021_v63 = vadd.f32 %v2020_v22, %v2019_v20  ;;  %v11664_v39 = vunpack.c.h.bf16 %v10182_v13  ;;  %v1727_v29 = vadd.f32 %v1726_v36, %v1725_v9  ;;  %v11665_v52 = vunpack.c.l.bf16 %v10100_v24 }
 0x1e4   :  { %v1987_v11 = vadd.f32 %v1986_v40, %v11661_v4  ;;  %v1679_v61 = vadd.f32 %v1678_v10, %v11662_v60  ;;  %v1878_v8 = vsel %vm1218_vm4, %v11663_v45, 0.0  ;;  %v1877_v32 = vadd.f32 %v1876_v27, %v1875_v14 }
 0x1e5   :  { %v2024_v62 = vsel %vm1218_vm4, %v11664_v39, 0.0  ;;  %v1835_v26 = vadd.f32 %v1834_v23, %v11665_v52  ;;  %v11666_v19 = vunpack.c.l.bf16 %v10182_v13  ;;  %v11667_v41 = vunpack.c.l.bf16 %v10005_v15 }
 0x1e6   :  { %v11668_v40 = vunpack.c.h.bf16 %v10102_v46  ;;  %v2023_v20 = vadd.f32 %v2022_v17, %v2021_v63  ;;  %v11669_v58 = vunpack.c.h.bf16 %v10188_v28  ;;  %v1729_v36 = vadd.f32 %v1728_v53, %v1727_v29 }
 0x1e7   :  { %v1988_v56 = vadd.f32 %v1987_v11, %v11666_v19  ;;  %v1680_v50 = vadd.f32 %v1679_v61, %v11667_v41  ;;  %v11670_v24 = vunpack.c.l.bf16 %v10102_v46  ;;  %v1879_v27 = vadd.f32 %v1878_v8, %v1877_v32  ;;  %v11683_v41 = vld [vmem:[#allocation19_spill] sm:$0xff] }
 0x1e8   :  { %v1880_v10 = vsel %vm1218_vm4, %v11668_v40, 0.0  ;;  %v2026_v22 = vsel %vm1218_vm4, %v11669_v58, 0.0  ;;  %v11671_v13 = vunpack.c.l.bf16 %v10188_v28  ;;  %v11672_v15 = vunpack.c.l.bf16 %v10009_v0 }
 0x1e9   :  { %v1836_v35 = vadd.f32 %v1835_v26, %v11670_v24  ;;  %v11673_v23 = vunpack.c.h.bf16 %v10108_v12  ;;  %v2025_v17 = vadd.f32 %v2024_v62, %v2023_v20  ;;  %v11674_v4 = vunpack.c.h.bf16 %v10190_v1  ;;  %v11685_v20 = vld [vmem:[#allocation42_spill] sm:$0xff] }
 0x1ea   :  { %v1989_v9 = vadd.f32 %v1988_v56, %v11671_v13  ;;  %v1681_v16 = vadd.f32 %v1680_v50, %v11672_v15  ;;  %v1731_v53 = vadd.f32 %v1730_v2, %v1729_v36  ;;  %v11675_v46 = vunpack.c.l.bf16 %v10108_v12  ;;  %v11690_v13 = vld [vmem:[#allocation30_spill] sm:$0xff] }
 0x1eb   :  { %v1882_v14 = vsel %vm1218_vm4, %v11673_v23, 0.0  ;;  %v2028_v11 = vsel %vm1218_vm4, %v11674_v4, 0.0  ;;  %v1881_v61 = vadd.f32 %v1880_v10, %v1879_v27  ;;  %v11676_v28 = vunpack.c.l.bf16 %v10190_v1  ;;  %v11692_v23 = vld [vmem:[#allocation38_spill] sm:$0xff] }
 0x1ec   :  { %v1837_v60 = vadd.f32 %v1836_v35, %v11675_v46  ;;  %v11677_v0 = vunpack.c.l.bf16 %v10011_v51  ;;  %v11678_v63 = vunpack.c.h.bf16 %v10110_v5  ;;  %v2027_v62 = vadd.f32 %v2026_v22, %v2025_v17 }
 0x1ed   :  { %v1990_v45 = vadd.f32 %v1989_v9, %v11676_v28  ;;  %v11679_v29 = vunpack.c.h.bf16 %v10196_v33  ;;  %v1733_v2 = vadd.f32 %v1732_v38, %v1731_v53  ;;  %v11680_v12 = vunpack.c.l.bf16 %v10110_v5  ;;  %v11697_v28 = vld [vmem:[#allocation27_spill] sm:$0xff] }
 0x1ee   :  { %v1682_v8 = vadd.f32 %v1681_v16, %v11677_v0  ;;  %v1884_v39 = vsel %vm1218_vm4, %v11678_v63, 0.0  ;;  %v1883_v32 = vadd.f32 %v1882_v14, %v1881_v61  ;;  %v11681_v1 = vunpack.c.l.bf16 %v10196_v33  ;;  %v11699_v63 = vld [vmem:[#allocation21_spill] sm:$0xff] }
 0x1ef   :  { %v2030_v52 = vsel %vm1218_vm4, %v11679_v29, 0.0  ;;  %v1838_v26 = vadd.f32 %v1837_v60, %v11680_v12  ;;  %v11682_v51 = vunpack.c.l.bf16 %v10017_v49  ;;  %v11684_v50 = vunpack.c.h.bf16 %v11683_v41 }
 0x1f0   :  { %v1991_v19 = vadd.f32 %v1990_v45, %v11681_v1  ;;  %v2029_v10 = vadd.f32 %v2028_v11, %v2027_v62  ;;  %v11686_v58 = vunpack.c.h.bf16 %v11685_v20  ;;  %v1735_v38 = vadd.f32 %v10377_v54, %v1733_v2  ;;  %v11704_v1 = vld [vmem:[#allocation23_spill] sm:$0xff] }
 0x1f1   :  { %v1683_v56 = vadd.f32 %v1682_v8, %v11682_v51  ;;  %v1886_v40 = vsel %vm1218_vm4, %v11684_v50, 0.0  ;;  %v11687_v5 = vunpack.c.l.bf16 %v11683_v41  ;;  %v1885_v24 = vadd.f32 %v1884_v39, %v1883_v32  ;;  %v11706_v41 = vld [vmem:[#allocation25_spill] sm:$0xff] }
 0x1f2   :  { %v2032_v22 = vsel %vm1218_vm4, %v11686_v58, 0.0  ;;  %v11688_v33 = vunpack.c.l.bf16 %v11685_v20  ;;  %v11689_v49 = vunpack.c.l.bf16 %v10023_v3  ;;  %v11691_v9 = vunpack.c.h.bf16 %v11690_v13 }
 0x1f3   :  { %v1839_v36 = vadd.f32 %v1838_v26, %v11687_v5  ;;  %v2031_v16 = vadd.f32 %v2030_v52, %v2029_v10  ;;  %v11693_v14 = vunpack.c.h.bf16 %v11692_v23  ;;  %v1737_v54 = vadd.f32 %v10385_v7, %v1735_v38 }
 0x1f4   :  { %v1992_v35 = vadd.f32 %v1991_v19, %v11688_v33  ;;  %v1684_v27 = vadd.f32 %v1683_v56, %v11689_v49  ;;  %v1888_v15 = vsel %vm1218_vm4, %v11691_v9, 0.0  ;;  %v11694_v4 = vunpack.c.l.bf16 %v11690_v13  ;;  %v11713_v49 = vld [vmem:[#allocation29_spill] sm:$0xff] }
 0x1f5   :  { %v2034_v17 = vsel %vm1218_vm4, %v11693_v14, 0.0  ;;  %v1887_v53 = vadd.f32 %v1886_v40, %v1885_v24  ;;  %v11695_v46 = vunpack.c.l.bf16 %v11692_v23  ;;  %v11696_v3 = vunpack.c.l.bf16 %v10031_v30 }
 0x1f6   :  { %v1840_v11 = vadd.f32 %v1839_v36, %v11694_v4  ;;  %v11698_v45 = vunpack.c.h.bf16 %v11697_v28  ;;  %v2033_v8 = vadd.f32 %v2032_v22, %v2031_v16  ;;  %v11700_v39 = vunpack.c.h.bf16 %v11699_v63  ;;  %v11711_v36 = vld [vmem:[#allocation33_spill] sm:$0xff] }
 0x1f7   :  { %v1993_v60 = vadd.f32 %v1992_v35, %v11695_v46  ;;  %v1685_v61 = vadd.f32 %v1684_v27, %v11696_v3  ;;  %v1739_v7 = vadd.f32 %v10394_v48, %v1737_v54  ;;  %v11701_v29 = vunpack.c.l.bf16 %v11697_v28  ;;  %v11718_v54 = vld [vmem:[#allocation31_spill] sm:$0xff] }
 0x1f8   :  { %v1890_v0 = vsel %vm1218_vm4, %v11698_v45, 0.0  ;;  %v2036_v62 = vsel %vm1218_vm4, %v11700_v39, 0.0  ;;  %v1889_v2 = vadd.f32 %v1888_v15, %v1887_v53  ;;  %v11702_v12 = vunpack.c.l.bf16 %v11699_v63 }
 0x1f9   :  { %v1841_v52 = vadd.f32 %v1840_v11, %v11701_v29  ;;  %v11703_v30 = vunpack.c.l.bf16 %v10033_v43  ;;  %v11705_v19 = vunpack.c.h.bf16 %v11704_v1  ;;  %v2035_v56 = vadd.f32 %v2034_v17, %v2033_v8  ;;  %v11723_v8 = vld [vmem:[#allocation32_spill] sm:$0xff]  ;;  %v11726_v29 = vld [vmem:[#allocation41_spill] sm:$0xff] }
 0x1fa   :  { %v1994_v26 = vadd.f32 %v1993_v60, %v11702_v12  ;;  %v11707_v50 = vunpack.c.h.bf16 %v11706_v41  ;;  %v1741_v48 = vadd.f32 %v10399_v42, %v1739_v7  ;;  %v11708_v10 = vunpack.c.l.bf16 %v11704_v1 }
 0x1fb   :  { %v1686_v32 = vadd.f32 %v1685_v61, %v11703_v30  ;;  %v1892_v51 = vsel %vm1218_vm4, %v11705_v19, 0.0  ;;  %v1891_v58 = vadd.f32 %v1890_v0, %v1889_v2  ;;  %v11709_v22 = vunpack.c.l.bf16 %v11706_v41 }
 0x1fc   :  { %v2038_v40 = vsel %vm1218_vm4, %v11707_v50, 0.0  ;;  %v1842_v20 = vadd.f32 %v1841_v52, %v11708_v10  ;;  %v11710_v43 = vunpack.c.l.bf16 %v10039_v31  ;;  %v11712_v24 = vunpack.c.h.bf16 %v11711_v36 }
 0x1fd   :  { %v1995_v38 = vadd.f32 %v1994_v26, %v11709_v22  ;;  %v2037_v35 = vadd.f32 %v2036_v62, %v2035_v56  ;;  %v11714_v27 = vunpack.c.h.bf16 %v11713_v49  ;;  %v1743_v42 = vadd.f32 %v10407_v55, %v1741_v48  ;;  %v10566_v55 = vld [vmem:[#allocation2 + $0xa18] sm:$0xff]  ;;  %v11731_v56 = vld [vmem:[#allocation37_spill] sm:$0xff] }
 0x1fe   :  { %v1687_v5 = vadd.f32 %v1686_v32, %v11710_v43  ;;  %v1894_v33 = vsel %vm1218_vm4, %v11712_v24, 0.0  ;;  %v11715_v9 = vunpack.c.l.bf16 %v11711_v36  ;;  %v1893_v16 = vadd.f32 %v1892_v51, %v1891_v58 }
 0x1ff   :  { %v2040_v13 = vsel %vm1218_vm4, %v11714_v27, 0.0  ;;  %v11716_v23 = vunpack.c.l.bf16 %v11713_v49  ;;  %v11717_v31 = vunpack.c.l.bf16 %v10041_v47  ;;  %v11719_v4 = vunpack.c.h.bf16 %v11718_v54  ;;  %v11739_v49 = vld [vmem:[#allocation20_spill] sm:$0xff] }
 0x200   :  { %v1843_v15 = vadd.f32 %v1842_v20, %v11715_v9  ;;  %v2039_v53 = vadd.f32 %v2038_v40, %v2037_v35  ;;  %v11720_v46 = vunpack.c.h.bf16 %v10224_v18  ;;  %v1745_v3 = vadd.f32 %v10416_v21, %v1743_v42 }
 0x201   :  { %v1996_v14 = vadd.f32 %v1995_v38, %v11716_v23  ;;  %v1688_v17 = vadd.f32 %v1687_v5, %v11717_v31  ;;  %v1896_v11 = vsel %vm1218_vm4, %v11719_v4, 0.0  ;;  %v11721_v61 = vunpack.c.l.bf16 %v11718_v54  ;;  %v11736_v5 = vld [vmem:[#allocation22_spill] sm:$0xff]  ;;  %v11744_v54 = vld [vmem:[#allocation24_spill] sm:$0xff] }
 0x202   :  { %v2042_v60 = vsel %vm1218_vm4, %v11720_v46, 0.0  ;;  %v1895_v45 = vadd.f32 %v1894_v33, %v1893_v16  ;;  %v11722_v47 = vunpack.c.l.bf16 %v10224_v18  ;;  %v11724_v63 = vunpack.c.l.bf16 %v11723_v8  ;;  %v11746_v46 = vld [vmem:[#allocation45_spill] sm:$0xff] }
 0x203   :  { %v1844_v28 = vadd.f32 %v1843_v15, %v11721_v61  ;;  %v11725_v62 = vunpack.c.h.bf16 %v11723_v8  ;;  %v11727_v52 = vunpack.c.h.bf16 %v11726_v29  ;;  %v2041_v12 = vadd.f32 %v2040_v13, %v2039_v53  ;;  %v436_v61 = vld [vmem:[#allocation2 + $0xa28] sm:$0xff] }
 0x204   :  { %v1997_v0 = vadd.f32 %v1996_v14, %v11722_v47  ;;  %v1689_v39 = vadd.f32 %v1688_v17, %v11724_v63  ;;  %v11728_v21 = vunpack.c.l.bf16 %v11726_v29  ;;  %v1897_v30 = vadd.f32 %v1896_v11, %v1895_v45  ;;  %v11750_v63 = vld [vmem:[#allocation40_spill] sm:$0xff] }
 0x205   :  { %v1746_v7 = vsel %vm1218_vm4, %v11725_v62, 0.0  ;;  %v1898_v2 = vsel %vm1218_vm4, %v11727_v52, 0.0  ;;  %v11729_v32 = vunpack.c.l.bf16 %v10230_v34  ;;  %v11730_v1 = vunpack.c.h.bf16 %v10230_v34  ;;  %v11753_v52 = vld [vmem:[#allocation28_spill] sm:$0xff] }
 0x206   :  { %v1845_v26 = vadd.f32 %v1844_v28, %v11728_v21  ;;  %v1093_v51 = vunpack.c.l.bf16 %v10566_v55  ;;  %v11732_v41 = vunpack.c.h.bf16 %v11731_v56  ;;  %v2043_v40 = vadd.f32 %v2042_v60, %v2041_v12 }
 0x207   :  { %v1998_v18 = vadd.f32 %v1997_v0, %v11729_v32  ;;  %v2044_v19 = vsel %vm1218_vm4, %v11730_v1, 0.0  ;;  %v11733_v48 = vunpack.c.h.bf16 %v10245_v44  ;;  %v1747_v20 = vadd.f32 %v1746_v7, %v1745_v3 }
 0x208   :  { %v1900_v50 = vsel %vm1218_vm4, %v11732_v41, 0.0  ;;  %v11734_v58 = vunpack.c.l.bf16 %v11731_v56  ;;  %v1899_v38 = vadd.f32 %v1898_v2, %v1897_v30  ;;  %v11735_v34 = vunpack.c.l.bf16 %v10245_v44 }
 0x209   :  { %v2046_v10 = vsel %vm1218_vm4, %v11733_v48, 0.0  ;;  %v11737_v36 = vunpack.c.l.bf16 %v11736_v5  ;;  %v11738_v33 = vunpack.c.h.bf16 %v11736_v5  ;;  %v11740_v27 = vunpack.c.h.bf16 %v11739_v49 }
 0x20a   :  { %v1846_v22 = vadd.f32 %v1845_v26, %v11734_v58  ;;  %v1999_v43 = vadd.f32 %v1998_v18, %v11735_v34  ;;  %v2045_v42 = vadd.f32 %v2044_v19, %v2043_v40  ;;  %v11741_v9 = vunpack.c.l.bf16 %v11739_v49 }
 0x20b   :  { %v1690_v24 = vadd.f32 %v1689_v39, %v11737_v36  ;;  %v1748_v35 = vsel %vm1218_vm4, %v11738_v33, 0.0  ;;  %v1902_v13 = vsel %vm1218_vm4, %v11740_v27, 0.0  ;;  %v1901_v16 = vadd.f32 %v1900_v50, %v1899_v38  ;;  %v11758_v50 = vld [vmem:[#allocation18_spill] sm:$0xff]  ;;  %v11763_v36 = vld [vmem:[#allocation36_spill] sm:$0xff] }
 0x20c   :  { %v1847_v15 = vadd.f32 %v1846_v22, %v11741_v9  ;;  %v11742_v23 = vunpack.c.l.bf16 %v10250_v25  ;;  %v11743_v14 = vunpack.c.h.bf16 %v10250_v25  ;;  %v1094_v17 = vunpack.c.h.bf16 %v10566_v55  ;;  %v11766_v27 = vld [vmem:[#allocation34_spill] sm:$0xff] }
 0x20d   :  { %v11745_v4 = vunpack.c.h.bf16 %v11744_v54  ;;  %v2047_v53 = vadd.f32 %v2046_v10, %v2045_v42  ;;  %v11747_v60 = vunpack.c.h.bf16 %v11746_v46  ;;  %v1749_v28 = vadd.f32 %v1748_v35, %v1747_v20 }
 0x20e   :  { %v2000_v44 = vadd.f32 %v1999_v43, %v11742_v23  ;;  %v2048_v31 = vsel %vm1218_vm4, %v11743_v14, 0.0  ;;  %v11748_v45 = vunpack.c.l.bf16 %v11744_v54  ;;  %v1903_v0 = vadd.f32 %v1902_v13, %v1901_v16 }
 0x20f   :  { %v1904_v11 = vsel %vm1218_vm4, %v11745_v4, 0.0  ;;  %v2050_v3 = vsel %vm1218_vm4, %v11747_v60, 0.0  ;;  %v11749_v25 = vunpack.c.l.bf16 %v11746_v46  ;;  %v11751_v39 = vunpack.c.l.bf16 %v11750_v63 }
 0x210   :  { %v1848_v47 = vadd.f32 %v1847_v15, %v11748_v45  ;;  %v11752_v7 = vunpack.c.h.bf16 %v11750_v63  ;;  %v11754_v2 = vunpack.c.h.bf16 %v11753_v52  ;;  %v2049_v21 = vadd.f32 %v2048_v31, %v2047_v53  ;;  %v438_v15 = vld [vmem:[#allocation2 + $0xa38] sm:$0xff]  ;;  %v440_v45 = vld [vmem:[#allocation2 + $0xa48] sm:$0xff] }
 0x211   :  { %v2001_v8 = vadd.f32 %v2000_v44, %v11749_v25  ;;  %v1691_v62 = vadd.f32 %v1690_v24, %v11751_v39  ;;  %v11755_v26 = vunpack.c.l.bf16 %v11753_v52  ;;  %v1905_v32 = vadd.f32 %v1904_v11, %v1903_v0  ;;  %v11771_v11 = vld [vmem:[#allocation44_spill] sm:$0xff] }
 0x212   :  { %v1750_v29 = vsel %vm1218_vm4, %v11752_v7, 0.0  ;;  %v1906_v12 = vsel %vm1218_vm4, %v11754_v2, 0.0  ;;  %v11756_v18 = vunpack.c.l.bf16 %v10261_v6  ;;  %v11757_v19 = vunpack.c.h.bf16 %v10261_v6 }
 0x213   :  { %v1849_v30 = vadd.f32 %v1848_v47, %v11755_v26  ;;  %v1097_v41 = vunpack.c.l.bf16 %v436_v61  ;;  %v11759_v40 = vunpack.c.h.bf16 %v11758_v50  ;;  %v2051_v10 = vadd.f32 %v2050_v3, %v2049_v21  ;;  %v442_v21 = vld [vmem:[#allocation2 + $0xa58] sm:$0xff] }
 0x214   :  { %v2002_v1 = vadd.f32 %v2001_v8, %v11756_v18  ;;  %v2052_v56 = vsel %vm1218_vm4, %v11757_v19, 0.0  ;;  %v11760_v20 = vunpack.c.h.bf16 %v10266_v57  ;;  %v1751_v22 = vadd.f32 %v1750_v29, %v1749_v28  ;;  %v444_v18 = vld [vmem:[#allocation2 + $0xa68] sm:$0xff] }
 0x215   :  { %v1908_v48 = vsel %vm1218_vm4, %v11759_v40, 0.0  ;;  %v11761_v38 = vunpack.c.l.bf16 %v11758_v50  ;;  %v1907_v43 = vadd.f32 %v1906_v12, %v1905_v32  ;;  %v11762_v5 = vunpack.c.l.bf16 %v10266_v57 }
 0x216   :  { %v2054_v58 = vsel %vm1218_vm4, %v11760_v20, 0.0  ;;  %v11764_v24 = vunpack.c.l.bf16 %v11763_v36  ;;  %v11765_v35 = vunpack.c.h.bf16 %v11763_v36  ;;  %v11767_v13 = vunpack.c.h.bf16 %v11766_v27 }
 0x217   :  { %v1850_v34 = vadd.f32 %v1849_v30, %v11761_v38  ;;  %v2003_v6 = vadd.f32 %v2002_v1, %v11762_v5  ;;  %v2053_v9 = vadd.f32 %v2052_v56, %v2051_v10  ;;  %v11768_v16 = vunpack.c.l.bf16 %v11766_v27 }
 0x218   :  { %v1692_v33 = vadd.f32 %v1691_v62, %v11764_v24  ;;  %v1752_v49 = vsel %vm1218_vm4, %v11765_v35, 0.0  ;;  %v1910_v42 = vsel %vm1218_vm4, %v11767_v13, 0.0  ;;  %v1909_v44 = vadd.f32 %v1908_v48, %v1907_v43 }
 0x219   :  { %v1851_v23 = vadd.f32 %v1850_v34, %v11768_v16  ;;  %v11769_v57 = vunpack.c.l.bf16 %v10275_v37  ;;  %v11770_v31 = vunpack.c.h.bf16 %v10275_v37  ;;  %v1098_v4 = vunpack.c.h.bf16 %v436_v61 }
 0x21a   :  { %v11772_v53 = vunpack.c.h.bf16 %v11771_v11  ;;  %v2055_v60 = vadd.f32 %v2054_v58, %v2053_v9  ;;  %v11773_v3 = vunpack.c.h.bf16 %v10280_v59  ;;  %v1753_v47 = vadd.f32 %v1752_v49, %v1751_v22 }
 0x21b   :  { %v2004_v14 = vadd.f32 %v2003_v6, %v11769_v57  ;;  %v2056_v54 = vsel %vm1218_vm4, %v11770_v31, 0.0  ;;  %v11774_v0 = vunpack.c.l.bf16 %v11771_v11  ;;  %v1911_v8 = vadd.f32 %v1910_v42, %v1909_v44 }
 0x21c   :  { %v1912_v46 = vsel %vm1218_vm4, %v11772_v53, 0.0  ;;  %v2058_v28 = vsel %vm1218_vm4, %v11773_v3, 0.0  ;;  %v11775_v37 = vunpack.c.l.bf16 %v10280_v59  ;;  %v1101_v39 = vunpack.c.l.bf16 %v438_v15 }
 0x21d   :  { %v1852_v25 = vadd.f32 %v1851_v23, %v11774_v0  ;;  %v1102_v61 = vunpack.c.h.bf16 %v438_v15  ;;  %v1693_v62 = vrot.slane %v1692_v33, 4  ;;  %v2057_v7 = vadd.f32 %v2056_v54, %v2055_v60 }
 0x21e   :  { %v2005_v63 = vadd.f32 %v2004_v14, %v11775_v37  ;;  %v1913_v52 = vadd.f32 %v1912_v46, %v1911_v8  ;;  %v2060_v12 = vsel %vm1218_vm4, %v1094_v17, 0.0  ;;  %v1105_v26 = vunpack.c.l.bf16 %v440_v45 }
 0x21f   :  { %v1853_v29 = vrot.slane %v1852_v25, 4  ;;  %v1106_v30 = vunpack.c.h.bf16 %v440_v45  ;;  %v2059_v32 = vadd.f32 %v2058_v28, %v2057_v7  ;;  %v1754_v1 = vrot.slane %v1753_v47, 4 }
 0x220   :  { %v2006_v2 = vadd.f32 %v2005_v63, %v1093_v51  ;;  %v1914_v19 = vrot.slane %v1913_v52, 4  ;;  %v2062_v56 = vsel %vm1218_vm4, %v1098_v4, 0.0  ;;  %v1694_v50 = vadd.f32 %v1693_v62, %v1692_v33  ;;  %v446_v51 = vld [vmem:[#allocation2 + $0xa78] sm:$0xff] }
 0x221   :  { %v1854_v40 = vadd.f32 %v1853_v29, %v1852_v25  ;;  %v2061_v48 = vadd.f32 %v2060_v12, %v2059_v32  ;;  %v1109_v10 = vunpack.c.l.bf16 %v442_v21  ;;  %v1110_v20 = vunpack.c.h.bf16 %v442_v21 }
 0x222   :  { %v2007_v59 = vadd.f32 %v2006_v2, %v1097_v41  ;;  %v2064_v55 = vsel %vm1218_vm4, %v1102_v61, 0.0  ;;  %v1113_v17 = vunpack.c.l.bf16 %v444_v18  ;;  %v1114_v22 = vunpack.c.h.bf16 %v444_v18 }
 0x223   :  { %v2063_v38 = vadd.f32 %v2062_v56, %v2061_v48  ;;  %v1755_v34 = vadd.f32 %v1754_v1, %v1753_v47  ;;  %v1915_v43 = vadd.f32 %v1914_v19, %v1913_v52  ;;  %v2066_v6 = vsel %vm1218_vm4, %v1106_v30, 0.0  ;;  %v11776_v1 = vld [vmem:[#allocation26_spill] sm:$0xff]  ;;  %v96_v48 = vld [vmem:[#allocation10 + $0x28] sm:$0xff] }
 0x224   :  { %v2008_v58 = vadd.f32 %v2007_v59, %v1101_v39  ;;  %v1695_v41 = vrot.slane %v1694_v50, 2  ;;  %v1855_v36 = vrot.slane %v1854_v40, 2  ;;  %v1117_v33 = vunpack.c.l.bf16 %v446_v51  ;;  %2364 = vmatprep.subr.mxu0 %v96_v48  ;;  %v6986_v48 = vld [vmem:[#allocation5 + $0xec] ss:$16 sps:$4 sm:$0xff]  }
 0x225   :  { %v2065_v24 = vadd.f32 %v2064_v55, %v2063_v38  ;;  %v1118_v35 = vunpack.c.h.bf16 %v446_v51  ;;  %v2068_v27 = vsel %vm1218_vm4, %v1110_v20, 0.0  ;;  %v1756_v42 = vrot.slane %v1755_v34, 2  ;;  %v95_v20 = vld [vmem:[#allocation10 + $0x20] sm:$0xff]  ;;  %v94_v55 = vld [vmem:[#allocation10 + $0x18] sm:$0xff]  ;;  %v100_v51 = vld [vmem:[#allocation10 + $0x48] sm:$0xff] }
 0x226   :  { %v2009_v5 = vadd.f32 %v2008_v58, %v1105_v26  ;;  %v1916_v9 = vrot.slane %v1915_v43, 2  ;;  %v2070_v16 = vsel %vm1218_vm4, %v1114_v22, 0.0  ;;  %v1696_v23 = vadd.f32 %v1695_v41, %v1694_v50  ;;  %2365 = vmatpush1.msra.mxu0 %v95_v20  ;;  %v6995_v20 = vld [vmem:[#allocation5 + $0x124] ss:$16 sps:$4 sm:$0xff]  }
 0x227   :  { %v2067_v13 = vadd.f32 %v2066_v6, %v2065_v24  ;;  %v1856_v44 = vadd.f32 %v1855_v36, %v1854_v40  ;;  %v2072_v31 = vsel %vm1218_vm4, %v1118_v35, 0.0  ;;  %v1757_v4 = vadd.f32 %v1756_v42, %v1755_v34  ;;  %v92_v40 = vld [vmem:[#allocation10 + $0x8] sm:$0xff]  ;;  %2506 = vmatprep.subr.mxu0 %v100_v51  ;;  %v2175_v34 = vpop.xlane.xlu1 %2174 }
 0x228   :  { %v2010_v49 = vadd.f32 %v2009_v5, %v1109_v10  ;;  %v1917_v11 = vadd.f32 %v1916_v9, %v1915_v43  ;;  %v1697_v46 = vrot.slane %v1696_v23, 1  ;;  %v91_v10 = vld [vmem:[#allocation10] sm:$0xff]  ;;  %2222 = vmatprep.subr.mxu1 %v92_v40  ;;  %v7796_v58 = vmov 0.0   ;;  %v6978_v40 = vld [vmem:[#allocation5 + $0xc8] ss:$16 sps:$4 sm:$0xff]  }
 0x229   :  { %v2069_v57 = vadd.f32 %v2068_v27, %v2067_v13  ;;  %v1857_v60 = vrot.slane %v1856_v44, 1  ;;  %v1758_v47 = vrot.slane %v1757_v4, 1  ;;  %2223 = vmatpush1.msra.mxu1 %v91_v10  ;;  %2286 = vmatprep.mubr.f32.mxu1 %v7796_v58  ;;  %v11777_v22 = vlaneseq  ;;  %v11778_v43 = vld [vmem:[#allocation16_spill] sm:$0xff]  ;;  %v6992_v51 = vld [vmem:[#allocation5 + $0x10c] ss:$16 sps:$4 sm:$0xff]  }
 0x22a   :  { %v2011_v15 = vadd.f32 %v2010_v49, %v1113_v17  ;;  %v1918_v0 = vrot.slane %v1917_v11, 1  ;;  %v1698_v8 = vadd.f32 %v1697_v46, %v1696_v23  ;;  %2428 = vmatprep.mubr.f32.mxu0 %v7796_v58  ;;  %2293 = vmatprep.subr.mxu1 %v94_v55  ;;  %v2157_v17 = vpop.xlane.xlu0 %2156  ;;  %v2201_v5 = vadd.s32 4294967293, %v11778_v43  ;;  %v6947_v46 = vld [vmem:[#allocation5 + $0x24] ss:$16 sps:$4 sm:$0xff]   ;;  %v6987_v10 = vld [vmem:[#allocation5 + $0x100] ss:$16 sps:$4 sm:$0xff]  }
 0x22b   :  { %v2071_v54 = vadd.f32 %v2070_v16, %v2069_v57  ;;  %v1858_v37 = vadd.f32 %v1857_v60, %v1856_v44  ;;  %v1759_v62 = vadd.f32 %v1758_v47, %v1757_v4  ;;  %v10694_v38 = vshrl.u32 %v11777_v22, 7  ;;  %v93_v44 = vld [vmem:[#allocation10 + $0x10] sm:$0xff]  ;;  %v6942_v47 = vld [vmem:[#allocation5 + $0x8] ss:$16 sps:$4 sm:$0xff]  }
 0x22c   :  { %v2012_v14 = vadd.f32 %v2011_v15, %v1117_v33  ;;  %v1919_v7 = vadd.f32 %v1918_v0, %v1917_v11  ;;  %v2185_v24 = vsub.f32 %v2175_v34, %v2157_v17  ;;  %v97_v4 = vld [vmem:[#allocation10 + $0x30] sm:$0xff]  ;;  %v6950_v0 = vld [vmem:[#allocation5 + $0x2c] ss:$16 sps:$4 sm:$0xff]   ;;  %v6984_v55 = vld [vmem:[#allocation5 + $0xe8] ss:$16 sps:$4 sm:$0xff]  }
 0x22d   :  { %v2073_v3 = vadd.f32 %v2072_v31, %v2071_v54  ;;  %v2127_v2 = vsel %vm2113_vm0, %v1858_v37, %v1698_v8  ;;  %v2191_v6 = vsub.s32 %v11778_v43, %v10694_v38  ;;  %v2204_v36 = vsub.s32 %v2201_v5, %v10694_v38  ;;  %v6941_v31 = vld [vmem:[#allocation5 + $0x4] ss:$16 sps:$4 sm:$0xff]   ;;  %v98_v54 = vld [vmem:[#allocation10 + $0x38] sm:$0xff]  ;;  %v6939_v11 = vld [vmem:[#allocation5] ss:$16 sps:$4 sm:$0xff]  }
 0x22e   :  { %v2013_v53 = vrot.slane %v2012_v14, 4  ;;  %v2129_v30 = vsel %vm2113_vm0, %v1919_v7, %v1759_v62  ;;  %v101_v60 = vld [vmem:[#allocation10 + $0x50] sm:$0xff]  ;;  %v6948_v37 = vld [vmem:[#allocation5 + $0x28] ss:$16 sps:$4 sm:$0xff]   ;;  %v6962_v7 = vld [vmem:[#allocation5 + $0x6c] ss:$16 sps:$4 sm:$0xff]  }
 0x22f   :  { %v2074_v45 = vrot.slane %v2073_v3, 4  ;;  %v2192_v35 = vrot.slane %v2157_v17, %v2191_v6  ;;  %v2205_v13 = vrot.slane %v2185_v24, %v2204_v36  ;;  %v6959_v8 = vld [vmem:[#allocation5 + $0x64] ss:$16 sps:$4 sm:$0xff]   ;;  %v6954_v62 = vld [vmem:[#allocation5 + $0x48] ss:$16 sps:$4 sm:$0xff]  }
 0x230   :  { %v2014_v28 = vadd.f32 %v2013_v53, %v2012_v14  ;;  %v99_v14 = vld [vmem:[#allocation10 + $0x40] sm:$0xff]  ;;  %v102_v53 = vld [vmem:[#allocation10 + $0x58] sm:$0xff] }
 0x231   :  { %v2075_v63 = vadd.f32 %v2074_v45, %v2073_v3  ;;  %v6944_v3 = vld [vmem:[#allocation5 + $0xc] ss:$16 sps:$4 sm:$0xff]   ;;  %v6953_v45 = vld [vmem:[#allocation5 + $0x44] ss:$16 sps:$4 sm:$0xff]   ;;  %v6993_v17 = vld [vmem:[#allocation5 + $0x120] ss:$16 sps:$4 sm:$0xff]  }
 0x232   :  { %v2015_v25 = vrot.slane %v2014_v28, 2  ;;  %v7001_v22 = vld [vmem:[#allocation5 + $0x144] ss:$16 sps:$4 sm:$0xff]   ;;  %v6990_v34 = vld [vmem:[#allocation5 + $0x108] ss:$16 sps:$4 sm:$0xff]  }
 0x233   :  { %v2076_v61 = vrot.slane %v2075_v63, 2  ;;  %v6998_v43 = vld [vmem:[#allocation5 + $0x12c] ss:$16 sps:$4 sm:$0xff]   ;;  %v6999_v5 = vld [vmem:[#allocation5 + $0x140] ss:$16 sps:$4 sm:$0xff]  }
 0x234   :  { %v2016_v39 = vadd.f32 %v2015_v25, %v2014_v28  ;;  %v6945_v28 = vld [vmem:[#allocation5 + $0x20] ss:$16 sps:$4 sm:$0xff]  }
 0x235   :  { %v2077_v52 = vadd.f32 %v2076_v61, %v2075_v63  ;;  %v6951_v25 = vld [vmem:[#allocation5 + $0x40] ss:$16 sps:$4 sm:$0xff]   ;;  %v6956_v63 = vld [vmem:[#allocation5 + $0x4c] ss:$16 sps:$4 sm:$0xff]   ;;  %v6965_v61 = vld [vmem:[#allocation5 + $0x84] ss:$16 sps:$4 sm:$0xff]  }
 0x236   :  { %v2017_v29 = vrot.slane %v2016_v39, 1  ;;  %v7005_v24 = vld [vmem:[#allocation5 + $0x160] ss:$16 sps:$4 sm:$0xff]  }
 0x237   :  { %v2078_v21 = vrot.slane %v2077_v52, 1 }
 0x238   :  { %v2018_v12 = vadd.f32 %v2017_v29, %v2016_v39  ;;  %v6957_v39 = vld [vmem:[#allocation5 + $0x60] ss:$16 sps:$4 sm:$0xff]  }
 0x239   :  { %v2079_v32 = vadd.f32 %v2078_v21, %v2077_v52  ;;  %v6963_v29 = vld [vmem:[#allocation5 + $0x80] ss:$16 sps:$4 sm:$0xff]   ;;  %v6971_v52 = vld [vmem:[#allocation5 + $0xa4] ss:$16 sps:$4 sm:$0xff]  }
 0x23a   :  { %v2128_v26 = vsel %vm2115_vm1, %v2018_v12, %v2127_v2  ;;  %v6960_v2 = vld [vmem:[#allocation5 + $0x68] ss:$16 sps:$4 sm:$0xff]   ;;  %v6968_v12 = vld [vmem:[#allocation5 + $0x8c] ss:$16 sps:$4 sm:$0xff]   ;;  %v6969_v21 = vld [vmem:[#allocation5 + $0xa0] ss:$16 sps:$4 sm:$0xff]  }
 0x23b   :  { %v2179_v18 = vsel %vm2147_vm3, %v2128_v26, 0.0  ;;  %v2130_v59 = vsel %vm2115_vm1, %v2079_v32, %v2129_v30  ;;  %v6977_v26 = vld [vmem:[#allocation5 + $0xc4] ss:$16 sps:$4 sm:$0xff]   ;;  %v6966_v30 = vld [vmem:[#allocation5 + $0x88] ss:$16 sps:$4 sm:$0xff]  }
 0x23c   :  { %v2180_v19 = vadd.f32 %v2179_v18, %v11776_v1  ;;  %v2181_v56 = vsel %vm2153_vm5, %v2130_v59, 0.0  ;;  %v6974_v32 = vld [vmem:[#allocation5 + $0xac] ss:$16 sps:$4 sm:$0xff]   ;;  %v6975_v18 = vld [vmem:[#allocation5 + $0xc0] ss:$16 sps:$4 sm:$0xff]  }
 0x23d   :  { %v6983_v1 = vld [vmem:[#allocation5 + $0xe4] ss:$16 sps:$4 sm:$0xff]   ;;  %v6980_v59 = vld [vmem:[#allocation5 + $0xcc] ss:$16 sps:$4 sm:$0xff]  }
 0x23e   :  { %v2182_v50 = vadd.f32 %v2181_v56, %v2180_v19  ;;  %v6972_v19 = vld [vmem:[#allocation5 + $0xa8] ss:$16 sps:$4 sm:$0xff]   ;;  %v6981_v56 = vld [vmem:[#allocation5 + $0xe0] ss:$16 sps:$4 sm:$0xff]  }
 0x240   :  { %2183 = vadd.xlane.f32.xlu1 %v2182_v50  ;;  %v6989_v50 = vld [vmem:[#allocation5 + $0x104] ss:$16 sps:$4 sm:$0xff]  }
 0x24a   :  { %v2166_v41 = vpop.xlane.xlu0 %2165 }
 0x24b   :  { %v2196_v49 = vrot.slane %v2166_v41, %v2191_v6  ;;  %v7007_v6 = vld [vmem:[#allocation5 + $0x164] ss:$16 sps:$4 sm:$0xff]  }
 0x24d   :  { %v2197_v9 = vsel %vm2113_vm0, %v2196_v49, %v2192_v35  ;;  %v7002_v35 = vld [vmem:[#allocation5 + $0x148] ss:$16 sps:$4 sm:$0xff]   ;;  %v7010_v49 = vld [vmem:[#allocation5 + $0x16c] ss:$16 sps:$4 sm:$0xff]  }
 0x2cd   :  { %v2184_v33 = vpop.xlane.xlu1 %2183 }
 0x2ce   :  { %v2186_v27 = vsub.f32 %v2184_v33, %v2166_v41  ;;  %v6996_v41 = vld [vmem:[#allocation5 + $0x128] ss:$16 sps:$4 sm:$0xff]   ;;  %v7013_v33 = vld [vmem:[#allocation5 + $0x184] ss:$16 sps:$4 sm:$0xff]  }
 0x2d0   :  { %v2209_v42 = vrot.slane %v2186_v27, %v2204_v36  ;;  %v7004_v36 = vld [vmem:[#allocation5 + $0x14c] ss:$16 sps:$4 sm:$0xff]   ;;  %v7011_v27 = vld [vmem:[#allocation5 + $0x180] ss:$16 sps:$4 sm:$0xff]  }
 0x2d2   :  { %v2210_v15 = vsel %vm2113_vm0, %v2209_v42, %v2205_v13  ;;  %v7019_v13 = vld [vmem:[#allocation5 + $0x1a4] ss:$16 sps:$4 sm:$0xff]   ;;  %v7008_v42 = vld [vmem:[#allocation5 + $0x168] ss:$16 sps:$4 sm:$0xff]  }
 0x2d3   :  { %v2213_v16 = vsel %vm2212_vm6, %v2197_v9, %v2210_v15  ;;  %v7016_v9 = vld [vmem:[#allocation5 + $0x18c] ss:$16 sps:$4 sm:$0xff]   ;;  %v7017_v15 = vld [vmem:[#allocation5 + $0x1a0] ss:$16 sps:$4 sm:$0xff]  }
 0x2d4   :  { %v2215_v23 = vsel %vm2214_vm7, %v2213_v16, 1.0  ;;  %v7025_v16 = vld [vmem:[#allocation5 + $0x1c4] ss:$16 sps:$4 sm:$0xff]  }
 0x2d5   :  { %v2217_v57 = vsel %vm2216_vm8, %v2215_v23, 0.0  ;;  %v7014_v23 = vld [vmem:[#allocation5 + $0x188] ss:$16 sps:$4 sm:$0xff]  }
 0x2d6   :  { %6344 = vmatmul.mubr.msk.f32.vlgmr.msra.gmra.mrb[0].mxu1 %vm2218_vm9, %v2217_v57  ;;  %6346 = vmatmul.mubr.msk.f32.vlgmr.msra.gmra.mrb[0].mxu0 %vm2218_vm9, %v2217_v57 }
 0x2d7   :  { %2294 = vmatpush1.msra.mxu1 %v93_v44  ;;  %2357 = vmatprep.mubr.f32.mxu1 %v7796_v58  ;;  %v7022_v44 = vld [vmem:[#allocation5 + $0x1ac] ss:$16 sps:$4 sm:$0xff]  }
 0x2d8   :  { %2507 = vmatpush1.msra.mxu0 %v99_v14  ;;  %2570 = vmatprep.mubr.f32.mxu0 %v7796_v58  ;;  %v7020_v14 = vld [vmem:[#allocation5 + $0x1a8] ss:$16 sps:$4 sm:$0xff]  }
 0x2d9   :  { %2435 = vmatprep.subr.mxu1 %v98_v54  ;;  %4980 = vmatprep.subr.bf16.mxu0 %v6941_v31  ;;  %v7028_v31 = vld [vmem:[#allocation5 + $0x1cc] ss:$16 sps:$4 sm:$0xff]   ;;  %v7026_v54 = vld [vmem:[#allocation5 + $0x1c8] ss:$16 sps:$4 sm:$0xff]  }
 0x2da   :  { %6345 = vmatmul.mubr.msk.f32.vlgmr.msra.gmra.mrb[2].mxu1 %vm2218_vm9, %v2217_v57  ;;  %6348 = vmatmul.mubr.msk.f32.vlgmr.msra.gmra.mrb[2].mxu0 %vm2218_vm9, %v2217_v57 }
 0x2db   :  { %2436 = vmatpush1.msra.mxu1 %v97_v4  ;;  %2499 = vmatprep.mubr.f32.mxu1 %v7796_v58  ;;  %v7031_v4 = vld [vmem:[#allocation5 + $0x1e4] ss:$16 sps:$4 sm:$0xff]  }
 0x2dc   :  { %2577 = vmatprep.subr.mxu1 %v102_v53  ;;  %4981 = vmatpush1.bf16.msra.mxu0 %v6939_v11  ;;  %v7034_v11 = vld [vmem:[#allocation5 + $0x1ec] ss:$16 sps:$4 sm:$0xff]   ;;  %v7029_v53 = vld [vmem:[#allocation5 + $0x1e0] ss:$16 sps:$4 sm:$0xff]  }
 0x2dd   :  { %4982 = vmatprep.subr.bf16.mxu0 %v6947_v46  ;;  %v7032_v46 = vld [vmem:[#allocation5 + $0x1e8] ss:$16 sps:$4 sm:$0xff]  }
 0x2de   :  { %6347 = vmatmul.mubr.msk.f32.vlgmr.msra.gmra.mrb[4].mxu1 %vm2218_vm9, %v2217_v57 }
 0x2df   :  { %2578 = vmatpush1.msra.mxu1 %v101_v60  ;;  %2641 = vmatprep.mubr.f32.mxu1 %v7796_v58  ;;  %v7037_v60 = vld [vmem:[#allocation5 + $0x204] ss:$16 sps:$4 sm:$0xff]  }
 0x2e0   :  { %5226 = vmatprep.subr.bf16.mxu1 %v6944_v3  ;;  %4983 = vmatpush1.bf16.msra.mxu0 %v6945_v28  ;;  %v7040_v3 = vld [vmem:[#allocation5 + $0x20c] ss:$16 sps:$4 sm:$0xff]  }
 0x2e1   :  { %4984 = vmatprep.subr.bf16.mxu0 %v6953_v45 }
 0x2e2   :  { %6349 = vmatmul.mubr.msk.f32.vlgmr.msra.gmra.mrb[6].mxu1 %vm2218_vm9, %v2217_v57  ;;  %v7023_v57 = vld [vmem:[#allocation5 + $0x1c0] ss:$16 sps:$4 sm:$0xff]  }
 0x2e3   :  { %5227 = vmatpush1.bf16.msra.mxu1 %v6942_v47 }
 0x2e4   :  { %5228 = vmatprep.subr.bf16.mxu1 %v6950_v0  ;;  %4985 = vmatpush1.bf16.msra.mxu0 %v6951_v25 }
 0x2e5   :  { %4986 = vmatprep.subr.bf16.mxu0 %v6959_v8  ;;  %v7035_v8 = vld [vmem:[#allocation5 + $0x200] ss:$16 sps:$4 sm:$0xff]  }
 0x2e7   :  { %5229 = vmatpush1.bf16.msra.mxu1 %v6948_v37  ;;  %v7038_v37 = vld [vmem:[#allocation5 + $0x208] ss:$16 sps:$4 sm:$0xff]  }
 0x2e8   :  { %5230 = vmatprep.subr.bf16.mxu1 %v6956_v63  ;;  %4987 = vmatpush1.bf16.msra.mxu0 %v6957_v39  ;;  %v7043_v39 = vld [vmem:[#allocation5 + $0x224] ss:$16 sps:$4 sm:$0xff]  }
 0x2e9   :  { %4988 = vmatprep.subr.bf16.mxu0 %v6965_v61  ;;  %v7046_v61 = vld [vmem:[#allocation5 + $0x22c] ss:$16 sps:$4 sm:$0xff]  }
 0x2eb   :  { %5231 = vmatpush1.bf16.msra.mxu1 %v6954_v62 }
 0x2ec   :  { %5232 = vmatprep.subr.bf16.mxu1 %v6962_v7  ;;  %4989 = vmatpush1.bf16.msra.mxu0 %v6963_v29 }
 0x2ed   :  { %4990 = vmatprep.subr.bf16.mxu0 %v6971_v52 }
 0x2ef   :  { %5233 = vmatpush1.bf16.msra.mxu1 %v6960_v2 }
 0x2f0   :  { %5234 = vmatprep.subr.bf16.mxu1 %v6968_v12  ;;  %4991 = vmatpush1.bf16.msra.mxu0 %v6969_v21  ;;  %v7041_v12 = vld [vmem:[#allocation5 + $0x220] ss:$16 sps:$4 sm:$0xff]   ;;  %v7044_v21 = vld [vmem:[#allocation5 + $0x228] ss:$16 sps:$4 sm:$0xff]  }
 0x2f1   :  { %4992 = vmatprep.subr.bf16.mxu0 %v6977_v26  ;;  %v7049_v26 = vld [vmem:[#allocation5 + $0x244] ss:$16 sps:$4 sm:$0xff]  }
 0x2f3   :  { %5235 = vmatpush1.bf16.msra.mxu1 %v6966_v30  ;;  %v7052_v30 = vld [vmem:[#allocation5 + $0x24c] ss:$16 sps:$4 sm:$0xff]  }
 0x2f4   :  { %5236 = vmatprep.subr.bf16.mxu1 %v6974_v32  ;;  %4993 = vmatpush1.bf16.msra.mxu0 %v6975_v18 }
 0x2f5   :  { %4994 = vmatprep.subr.bf16.mxu0 %v6983_v1  ;;  %v7047_v1 = vld [vmem:[#allocation5 + $0x240] ss:$16 sps:$4 sm:$0xff]  }
 0x2f7   :  { %5237 = vmatpush1.bf16.msra.mxu1 %v6972_v19  ;;  %v7050_v19 = vld [vmem:[#allocation5 + $0x248] ss:$16 sps:$4 sm:$0xff]  }
 0x2f8   :  { %5238 = vmatprep.subr.bf16.mxu1 %v6980_v59  ;;  %4995 = vmatpush1.bf16.msra.mxu0 %v6981_v56  ;;  %v7055_v59 = vld [vmem:[#allocation5 + $0x264] ss:$16 sps:$4 sm:$0xff]   ;;  %v7058_v56 = vld [vmem:[#allocation5 + $0x26c] ss:$16 sps:$4 sm:$0xff]  }
 0x2f9   :  { %4996 = vmatprep.subr.bf16.mxu0 %v6989_v50 }
 0x2fb   :  { %5239 = vmatpush1.bf16.msra.mxu1 %v6978_v40 }
 0x2fc   :  { %5240 = vmatprep.subr.bf16.mxu1 %v6986_v48  ;;  %4997 = vmatpush1.bf16.msra.mxu0 %v6987_v10  ;;  %v7053_v48 = vld [vmem:[#allocation5 + $0x260] ss:$16 sps:$4 sm:$0xff]   ;;  %v7056_v10 = vld [vmem:[#allocation5 + $0x268] ss:$16 sps:$4 sm:$0xff]  }
 0x2fd   :  { %4998 = vmatprep.subr.bf16.mxu0 %v6995_v20  ;;  %v7061_v20 = vld [vmem:[#allocation5 + $0x284] ss:$16 sps:$4 sm:$0xff]  }
 0x2ff   :  { %5241 = vmatpush1.bf16.msra.mxu1 %v6984_v55  ;;  %v7064_v55 = vld [vmem:[#allocation5 + $0x28c] ss:$16 sps:$4 sm:$0xff]  }
 0x300   :  { %5242 = vmatprep.subr.bf16.mxu1 %v6992_v51  ;;  %4999 = vmatpush1.bf16.msra.mxu0 %v6993_v17  ;;  %v7059_v51 = vld [vmem:[#allocation5 + $0x280] ss:$16 sps:$4 sm:$0xff]   ;;  %v7062_v17 = vld [vmem:[#allocation5 + $0x288] ss:$16 sps:$4 sm:$0xff]  }
 0x301   :  { %5000 = vmatprep.subr.bf16.mxu0 %v7001_v22  ;;  %v7067_v22 = vld [vmem:[#allocation5 + $0x2a4] ss:$16 sps:$4 sm:$0xff]  }
 0x303   :  { %5243 = vmatpush1.bf16.msra.mxu1 %v6990_v34  ;;  %v7070_v34 = vld [vmem:[#allocation5 + $0x2ac] ss:$16 sps:$4 sm:$0xff]  }
 0x304   :  { %5244 = vmatprep.subr.bf16.mxu1 %v6998_v43  ;;  %5001 = vmatpush1.bf16.msra.mxu0 %v6999_v5  ;;  %v7065_v43 = vld [vmem:[#allocation5 + $0x2a0] ss:$16 sps:$4 sm:$0xff]   ;;  %v7068_v5 = vld [vmem:[#allocation5 + $0x2a8] ss:$16 sps:$4 sm:$0xff]  }
 0x305   :  { %5002 = vmatprep.subr.bf16.mxu0 %v7007_v6  ;;  %v7073_v6 = vld [vmem:[#allocation5 + $0x2c4] ss:$16 sps:$4 sm:$0xff]  }
 0x307   :  { %5245 = vmatpush1.bf16.msra.mxu1 %v6996_v41  ;;  %v7076_v41 = vld [vmem:[#allocation5 + $0x2cc] ss:$16 sps:$4 sm:$0xff]  }
 0x308   :  { %5246 = vmatprep.subr.bf16.mxu1 %v7004_v36  ;;  %5003 = vmatpush1.bf16.msra.mxu0 %v7005_v24  ;;  %v7071_v36 = vld [vmem:[#allocation5 + $0x2c0] ss:$16 sps:$4 sm:$0xff]   ;;  %v7074_v24 = vld [vmem:[#allocation5 + $0x2c8] ss:$16 sps:$4 sm:$0xff]  }
 0x309   :  { %5004 = vmatprep.subr.bf16.mxu0 %v7013_v33  ;;  %v7079_v33 = vld [vmem:[#allocation5 + $0x2e4] ss:$16 sps:$4 sm:$0xff]  }
 0x30b   :  { %5247 = vmatpush1.bf16.msra.mxu1 %v7002_v35  ;;  %v7082_v35 = vld [vmem:[#allocation5 + $0x2ec] ss:$16 sps:$4 sm:$0xff]  }
 0x30c   :  { %5248 = vmatprep.subr.bf16.mxu1 %v7010_v49  ;;  %5005 = vmatpush1.bf16.msra.mxu0 %v7011_v27  ;;  %v7077_v49 = vld [vmem:[#allocation5 + $0x2e0] ss:$16 sps:$4 sm:$0xff]   ;;  %v7080_v27 = vld [vmem:[#allocation5 + $0x2e8] ss:$16 sps:$4 sm:$0xff]  }
 0x30d   :  { %5006 = vmatprep.subr.bf16.mxu0 %v7019_v13  ;;  %v7085_v13 = vld [vmem:[#allocation5 + $0x304] ss:$16 sps:$4 sm:$0xff]  }
 0x30f   :  { %5249 = vmatpush1.bf16.msra.mxu1 %v7008_v42  ;;  %v7088_v42 = vld [vmem:[#allocation5 + $0x30c] ss:$16 sps:$4 sm:$0xff]  }
 0x310   :  { %5250 = vmatprep.subr.bf16.mxu1 %v7016_v9  ;;  %5007 = vmatpush1.bf16.msra.mxu0 %v7017_v15  ;;  %v7083_v9 = vld [vmem:[#allocation5 + $0x300] ss:$16 sps:$4 sm:$0xff]   ;;  %v7086_v15 = vld [vmem:[#allocation5 + $0x308] ss:$16 sps:$4 sm:$0xff]  }
 0x311   :  { %5008 = vmatprep.subr.bf16.mxu0 %v7025_v16  ;;  %v7091_v16 = vld [vmem:[#allocation5 + $0x324] ss:$16 sps:$4 sm:$0xff]  }
 0x313   :  { %5251 = vmatpush1.bf16.msra.mxu1 %v7014_v23  ;;  %v7094_v23 = vld [vmem:[#allocation5 + $0x32c] ss:$16 sps:$4 sm:$0xff]  }
 0x314   :  { %5252 = vmatprep.subr.bf16.mxu1 %v7022_v44  ;;  %5009 = vmatpush1.bf16.msra.mxu0 %v7023_v57  ;;  %v7089_v44 = vld [vmem:[#allocation5 + $0x320] ss:$16 sps:$4 sm:$0xff]   ;;  %v7092_v57 = vld [vmem:[#allocation5 + $0x328] ss:$16 sps:$4 sm:$0xff]  }
 0x315   :  { %5010 = vmatprep.subr.bf16.mxu0 %v7031_v4  ;;  %v7098_v4 = vld [vmem:[#allocation5 + $0x348] ss:$16 sps:$4 sm:$0xff]  }
 0x317   :  { %5253 = vmatpush1.bf16.msra.mxu1 %v7020_v14  ;;  %v7097_v14 = vld [vmem:[#allocation5 + $0x344] ss:$16 sps:$4 sm:$0xff]  }
 0x318   :  { %5254 = vmatprep.subr.bf16.mxu1 %v7028_v31  ;;  %5011 = vmatpush1.bf16.msra.mxu0 %v7029_v53  ;;  %v7100_v31 = vld [vmem:[#allocation5 + $0x34c] ss:$16 sps:$4 sm:$0xff]  }
 0x319   :  { %5021 = vmatprep.subr.bf16.mxu0 %v7037_v60  ;;  %v7106_v53 = vld [vmem:[#allocation5 + $0x36c] ss:$16 sps:$4 sm:$0xff]   ;;  %v7104_v60 = vld [vmem:[#allocation5 + $0x368] ss:$16 sps:$4 sm:$0xff]  }
 0x31b   :  { %5255 = vmatpush1.bf16.msra.mxu1 %v7026_v54  ;;  %v7095_v54 = vld [vmem:[#allocation5 + $0x340] ss:$16 sps:$4 sm:$0xff]  }
 0x31c   :  { %5256 = vmatprep.subr.bf16.mxu1 %v7034_v11  ;;  %v7103_v11 = vld [vmem:[#allocation5 + $0x364] ss:$16 sps:$4 sm:$0xff]  }
 0x31f   :  { %5257 = vmatpush1.bf16.msra.mxu1 %v7032_v46  ;;  %v7101_v46 = vld [vmem:[#allocation5 + $0x360] ss:$16 sps:$4 sm:$0xff]  }
 0x320   :  { %5267 = vmatprep.subr.bf16.mxu1 %v7040_v3  ;;  %v7109_v3 = vld [vmem:[#allocation5 + $0x384] ss:$16 sps:$4 sm:$0xff]  }
 0x3a9   :  { %v2288_v28 = vpop.f32.mrb[0].mxu1  ;;  %v10712_v45 = vpop.f32.mrb[0].mxu0 }
 0x3aa   :  { %v2290_v47 = vpop.f32.mrb[1].mxu1  ;;  %v10714_v0 = vpop.f32.mrb[1].mxu0  ;;  %v2648_v63 = vpack.c.bf16 %v2288_v28, %v2288_v28  ;;  %v7112_v28 = vld [vmem:[#allocation5 + $0x38c] ss:$16 sps:$4 sm:$0xff]  }
 0x3ab   :  { %v2649_v25 = vpack.c.bf16 %v2290_v47, %v2290_v47  ;;  %v7107_v47 = vld [vmem:[#allocation5 + $0x380] ss:$16 sps:$4 sm:$0xff]  }
 0x3ad   :  { %v10716_v62 = vpop.f32.mrb[2].mxu1  ;;  %v10718_v7 = vpop.f32.mrb[2].mxu0  ;;  %5012 = vmatprep.mubr.bf16.mxu0 %v2649_v25  ;;  %5258 = vmatprep.mubr.bf16.mxu1 %v2649_v25  ;;  %v7110_v25 = vld [vmem:[#allocation5 + $0x388] ss:$16 sps:$4 sm:$0xff]  }
 0x3ae   :  { %v2361_v29 = vpop.f32.mrb[3].mxu1  ;;  %v10720_v52 = vpop.f32.mrb[3].mxu0  ;;  %5013 = vmatmul.mubr.bf16.vlgmr.msra.gmra.mrb[4].mxu0 %v2648_v63  ;;  %5259 = vmatmul.mubr.bf16.vlgmr.msra.gmra.mrb[8].mxu1 %v2648_v63  ;;  %v7113_v63 = vld [vmem:[#allocation5 + $0x3a0] ss:$16 sps:$4 sm:$0xff]  }
 0x3af   :  { %v2651_v2 = vpack.c.bf16 %v2361_v29, %v2361_v29  ;;  %5022 = vmatpush1.bf16.msra.mxu0 %v7035_v8  ;;  %5268 = vmatpush1.bf16.msra.mxu1 %v7038_v37  ;;  %v7115_v8 = vld [vmem:[#allocation5 + $0x3a4] ss:$16 sps:$4 sm:$0xff]   ;;  %v7118_v37 = vld [vmem:[#allocation5 + $0x3ac] ss:$16 sps:$4 sm:$0xff]  }
 0x3b0   :  { %5023 = vmatprep.subr.bf16.mxu0 %v7043_v39  ;;  %5269 = vmatprep.subr.bf16.mxu1 %v7046_v61  ;;  %v7116_v39 = vld [vmem:[#allocation5 + $0x3a8] ss:$16 sps:$4 sm:$0xff]   ;;  %v7121_v61 = vld [vmem:[#allocation5 + $0x3c4] ss:$16 sps:$4 sm:$0xff]   ;;  %v7124_v29 = vld [vmem:[#allocation5 + $0x3cc] ss:$16 sps:$4 sm:$0xff]  }
 0x3b1   :  { %v10722_v32 = vpop.f32.mrb[4].mxu1  ;;  %5053 = vmatprep.mubr.bf16.mxu0 %v2651_v2  ;;  %5299 = vmatprep.mubr.bf16.mxu1 %v2651_v2  ;;  %v7119_v2 = vld [vmem:[#allocation5 + $0x3c0] ss:$16 sps:$4 sm:$0xff]  }
 0x3b2   :  { %v10724_v18 = vpop.f32.mrb[5].mxu1 }
 0x3b3   :  { %5024 = vmatpush1.bf16.msra.mxu0 %v7041_v12  ;;  %5270 = vmatpush1.bf16.msra.mxu1 %v7044_v21  ;;  %v7122_v12 = vld [vmem:[#allocation5 + $0x3c8] ss:$16 sps:$4 sm:$0xff]   ;;  %v7127_v21 = vld [vmem:[#allocation5 + $0x3e4] ss:$16 sps:$4 sm:$0xff]  }
 0x3b4   :  { %5025 = vmatprep.subr.bf16.mxu0 %v7049_v26  ;;  %5271 = vmatprep.subr.bf16.mxu1 %v7052_v30  ;;  %v7130_v26 = vld [vmem:[#allocation5 + $0x3ec] ss:$16 sps:$4 sm:$0xff]   ;;  %v7125_v30 = vld [vmem:[#allocation5 + $0x3e0] ss:$16 sps:$4 sm:$0xff]  }
 0x3b5   :  { %v10726_v50 = vpop.f32.mrb[6].mxu1 }
 0x3b6   :  { %v10728_v40 = vpop.f32.mrb[7].mxu1 }
 0x3b7   :  { %5026 = vmatpush1.bf16.msra.mxu0 %v7047_v1  ;;  %5272 = vmatpush1.bf16.msra.mxu1 %v7050_v19  ;;  %v7128_v1 = vld [vmem:[#allocation5 + $0x3e8] ss:$16 sps:$4 sm:$0xff]   ;;  %v7133_v19 = vld [vmem:[#allocation5 + $0x404] ss:$16 sps:$4 sm:$0xff]  }
 0x3b8   :  { %5027 = vmatprep.subr.bf16.mxu0 %v7055_v59  ;;  %5273 = vmatprep.subr.bf16.mxu1 %v7058_v56  ;;  %v7136_v59 = vld [vmem:[#allocation5 + $0x40c] ss:$16 sps:$4 sm:$0xff]   ;;  %v7131_v56 = vld [vmem:[#allocation5 + $0x400] ss:$16 sps:$4 sm:$0xff]  }
 0x3bb   :  { %5028 = vmatpush1.bf16.msra.mxu0 %v7053_v48  ;;  %5274 = vmatpush1.bf16.msra.mxu1 %v7056_v10  ;;  %v2650_v48 = vpack.c.bf16 %v10716_v62, %v10716_v62  ;;  %v7134_v10 = vld [vmem:[#allocation5 + $0x408] ss:$16 sps:$4 sm:$0xff]   ;;  %v7148_v62 = vld [vmem:[#allocation5 + $0x44c] ss:$16 sps:$4 sm:$0xff]  }
 0x3bc   :  { %5029 = vmatprep.subr.bf16.mxu0 %v7061_v20  ;;  %5275 = vmatprep.subr.bf16.mxu1 %v7064_v55  ;;  %v2653_v20 = vpack.c.bf16 %v10714_v0, %v10714_v0  ;;  %v7139_v55 = vld [vmem:[#allocation5 + $0x424] ss:$16 sps:$4 sm:$0xff]  }
 0x3bd   :  { %v7151_v0 = vld [vmem:[#allocation5 + $0x464] ss:$16 sps:$4 sm:$0xff]  }
 0x3bf   :  { %5030 = vmatpush1.bf16.msra.mxu0 %v7059_v51  ;;  %5276 = vmatpush1.bf16.msra.mxu1 %v7062_v17  ;;  %v7142_v51 = vld [vmem:[#allocation5 + $0x42c] ss:$16 sps:$4 sm:$0xff]   ;;  %v7137_v17 = vld [vmem:[#allocation5 + $0x420] ss:$16 sps:$4 sm:$0xff]  }
 0x3c0   :  { %5031 = vmatprep.subr.bf16.mxu0 %v7067_v22  ;;  %5277 = vmatprep.subr.bf16.mxu1 %v7070_v34  ;;  %v7140_v22 = vld [vmem:[#allocation5 + $0x428] ss:$16 sps:$4 sm:$0xff]   ;;  %v7145_v34 = vld [vmem:[#allocation5 + $0x444] ss:$16 sps:$4 sm:$0xff]  }
 0x3c3   :  { %5032 = vmatpush1.bf16.msra.mxu0 %v7065_v43  ;;  %5278 = vmatpush1.bf16.msra.mxu1 %v7068_v5  ;;  %v7143_v43 = vld [vmem:[#allocation5 + $0x440] ss:$16 sps:$4 sm:$0xff]   ;;  %v7146_v5 = vld [vmem:[#allocation5 + $0x448] ss:$16 sps:$4 sm:$0xff]  }
 0x3c4   :  { %5033 = vmatprep.subr.bf16.mxu0 %v7073_v6  ;;  %5279 = vmatprep.subr.bf16.mxu1 %v7076_v41  ;;  %v7154_v6 = vld [vmem:[#allocation5 + $0x46c] ss:$16 sps:$4 sm:$0xff]   ;;  %v7149_v41 = vld [vmem:[#allocation5 + $0x460] ss:$16 sps:$4 sm:$0xff]  }
 0x3c7   :  { %5034 = vmatpush1.bf16.msra.mxu0 %v7071_v36  ;;  %5280 = vmatpush1.bf16.msra.mxu1 %v7074_v24  ;;  %v7152_v36 = vld [vmem:[#allocation5 + $0x468] ss:$16 sps:$4 sm:$0xff]   ;;  %v7157_v24 = vld [vmem:[#allocation5 + $0x484] ss:$16 sps:$4 sm:$0xff]  }
 0x3c8   :  { %5035 = vmatprep.subr.bf16.mxu0 %v7079_v33  ;;  %5281 = vmatprep.subr.bf16.mxu1 %v7082_v35  ;;  %v7160_v33 = vld [vmem:[#allocation5 + $0x48c] ss:$16 sps:$4 sm:$0xff]   ;;  %v7155_v35 = vld [vmem:[#allocation5 + $0x480] ss:$16 sps:$4 sm:$0xff]  }
 0x3cb   :  { %5036 = vmatpush1.bf16.msra.mxu0 %v7077_v49  ;;  %5282 = vmatpush1.bf16.msra.mxu1 %v7080_v27  ;;  %v7158_v49 = vld [vmem:[#allocation5 + $0x488] ss:$16 sps:$4 sm:$0xff]   ;;  %v7163_v27 = vld [vmem:[#allocation5 + $0x4a4] ss:$16 sps:$4 sm:$0xff]  }
 0x3cc   :  { %5037 = vmatprep.subr.bf16.mxu0 %v7085_v13  ;;  %5283 = vmatprep.subr.bf16.mxu1 %v7088_v42  ;;  %v7166_v13 = vld [vmem:[#allocation5 + $0x4ac] ss:$16 sps:$4 sm:$0xff]   ;;  %v7161_v42 = vld [vmem:[#allocation5 + $0x4a0] ss:$16 sps:$4 sm:$0xff]  }
 0x3cf   :  { %5038 = vmatpush1.bf16.msra.mxu0 %v7083_v9  ;;  %5284 = vmatpush1.bf16.msra.mxu1 %v7086_v15  ;;  %v7164_v9 = vld [vmem:[#allocation5 + $0x4a8] ss:$16 sps:$4 sm:$0xff]   ;;  %v7169_v15 = vld [vmem:[#allocation5 + $0x4c4] ss:$16 sps:$4 sm:$0xff]  }
 0x3d0   :  { %5039 = vmatprep.subr.bf16.mxu0 %v7091_v16  ;;  %5285 = vmatprep.subr.bf16.mxu1 %v7094_v23  ;;  %v7172_v16 = vld [vmem:[#allocation5 + $0x4cc] ss:$16 sps:$4 sm:$0xff]   ;;  %v7167_v23 = vld [vmem:[#allocation5 + $0x4c0] ss:$16 sps:$4 sm:$0xff]  }
 0x3d3   :  { %5040 = vmatpush1.bf16.msra.mxu0 %v7089_v44  ;;  %5286 = vmatpush1.bf16.msra.mxu1 %v7092_v57  ;;  %v7170_v44 = vld [vmem:[#allocation5 + $0x4c8] ss:$16 sps:$4 sm:$0xff]   ;;  %v7175_v57 = vld [vmem:[#allocation5 + $0x4e4] ss:$16 sps:$4 sm:$0xff]  }
 0x3d4   :  { %5041 = vmatprep.subr.bf16.mxu0 %v7097_v14  ;;  %5287 = vmatprep.subr.bf16.mxu1 %v7100_v31  ;;  %v7178_v14 = vld [vmem:[#allocation5 + $0x4ec] ss:$16 sps:$4 sm:$0xff]   ;;  %v7173_v31 = vld [vmem:[#allocation5 + $0x4e0] ss:$16 sps:$4 sm:$0xff]  }
 0x3d7   :  { %5042 = vmatpush1.bf16.msra.mxu0 %v7095_v54  ;;  %5288 = vmatpush1.bf16.msra.mxu1 %v7098_v4  ;;  %v7176_v54 = vld [vmem:[#allocation5 + $0x4e8] ss:$16 sps:$4 sm:$0xff]   ;;  %v7181_v4 = vld [vmem:[#allocation5 + $0x504] ss:$16 sps:$4 sm:$0xff]  }
 0x3d8   :  { %5043 = vmatprep.subr.bf16.mxu0 %v7103_v11  ;;  %5289 = vmatprep.subr.bf16.mxu1 %v7106_v53  ;;  %v7184_v11 = vld [vmem:[#allocation5 + $0x50c] ss:$16 sps:$4 sm:$0xff]   ;;  %v7179_v53 = vld [vmem:[#allocation5 + $0x500] ss:$16 sps:$4 sm:$0xff]  }
 0x3db   :  { %5044 = vmatpush1.bf16.msra.mxu0 %v7101_v46  ;;  %5290 = vmatpush1.bf16.msra.mxu1 %v7104_v60  ;;  %v7182_v46 = vld [vmem:[#allocation5 + $0x508] ss:$16 sps:$4 sm:$0xff]   ;;  %v7187_v60 = vld [vmem:[#allocation5 + $0x524] ss:$16 sps:$4 sm:$0xff]  }
 0x3dc   :  { %5045 = vmatprep.subr.bf16.mxu0 %v7109_v3  ;;  %5291 = vmatprep.subr.bf16.mxu1 %v7112_v28  ;;  %v7190_v3 = vld [vmem:[#allocation5 + $0x52c] ss:$16 sps:$4 sm:$0xff]   ;;  %v7185_v28 = vld [vmem:[#allocation5 + $0x520] ss:$16 sps:$4 sm:$0xff]  }
 0x3df   :  { %5046 = vmatpush1.bf16.msra.mxu0 %v7107_v47  ;;  %5292 = vmatpush1.bf16.msra.mxu1 %v7110_v25  ;;  %v7188_v47 = vld [vmem:[#allocation5 + $0x528] ss:$16 sps:$4 sm:$0xff]   ;;  %v7193_v25 = vld [vmem:[#allocation5 + $0x544] ss:$16 sps:$4 sm:$0xff]  }
 0x3e0   :  { %5047 = vmatprep.subr.bf16.mxu0 %v7115_v8  ;;  %5293 = vmatprep.subr.bf16.mxu1 %v7118_v37  ;;  %v7196_v8 = vld [vmem:[#allocation5 + $0x54c] ss:$16 sps:$4 sm:$0xff]   ;;  %v7191_v37 = vld [vmem:[#allocation5 + $0x540] ss:$16 sps:$4 sm:$0xff]  }
 0x3e3   :  { %5048 = vmatpush1.bf16.msra.mxu0 %v7113_v63  ;;  %5294 = vmatpush1.bf16.msra.mxu1 %v7116_v39  ;;  %v7194_v63 = vld [vmem:[#allocation5 + $0x548] ss:$16 sps:$4 sm:$0xff]   ;;  %v7199_v39 = vld [vmem:[#allocation5 + $0x564] ss:$16 sps:$4 sm:$0xff]  }
 0x3e4   :  { %5049 = vmatprep.subr.bf16.mxu0 %v7121_v61  ;;  %5295 = vmatprep.subr.bf16.mxu1 %v7124_v29  ;;  %v7202_v61 = vld [vmem:[#allocation5 + $0x56c] ss:$16 sps:$4 sm:$0xff]   ;;  %v7197_v29 = vld [vmem:[#allocation5 + $0x560] ss:$16 sps:$4 sm:$0xff]  }
 0x3e7   :  { %5050 = vmatpush1.bf16.msra.mxu0 %v7119_v2  ;;  %5296 = vmatpush1.bf16.msra.mxu1 %v7122_v12  ;;  %v7200_v2 = vld [vmem:[#allocation5 + $0x568] ss:$16 sps:$4 sm:$0xff]   ;;  %v7205_v12 = vld [vmem:[#allocation5 + $0x584] ss:$16 sps:$4 sm:$0xff]  }
 0x3e8   :  { %5051 = vmatprep.subr.bf16.mxu0 %v7127_v21  ;;  %5297 = vmatprep.subr.bf16.mxu1 %v7130_v26  ;;  %v7208_v21 = vld [vmem:[#allocation5 + $0x58c] ss:$16 sps:$4 sm:$0xff]   ;;  %v7203_v26 = vld [vmem:[#allocation5 + $0x580] ss:$16 sps:$4 sm:$0xff]  }
 0x3eb   :  { %5052 = vmatpush1.bf16.msra.mxu0 %v7125_v30  ;;  %5298 = vmatpush1.bf16.msra.mxu1 %v7128_v1  ;;  %v7206_v30 = vld [vmem:[#allocation5 + $0x588] ss:$16 sps:$4 sm:$0xff]   ;;  %v7211_v1 = vld [vmem:[#allocation5 + $0x5a4] ss:$16 sps:$4 sm:$0xff]  }
 0x3ec   :  { %5062 = vmatprep.subr.bf16.mxu0 %v7133_v19  ;;  %5308 = vmatprep.subr.bf16.mxu1 %v7136_v59  ;;  %v7214_v19 = vld [vmem:[#allocation5 + $0x5ac] ss:$16 sps:$4 sm:$0xff]   ;;  %v7209_v59 = vld [vmem:[#allocation5 + $0x5a0] ss:$16 sps:$4 sm:$0xff]  }
 0x3ee   :  { %5054 = vmatmul.mubr.bf16.vlgmr.msra.gmra.mrb[4].mxu0 %v2650_v48  ;;  %5300 = vmatmul.mubr.bf16.vlgmr.msra.gmra.mrb[8].mxu1 %v2650_v48  ;;  %v7217_v48 = vld [vmem:[#allocation5 + $0x5c4] ss:$16 sps:$4 sm:$0xff]  }
 0x3ef   :  { %5063 = vmatpush1.bf16.msra.mxu0 %v7131_v56  ;;  %5094 = vmatprep.mubr.bf16.mxu0 %v2653_v20  ;;  %v7212_v56 = vld [vmem:[#allocation5 + $0x5a8] ss:$16 sps:$4 sm:$0xff]  }
 0x3f0   :  { %5309 = vmatpush1.bf16.msra.mxu1 %v7134_v10  ;;  %5340 = vmatprep.mubr.bf16.mxu1 %v2653_v20  ;;  %v7220_v10 = vld [vmem:[#allocation5 + $0x5cc] ss:$16 sps:$4 sm:$0xff]   ;;  %v7215_v20 = vld [vmem:[#allocation5 + $0x5c0] ss:$16 sps:$4 sm:$0xff]  }
 0x3f1   :  { %5064 = vmatprep.subr.bf16.mxu0 %v7139_v55  ;;  %5310 = vmatprep.subr.bf16.mxu1 %v7142_v51  ;;  %v7218_v55 = vld [vmem:[#allocation5 + $0x5c8] ss:$16 sps:$4 sm:$0xff]   ;;  %v7223_v51 = vld [vmem:[#allocation5 + $0x5e4] ss:$16 sps:$4 sm:$0xff]  }
 0x3f3   :  { %5065 = vmatpush1.bf16.msra.mxu0 %v7137_v17  ;;  %v7226_v17 = vld [vmem:[#allocation5 + $0x5ec] ss:$16 sps:$4 sm:$0xff]  }
 0x3f4   :  { %5311 = vmatpush1.bf16.msra.mxu1 %v7140_v22  ;;  %5066 = vmatprep.subr.bf16.mxu0 %v7145_v34  ;;  %v7221_v22 = vld [vmem:[#allocation5 + $0x5e0] ss:$16 sps:$4 sm:$0xff]   ;;  %v7224_v34 = vld [vmem:[#allocation5 + $0x5e8] ss:$16 sps:$4 sm:$0xff]  }
 0x3f5   :  { %5312 = vmatprep.subr.bf16.mxu1 %v7148_v62  ;;  %v7229_v62 = vld [vmem:[#allocation5 + $0x604] ss:$16 sps:$4 sm:$0xff]  }
 0x3f7   :  { %5067 = vmatpush1.bf16.msra.mxu0 %v7143_v43  ;;  %v7232_v43 = vld [vmem:[#allocation5 + $0x60c] ss:$16 sps:$4 sm:$0xff]  }
 0x3f8   :  { %5313 = vmatpush1.bf16.msra.mxu1 %v7146_v5  ;;  %5068 = vmatprep.subr.bf16.mxu0 %v7151_v0  ;;  %v7227_v5 = vld [vmem:[#allocation5 + $0x600] ss:$16 sps:$4 sm:$0xff]   ;;  %v2652_v0 = vpack.c.bf16 %v10712_v45, %v10712_v45  ;;  %v7244_v45 = vld [vmem:[#allocation5 + $0x64c] ss:$16 sps:$4 sm:$0xff]  }
 0x3f9   :  { %5314 = vmatprep.subr.bf16.mxu1 %v7154_v6  ;;  %v7230_v6 = vld [vmem:[#allocation5 + $0x608] ss:$16 sps:$4 sm:$0xff]  }
 0x3fb   :  { %5069 = vmatpush1.bf16.msra.mxu0 %v7149_v41  ;;  %v7235_v41 = vld [vmem:[#allocation5 + $0x624] ss:$16 sps:$4 sm:$0xff]  }
 0x3fc   :  { %5315 = vmatpush1.bf16.msra.mxu1 %v7152_v36  ;;  %5070 = vmatprep.subr.bf16.mxu0 %v7157_v24  ;;  %v2655_v36 = vpack.c.bf16 %v10724_v18, %v10724_v18  ;;  %v7238_v24 = vld [vmem:[#allocation5 + $0x62c] ss:$16 sps:$4 sm:$0xff]  }
 0x3fd   :  { %5316 = vmatprep.subr.bf16.mxu1 %v7160_v33  ;;  %v7233_v33 = vld [vmem:[#allocation5 + $0x620] ss:$16 sps:$4 sm:$0xff]   ;;  %v7250_v18 = vld [vmem:[#allocation5 + $0x66c] ss:$16 sps:$4 sm:$0xff]  }
 0x3ff   :  { %5071 = vmatpush1.bf16.msra.mxu0 %v7155_v35  ;;  %v7236_v35 = vld [vmem:[#allocation5 + $0x628] ss:$16 sps:$4 sm:$0xff]  }
 0x400   :  { %5317 = vmatpush1.bf16.msra.mxu1 %v7158_v49  ;;  %5072 = vmatprep.subr.bf16.mxu0 %v7163_v27  ;;  %v7241_v49 = vld [vmem:[#allocation5 + $0x644] ss:$16 sps:$4 sm:$0xff]   ;;  %v7239_v27 = vld [vmem:[#allocation5 + $0x640] ss:$16 sps:$4 sm:$0xff]  }
 0x401   :  { %5318 = vmatprep.subr.bf16.mxu1 %v7166_v13  ;;  %v7242_v13 = vld [vmem:[#allocation5 + $0x648] ss:$16 sps:$4 sm:$0xff]  }
 0x403   :  { %5073 = vmatpush1.bf16.msra.mxu0 %v7161_v42  ;;  %v7247_v42 = vld [vmem:[#allocation5 + $0x664] ss:$16 sps:$4 sm:$0xff]  }
 0x404   :  { %5319 = vmatpush1.bf16.msra.mxu1 %v7164_v9  ;;  %5074 = vmatprep.subr.bf16.mxu0 %v7169_v15  ;;  %v7245_v9 = vld [vmem:[#allocation5 + $0x660] ss:$16 sps:$4 sm:$0xff]   ;;  %v7248_v15 = vld [vmem:[#allocation5 + $0x668] ss:$16 sps:$4 sm:$0xff]  }
 0x405   :  { %5320 = vmatprep.subr.bf16.mxu1 %v7172_v16  ;;  %v7253_v16 = vld [vmem:[#allocation5 + $0x684] ss:$16 sps:$4 sm:$0xff]  }
 0x407   :  { %5075 = vmatpush1.bf16.msra.mxu0 %v7167_v23  ;;  %v7256_v23 = vld [vmem:[#allocation5 + $0x68c] ss:$16 sps:$4 sm:$0xff]  }
 0x408   :  { %5321 = vmatpush1.bf16.msra.mxu1 %v7170_v44  ;;  %5076 = vmatprep.subr.bf16.mxu0 %v7175_v57  ;;  %v7251_v44 = vld [vmem:[#allocation5 + $0x680] ss:$16 sps:$4 sm:$0xff]   ;;  %v7254_v57 = vld [vmem:[#allocation5 + $0x688] ss:$16 sps:$4 sm:$0xff]  }
 0x409   :  { %5322 = vmatprep.subr.bf16.mxu1 %v7178_v14  ;;  %v7259_v14 = vld [vmem:[#allocation5 + $0x6a4] ss:$16 sps:$4 sm:$0xff]  }
 0x40b   :  { %5077 = vmatpush1.bf16.msra.mxu0 %v7173_v31  ;;  %v7262_v31 = vld [vmem:[#allocation5 + $0x6ac] ss:$16 sps:$4 sm:$0xff]  }
 0x40c   :  { %5323 = vmatpush1.bf16.msra.mxu1 %v7176_v54  ;;  %5078 = vmatprep.subr.bf16.mxu0 %v7181_v4  ;;  %v7257_v54 = vld [vmem:[#allocation5 + $0x6a0] ss:$16 sps:$4 sm:$0xff]   ;;  %v7260_v4 = vld [vmem:[#allocation5 + $0x6a8] ss:$16 sps:$4 sm:$0xff]  }
 0x40d   :  { %5324 = vmatprep.subr.bf16.mxu1 %v7184_v11  ;;  %v7265_v11 = vld [vmem:[#allocation5 + $0x6c4] ss:$16 sps:$4 sm:$0xff]  }
 0x40f   :  { %5079 = vmatpush1.bf16.msra.mxu0 %v7179_v53  ;;  %v7268_v53 = vld [vmem:[#allocation5 + $0x6cc] ss:$16 sps:$4 sm:$0xff]  }
 0x410   :  { %5325 = vmatpush1.bf16.msra.mxu1 %v7182_v46  ;;  %5080 = vmatprep.subr.bf16.mxu0 %v7187_v60  ;;  %v7263_v46 = vld [vmem:[#allocation5 + $0x6c0] ss:$16 sps:$4 sm:$0xff]   ;;  %v7266_v60 = vld [vmem:[#allocation5 + $0x6c8] ss:$16 sps:$4 sm:$0xff]  }
 0x411   :  { %5326 = vmatprep.subr.bf16.mxu1 %v7190_v3  ;;  %v7271_v3 = vld [vmem:[#allocation5 + $0x6e4] ss:$16 sps:$4 sm:$0xff]  }
 0x413   :  { %5081 = vmatpush1.bf16.msra.mxu0 %v7185_v28  ;;  %v7274_v28 = vld [vmem:[#allocation5 + $0x6ec] ss:$16 sps:$4 sm:$0xff]  }
 0x414   :  { %5327 = vmatpush1.bf16.msra.mxu1 %v7188_v47  ;;  %5082 = vmatprep.subr.bf16.mxu0 %v7193_v25  ;;  %v7269_v47 = vld [vmem:[#allocation5 + $0x6e0] ss:$16 sps:$4 sm:$0xff]   ;;  %v7272_v25 = vld [vmem:[#allocation5 + $0x6e8] ss:$16 sps:$4 sm:$0xff]  }
 0x415   :  { %5328 = vmatprep.subr.bf16.mxu1 %v7196_v8  ;;  %v7277_v8 = vld [vmem:[#allocation5 + $0x704] ss:$16 sps:$4 sm:$0xff]  }
 0x417   :  { %5083 = vmatpush1.bf16.msra.mxu0 %v7191_v37  ;;  %v7280_v37 = vld [vmem:[#allocation5 + $0x70c] ss:$16 sps:$4 sm:$0xff]  }
 0x418   :  { %5329 = vmatpush1.bf16.msra.mxu1 %v7194_v63  ;;  %5084 = vmatprep.subr.bf16.mxu0 %v7199_v39  ;;  %v7275_v63 = vld [vmem:[#allocation5 + $0x700] ss:$16 sps:$4 sm:$0xff]   ;;  %v7278_v39 = vld [vmem:[#allocation5 + $0x708] ss:$16 sps:$4 sm:$0xff]  }
 0x419   :  { %5330 = vmatprep.subr.bf16.mxu1 %v7202_v61  ;;  %v7283_v61 = vld [vmem:[#allocation5 + $0x724] ss:$16 sps:$4 sm:$0xff]  }
 0x41b   :  { %5085 = vmatpush1.bf16.msra.mxu0 %v7197_v29  ;;  %v7286_v29 = vld [vmem:[#allocation5 + $0x72c] ss:$16 sps:$4 sm:$0xff]  }
 0x41c   :  { %5331 = vmatpush1.bf16.msra.mxu1 %v7200_v2  ;;  %5086 = vmatprep.subr.bf16.mxu0 %v7205_v12  ;;  %v7281_v2 = vld [vmem:[#allocation5 + $0x720] ss:$16 sps:$4 sm:$0xff]   ;;  %v7284_v12 = vld [vmem:[#allocation5 + $0x728] ss:$16 sps:$4 sm:$0xff]  }
 0x41d   :  { %5332 = vmatprep.subr.bf16.mxu1 %v7208_v21  ;;  %v7289_v21 = vld [vmem:[#allocation5 + $0x744] ss:$16 sps:$4 sm:$0xff]  }
 0x41f   :  { %5087 = vmatpush1.bf16.msra.mxu0 %v7203_v26  ;;  %v7292_v26 = vld [vmem:[#allocation5 + $0x74c] ss:$16 sps:$4 sm:$0xff]  }
 0x420   :  { %5333 = vmatpush1.bf16.msra.mxu1 %v7206_v30  ;;  %5088 = vmatprep.subr.bf16.mxu0 %v7211_v1  ;;  %v7287_v30 = vld [vmem:[#allocation5 + $0x740] ss:$16 sps:$4 sm:$0xff]   ;;  %v7290_v1 = vld [vmem:[#allocation5 + $0x748] ss:$16 sps:$4 sm:$0xff]  }
 0x421   :  { %5334 = vmatprep.subr.bf16.mxu1 %v7214_v19  ;;  %v7295_v19 = vld [vmem:[#allocation5 + $0x764] ss:$16 sps:$4 sm:$0xff]  }
 0x423   :  { %5089 = vmatpush1.bf16.msra.mxu0 %v7209_v59  ;;  %v7298_v59 = vld [vmem:[#allocation5 + $0x76c] ss:$16 sps:$4 sm:$0xff]  }
 0x424   :  { %5335 = vmatpush1.bf16.msra.mxu1 %v7212_v56  ;;  %5090 = vmatprep.subr.bf16.mxu0 %v7217_v48  ;;  %v7293_v56 = vld [vmem:[#allocation5 + $0x760] ss:$16 sps:$4 sm:$0xff]   ;;  %v7296_v48 = vld [vmem:[#allocation5 + $0x768] ss:$16 sps:$4 sm:$0xff]  }
 0x425   :  { %5336 = vmatprep.subr.bf16.mxu1 %v7220_v10  ;;  %v7301_v10 = vld [vmem:[#allocation5 + $0x784] ss:$16 sps:$4 sm:$0xff]  }
 0x427   :  { %5091 = vmatpush1.bf16.msra.mxu0 %v7215_v20  ;;  %v7304_v20 = vld [vmem:[#allocation5 + $0x78c] ss:$16 sps:$4 sm:$0xff]  }
 0x428   :  { %5337 = vmatpush1.bf16.msra.mxu1 %v7218_v55  ;;  %5092 = vmatprep.subr.bf16.mxu0 %v7223_v51  ;;  %v7299_v55 = vld [vmem:[#allocation5 + $0x780] ss:$16 sps:$4 sm:$0xff]   ;;  %v7302_v51 = vld [vmem:[#allocation5 + $0x788] ss:$16 sps:$4 sm:$0xff]  }
 0x429   :  { %5338 = vmatprep.subr.bf16.mxu1 %v7226_v17  ;;  %v7307_v17 = vld [vmem:[#allocation5 + $0x7a4] ss:$16 sps:$4 sm:$0xff]  }
 0x42b   :  { %5093 = vmatpush1.bf16.msra.mxu0 %v7221_v22  ;;  %v7310_v22 = vld [vmem:[#allocation5 + $0x7ac] ss:$16 sps:$4 sm:$0xff]  }
 0x42c   :  { %5339 = vmatpush1.bf16.msra.mxu1 %v7224_v34  ;;  %5103 = vmatprep.subr.bf16.mxu0 %v7229_v62  ;;  %v7305_v34 = vld [vmem:[#allocation5 + $0x7a0] ss:$16 sps:$4 sm:$0xff]   ;;  %v7308_v62 = vld [vmem:[#allocation5 + $0x7a8] ss:$16 sps:$4 sm:$0xff]  }
 0x42d   :  { %5349 = vmatprep.subr.bf16.mxu1 %v7232_v43  ;;  %v7313_v43 = vld [vmem:[#allocation5 + $0x7c4] ss:$16 sps:$4 sm:$0xff]  }
 0x42e   :  { %5095 = vmatmul.mubr.bf16.vlgmr.msra.gmra.mrb[4].mxu0 %v2652_v0 }
 0x42f   :  { %5341 = vmatmul.mubr.bf16.vlgmr.msra.gmra.mrb[8].mxu1 %v2652_v0  ;;  %5104 = vmatpush1.bf16.msra.mxu0 %v7227_v5  ;;  %v7316_v5 = vld [vmem:[#allocation5 + $0x7cc] ss:$16 sps:$4 sm:$0xff]   ;;  %v7311_v0 = vld [vmem:[#allocation5 + $0x7c0] ss:$16 sps:$4 sm:$0xff]  }
 0x430   :  { %5135 = vmatprep.mubr.bf16.mxu0 %v2655_v36  ;;  %5350 = vmatpush1.bf16.msra.mxu1 %v7230_v6  ;;  %v7314_v6 = vld [vmem:[#allocation5 + $0x7c8] ss:$16 sps:$4 sm:$0xff]  }
 0x431   :  { %5381 = vmatprep.mubr.bf16.mxu1 %v2655_v36  ;;  %5105 = vmatprep.subr.bf16.mxu0 %v7235_v41  ;;  %v7319_v41 = vld [vmem:[#allocation5 + $0x7e4] ss:$16 sps:$4 sm:$0xff]   ;;  %v7322_v36 = vld [vmem:[#allocation5 + $0x7ec] ss:$16 sps:$4 sm:$0xff]  }
 0x432   :  { %5351 = vmatprep.subr.bf16.mxu1 %v7238_v24  ;;  %v7317_v24 = vld [vmem:[#allocation5 + $0x7e0] ss:$16 sps:$4 sm:$0xff]  }
 0x433   :  { %5106 = vmatpush1.bf16.msra.mxu0 %v7233_v33  ;;  %v7320_v33 = vld [vmem:[#allocation5 + $0x7e8] ss:$16 sps:$4 sm:$0xff]  }
 0x434   :  { %5352 = vmatpush1.bf16.msra.mxu1 %v7236_v35  ;;  %5107 = vmatprep.subr.bf16.mxu0 %v7241_v49  ;;  %v7325_v35 = vld [vmem:[#allocation5 + $0x804] ss:$16 sps:$4 sm:$0xff]   ;;  %v7328_v49 = vld [vmem:[#allocation5 + $0x80c] ss:$16 sps:$4 sm:$0xff]  }
 0x435   :  { %5353 = vmatprep.subr.bf16.mxu1 %v7244_v45  ;;  %v7323_v45 = vld [vmem:[#allocation5 + $0x800] ss:$16 sps:$4 sm:$0xff]  }
 0x437   :  { %5108 = vmatpush1.bf16.msra.mxu0 %v7239_v27  ;;  %v2654_v27 = vpack.c.bf16 %v10722_v32, %v10722_v32  ;;  %v7340_v32 = vld [vmem:[#allocation5 + $0x84c] ss:$16 sps:$4 sm:$0xff]  }
 0x438   :  { %5354 = vmatpush1.bf16.msra.mxu1 %v7242_v13  ;;  %5109 = vmatprep.subr.bf16.mxu0 %v7247_v42  ;;  %v7326_v13 = vld [vmem:[#allocation5 + $0x808] ss:$16 sps:$4 sm:$0xff]   ;;  %v7331_v42 = vld [vmem:[#allocation5 + $0x824] ss:$16 sps:$4 sm:$0xff]  }
 0x439   :  { %5355 = vmatprep.subr.bf16.mxu1 %v7250_v18  ;;  %v2657_v18 = vpack.c.bf16 %v10720_v52, %v10720_v52  ;;  %v7346_v52 = vld [vmem:[#allocation5 + $0x86c] ss:$16 sps:$4 sm:$0xff]  }
 0x43b   :  { %5110 = vmatpush1.bf16.msra.mxu0 %v7245_v9  ;;  %v7334_v9 = vld [vmem:[#allocation5 + $0x82c] ss:$16 sps:$4 sm:$0xff]  }
 0x43c   :  { %5356 = vmatpush1.bf16.msra.mxu1 %v7248_v15  ;;  %5111 = vmatprep.subr.bf16.mxu0 %v7253_v16  ;;  %v7329_v15 = vld [vmem:[#allocation5 + $0x820] ss:$16 sps:$4 sm:$0xff]   ;;  %v7332_v16 = vld [vmem:[#allocation5 + $0x828] ss:$16 sps:$4 sm:$0xff]  }
 0x43d   :  { %5357 = vmatprep.subr.bf16.mxu1 %v7256_v23  ;;  %v7337_v23 = vld [vmem:[#allocation5 + $0x844] ss:$16 sps:$4 sm:$0xff]  }
 0x43f   :  { %5112 = vmatpush1.bf16.msra.mxu0 %v7251_v44  ;;  %v7335_v44 = vld [vmem:[#allocation5 + $0x840] ss:$16 sps:$4 sm:$0xff]  }
 0x440   :  { %5358 = vmatpush1.bf16.msra.mxu1 %v7254_v57  ;;  %5113 = vmatprep.subr.bf16.mxu0 %v7259_v14  ;;  %v7338_v57 = vld [vmem:[#allocation5 + $0x848] ss:$16 sps:$4 sm:$0xff]   ;;  %v7343_v14 = vld [vmem:[#allocation5 + $0x864] ss:$16 sps:$4 sm:$0xff]  }
 0x441   :  { %5359 = vmatprep.subr.bf16.mxu1 %v7262_v31  ;;  %v7341_v31 = vld [vmem:[#allocation5 + $0x860] ss:$16 sps:$4 sm:$0xff]  }
 0x443   :  { %5114 = vmatpush1.bf16.msra.mxu0 %v7257_v54  ;;  %v7344_v54 = vld [vmem:[#allocation5 + $0x868] ss:$16 sps:$4 sm:$0xff]  }
 0x444   :  { %5360 = vmatpush1.bf16.msra.mxu1 %v7260_v4  ;;  %5115 = vmatprep.subr.bf16.mxu0 %v7265_v11  ;;  %v7349_v4 = vld [vmem:[#allocation5 + $0x884] ss:$16 sps:$4 sm:$0xff]   ;;  %v7352_v11 = vld [vmem:[#allocation5 + $0x88c] ss:$16 sps:$4 sm:$0xff]  }
 0x445   :  { %5361 = vmatprep.subr.bf16.mxu1 %v7268_v53  ;;  %v7347_v53 = vld [vmem:[#allocation5 + $0x880] ss:$16 sps:$4 sm:$0xff]  }
 0x447   :  { %5116 = vmatpush1.bf16.msra.mxu0 %v7263_v46  ;;  %v7350_v46 = vld [vmem:[#allocation5 + $0x888] ss:$16 sps:$4 sm:$0xff]  }
 0x448   :  { %5362 = vmatpush1.bf16.msra.mxu1 %v7266_v60  ;;  %5117 = vmatprep.subr.bf16.mxu0 %v7271_v3  ;;  %v7355_v60 = vld [vmem:[#allocation5 + $0x8a4] ss:$16 sps:$4 sm:$0xff]   ;;  %v7358_v3 = vld [vmem:[#allocation5 + $0x8ac] ss:$16 sps:$4 sm:$0xff]  }
 0x449   :  { %5363 = vmatprep.subr.bf16.mxu1 %v7274_v28  ;;  %v7353_v28 = vld [vmem:[#allocation5 + $0x8a0] ss:$16 sps:$4 sm:$0xff]  }
 0x44b   :  { %5118 = vmatpush1.bf16.msra.mxu0 %v7269_v47  ;;  %v7356_v47 = vld [vmem:[#allocation5 + $0x8a8] ss:$16 sps:$4 sm:$0xff]  }
 0x44c   :  { %5364 = vmatpush1.bf16.msra.mxu1 %v7272_v25  ;;  %5119 = vmatprep.subr.bf16.mxu0 %v7277_v8  ;;  %v7361_v25 = vld [vmem:[#allocation5 + $0x8c4] ss:$16 sps:$4 sm:$0xff]   ;;  %v7364_v8 = vld [vmem:[#allocation5 + $0x8cc] ss:$16 sps:$4 sm:$0xff]  }
 0x44d   :  { %5365 = vmatprep.subr.bf16.mxu1 %v7280_v37  ;;  %v7359_v37 = vld [vmem:[#allocation5 + $0x8c0] ss:$16 sps:$4 sm:$0xff]  }
 0x44f   :  { %5120 = vmatpush1.bf16.msra.mxu0 %v7275_v63  ;;  %v7362_v63 = vld [vmem:[#allocation5 + $0x8c8] ss:$16 sps:$4 sm:$0xff]  }
 0x450   :  { %5366 = vmatpush1.bf16.msra.mxu1 %v7278_v39  ;;  %5121 = vmatprep.subr.bf16.mxu0 %v7283_v61  ;;  %v7367_v39 = vld [vmem:[#allocation5 + $0x8e4] ss:$16 sps:$4 sm:$0xff]   ;;  %v7370_v61 = vld [vmem:[#allocation5 + $0x8ec] ss:$16 sps:$4 sm:$0xff]  }
 0x451   :  { %5367 = vmatprep.subr.bf16.mxu1 %v7286_v29  ;;  %v7365_v29 = vld [vmem:[#allocation5 + $0x8e0] ss:$16 sps:$4 sm:$0xff]  }
 0x453   :  { %5122 = vmatpush1.bf16.msra.mxu0 %v7281_v2  ;;  %v7368_v2 = vld [vmem:[#allocation5 + $0x8e8] ss:$16 sps:$4 sm:$0xff]  }
 0x454   :  { %5368 = vmatpush1.bf16.msra.mxu1 %v7284_v12  ;;  %5123 = vmatprep.subr.bf16.mxu0 %v7289_v21  ;;  %v7373_v12 = vld [vmem:[#allocation5 + $0x904] ss:$16 sps:$4 sm:$0xff]   ;;  %v7376_v21 = vld [vmem:[#allocation5 + $0x90c] ss:$16 sps:$4 sm:$0xff]  }
 0x455   :  { %5369 = vmatprep.subr.bf16.mxu1 %v7292_v26  ;;  %v7371_v26 = vld [vmem:[#allocation5 + $0x900] ss:$16 sps:$4 sm:$0xff]  }
 0x457   :  { %5124 = vmatpush1.bf16.msra.mxu0 %v7287_v30  ;;  %v7374_v30 = vld [vmem:[#allocation5 + $0x908] ss:$16 sps:$4 sm:$0xff]  }
 0x458   :  { %5370 = vmatpush1.bf16.msra.mxu1 %v7290_v1  ;;  %5125 = vmatprep.subr.bf16.mxu0 %v7295_v19  ;;  %v7379_v1 = vld [vmem:[#allocation5 + $0x924] ss:$16 sps:$4 sm:$0xff]   ;;  %v7382_v19 = vld [vmem:[#allocation5 + $0x92c] ss:$16 sps:$4 sm:$0xff]  }
 0x459   :  { %5371 = vmatprep.subr.bf16.mxu1 %v7298_v59  ;;  %v7377_v59 = vld [vmem:[#allocation5 + $0x920] ss:$16 sps:$4 sm:$0xff]  }
 0x45b   :  { %5126 = vmatpush1.bf16.msra.mxu0 %v7293_v56  ;;  %v7380_v56 = vld [vmem:[#allocation5 + $0x928] ss:$16 sps:$4 sm:$0xff]  }
 0x45c   :  { %5372 = vmatpush1.bf16.msra.mxu1 %v7296_v48  ;;  %5127 = vmatprep.subr.bf16.mxu0 %v7301_v10  ;;  %v7385_v48 = vld [vmem:[#allocation5 + $0x944] ss:$16 sps:$4 sm:$0xff]   ;;  %v7388_v10 = vld [vmem:[#allocation5 + $0x94c] ss:$16 sps:$4 sm:$0xff]  }
 0x45d   :  { %5373 = vmatprep.subr.bf16.mxu1 %v7304_v20  ;;  %v7383_v20 = vld [vmem:[#allocation5 + $0x940] ss:$16 sps:$4 sm:$0xff]  }
 0x45f   :  { %5128 = vmatpush1.bf16.msra.mxu0 %v7299_v55  ;;  %v7386_v55 = vld [vmem:[#allocation5 + $0x948] ss:$16 sps:$4 sm:$0xff]  }
 0x460   :  { %5374 = vmatpush1.bf16.msra.mxu1 %v7302_v51  ;;  %5129 = vmatprep.subr.bf16.mxu0 %v7307_v17  ;;  %v7391_v51 = vld [vmem:[#allocation5 + $0x964] ss:$16 sps:$4 sm:$0xff]   ;;  %v7394_v17 = vld [vmem:[#allocation5 + $0x96c] ss:$16 sps:$4 sm:$0xff]  }
 0x461   :  { %5375 = vmatprep.subr.bf16.mxu1 %v7310_v22  ;;  %v7389_v22 = vld [vmem:[#allocation5 + $0x960] ss:$16 sps:$4 sm:$0xff]  }
 0x463   :  { %5130 = vmatpush1.bf16.msra.mxu0 %v7305_v34  ;;  %v7392_v34 = vld [vmem:[#allocation5 + $0x968] ss:$16 sps:$4 sm:$0xff]  }
 0x464   :  { %5376 = vmatpush1.bf16.msra.mxu1 %v7308_v62  ;;  %5131 = vmatprep.subr.bf16.mxu0 %v7313_v43  ;;  %v7397_v62 = vld [vmem:[#allocation5 + $0x984] ss:$16 sps:$4 sm:$0xff]   ;;  %v7400_v43 = vld [vmem:[#allocation5 + $0x98c] ss:$16 sps:$4 sm:$0xff]  }
 0x465   :  { %5377 = vmatprep.subr.bf16.mxu1 %v7316_v5  ;;  %v7395_v5 = vld [vmem:[#allocation5 + $0x980] ss:$16 sps:$4 sm:$0xff]  }
 0x467   :  { %5132 = vmatpush1.bf16.msra.mxu0 %v7311_v0  ;;  %v7398_v0 = vld [vmem:[#allocation5 + $0x988] ss:$16 sps:$4 sm:$0xff]  }
 0x468   :  { %5378 = vmatpush1.bf16.msra.mxu1 %v7314_v6  ;;  %5133 = vmatprep.subr.bf16.mxu0 %v7319_v41  ;;  %v7403_v6 = vld [vmem:[#allocation5 + $0x9a4] ss:$16 sps:$4 sm:$0xff]   ;;  %v7406_v41 = vld [vmem:[#allocation5 + $0x9ac] ss:$16 sps:$4 sm:$0xff]  }
 0x469   :  { %5379 = vmatprep.subr.bf16.mxu1 %v7322_v36  ;;  %v7401_v36 = vld [vmem:[#allocation5 + $0x9a0] ss:$16 sps:$4 sm:$0xff]  }
 0x46b   :  { %5134 = vmatpush1.bf16.msra.mxu0 %v7317_v24  ;;  %v7404_v24 = vld [vmem:[#allocation5 + $0x9a8] ss:$16 sps:$4 sm:$0xff]  }
 0x46c   :  { %5380 = vmatpush1.bf16.msra.mxu1 %v7320_v33  ;;  %5144 = vmatprep.subr.bf16.mxu0 %v7325_v35  ;;  %v7409_v33 = vld [vmem:[#allocation5 + $0x9c4] ss:$16 sps:$4 sm:$0xff]   ;;  %v7412_v35 = vld [vmem:[#allocation5 + $0x9cc] ss:$16 sps:$4 sm:$0xff]  }
 0x46d   :  { %5390 = vmatprep.subr.bf16.mxu1 %v7328_v49  ;;  %v7407_v49 = vld [vmem:[#allocation5 + $0x9c0] ss:$16 sps:$4 sm:$0xff]  }
 0x46e   :  { %5136 = vmatmul.mubr.bf16.vlgmr.msra.gmra.mrb[4].mxu0 %v2654_v27 }
 0x46f   :  { %5382 = vmatmul.mubr.bf16.vlgmr.msra.gmra.mrb[8].mxu1 %v2654_v27  ;;  %5145 = vmatpush1.bf16.msra.mxu0 %v7323_v45  ;;  %v7410_v45 = vld [vmem:[#allocation5 + $0x9c8] ss:$16 sps:$4 sm:$0xff]   ;;  %v7415_v27 = vld [vmem:[#allocation5 + $0x9e4] ss:$16 sps:$4 sm:$0xff]  }
 0x470   :  { %5176 = vmatprep.mubr.bf16.mxu0 %v2657_v18  ;;  %5391 = vmatpush1.bf16.msra.mxu1 %v7326_v13  ;;  %v7418_v13 = vld [vmem:[#allocation5 + $0x9ec] ss:$16 sps:$4 sm:$0xff]  }
 0x471   :  { %5422 = vmatprep.mubr.bf16.mxu1 %v2657_v18  ;;  %5146 = vmatprep.subr.bf16.mxu0 %v7331_v42  ;;  %v7413_v42 = vld [vmem:[#allocation5 + $0x9e0] ss:$16 sps:$4 sm:$0xff]   ;;  %v7416_v18 = vld [vmem:[#allocation5 + $0x9e8] ss:$16 sps:$4 sm:$0xff]  }
 0x472   :  { %5392 = vmatprep.subr.bf16.mxu1 %v7334_v9  ;;  %v7421_v9 = vld [vmem:[#allocation5 + $0xa04] ss:$16 sps:$4 sm:$0xff]  }
 0x473   :  { %5147 = vmatpush1.bf16.msra.mxu0 %v7329_v15  ;;  %v7424_v15 = vld [vmem:[#allocation5 + $0xa0c] ss:$16 sps:$4 sm:$0xff]  }
 0x474   :  { %5393 = vmatpush1.bf16.msra.mxu1 %v7332_v16  ;;  %5148 = vmatprep.subr.bf16.mxu0 %v7337_v23  ;;  %v7419_v16 = vld [vmem:[#allocation5 + $0xa00] ss:$16 sps:$4 sm:$0xff]   ;;  %v2656_v23 = vpack.c.bf16 %v10718_v7, %v10718_v7  ;;  %v7436_v7 = vld [vmem:[#allocation5 + $0xa4c] ss:$16 sps:$4 sm:$0xff]  }
 0x475   :  { %5394 = vmatprep.subr.bf16.mxu1 %v7340_v32  ;;  %v7422_v32 = vld [vmem:[#allocation5 + $0xa08] ss:$16 sps:$4 sm:$0xff]  }
 0x477   :  { %5149 = vmatpush1.bf16.msra.mxu0 %v7335_v44  ;;  %v7427_v44 = vld [vmem:[#allocation5 + $0xa24] ss:$16 sps:$4 sm:$0xff]  }
 0x478   :  { %5395 = vmatpush1.bf16.msra.mxu1 %v7338_v57  ;;  %5150 = vmatprep.subr.bf16.mxu0 %v7343_v14  ;;  %v2659_v57 = vpack.c.bf16 %v10728_v40, %v10728_v40  ;;  %v7430_v14 = vld [vmem:[#allocation5 + $0xa2c] ss:$16 sps:$4 sm:$0xff]  }
 0x479   :  { %5396 = vmatprep.subr.bf16.mxu1 %v7346_v52  ;;  %v7425_v52 = vld [vmem:[#allocation5 + $0xa20] ss:$16 sps:$4 sm:$0xff]   ;;  %v7442_v40 = vld [vmem:[#allocation5 + $0xa6c] ss:$16 sps:$4 sm:$0xff]  }
 0x47b   :  { %5151 = vmatpush1.bf16.msra.mxu0 %v7341_v31  ;;  %v7428_v31 = vld [vmem:[#allocation5 + $0xa28] ss:$16 sps:$4 sm:$0xff]  }
 0x47c   :  { %5397 = vmatpush1.bf16.msra.mxu1 %v7344_v54  ;;  %5152 = vmatprep.subr.bf16.mxu0 %v7349_v4  ;;  %v7433_v54 = vld [vmem:[#allocation5 + $0xa44] ss:$16 sps:$4 sm:$0xff]   ;;  %v7431_v4 = vld [vmem:[#allocation5 + $0xa40] ss:$16 sps:$4 sm:$0xff]  }
 0x47d   :  { %5398 = vmatprep.subr.bf16.mxu1 %v7352_v11  ;;  %v7434_v11 = vld [vmem:[#allocation5 + $0xa48] ss:$16 sps:$4 sm:$0xff]  }
 0x47f   :  { %5153 = vmatpush1.bf16.msra.mxu0 %v7347_v53  ;;  %v7439_v53 = vld [vmem:[#allocation5 + $0xa64] ss:$16 sps:$4 sm:$0xff]  }
 0x480   :  { %5399 = vmatpush1.bf16.msra.mxu1 %v7350_v46  ;;  %5154 = vmatprep.subr.bf16.mxu0 %v7355_v60  ;;  %v7437_v46 = vld [vmem:[#allocation5 + $0xa60] ss:$16 sps:$4 sm:$0xff]   ;;  %v7440_v60 = vld [vmem:[#allocation5 + $0xa68] ss:$16 sps:$4 sm:$0xff]  }
 0x481   :  { %5400 = vmatprep.subr.bf16.mxu1 %v7358_v3  ;;  %v7445_v3 = vld [vmem:[#allocation5 + $0xa84] ss:$16 sps:$4 sm:$0xff]  }
 0x483   :  { %5155 = vmatpush1.bf16.msra.mxu0 %v7353_v28  ;;  %v7448_v28 = vld [vmem:[#allocation5 + $0xa8c] ss:$16 sps:$4 sm:$0xff]  }
 0x484   :  { %5401 = vmatpush1.bf16.msra.mxu1 %v7356_v47  ;;  %5156 = vmatprep.subr.bf16.mxu0 %v7361_v25  ;;  %v7443_v47 = vld [vmem:[#allocation5 + $0xa80] ss:$16 sps:$4 sm:$0xff]   ;;  %v7446_v25 = vld [vmem:[#allocation5 + $0xa88] ss:$16 sps:$4 sm:$0xff]  }
 0x485   :  { %5402 = vmatprep.subr.bf16.mxu1 %v7364_v8  ;;  %v7451_v8 = vld [vmem:[#allocation5 + $0xaa4] ss:$16 sps:$4 sm:$0xff]  }
 0x487   :  { %5157 = vmatpush1.bf16.msra.mxu0 %v7359_v37  ;;  %v7454_v37 = vld [vmem:[#allocation5 + $0xaac] ss:$16 sps:$4 sm:$0xff]  }
 0x488   :  { %5403 = vmatpush1.bf16.msra.mxu1 %v7362_v63  ;;  %5158 = vmatprep.subr.bf16.mxu0 %v7367_v39  ;;  %v7449_v63 = vld [vmem:[#allocation5 + $0xaa0] ss:$16 sps:$4 sm:$0xff]   ;;  %v7452_v39 = vld [vmem:[#allocation5 + $0xaa8] ss:$16 sps:$4 sm:$0xff]  }
 0x489   :  { %5404 = vmatprep.subr.bf16.mxu1 %v7370_v61  ;;  %v7457_v61 = vld [vmem:[#allocation5 + $0xac4] ss:$16 sps:$4 sm:$0xff]  }
 0x48b   :  { %5159 = vmatpush1.bf16.msra.mxu0 %v7365_v29  ;;  %v7460_v29 = vld [vmem:[#allocation5 + $0xacc] ss:$16 sps:$4 sm:$0xff]  }
 0x48c   :  { %5405 = vmatpush1.bf16.msra.mxu1 %v7368_v2  ;;  %5160 = vmatprep.subr.bf16.mxu0 %v7373_v12  ;;  %v7455_v2 = vld [vmem:[#allocation5 + $0xac0] ss:$16 sps:$4 sm:$0xff]   ;;  %v7458_v12 = vld [vmem:[#allocation5 + $0xac8] ss:$16 sps:$4 sm:$0xff]  }
 0x48d   :  { %5406 = vmatprep.subr.bf16.mxu1 %v7376_v21  ;;  %v7463_v21 = vld [vmem:[#allocation5 + $0xae4] ss:$16 sps:$4 sm:$0xff]  }
 0x48f   :  { %5161 = vmatpush1.bf16.msra.mxu0 %v7371_v26  ;;  %v7466_v26 = vld [vmem:[#allocation5 + $0xaec] ss:$16 sps:$4 sm:$0xff]  }
 0x490   :  { %5407 = vmatpush1.bf16.msra.mxu1 %v7374_v30  ;;  %5162 = vmatprep.subr.bf16.mxu0 %v7379_v1  ;;  %v7461_v30 = vld [vmem:[#allocation5 + $0xae0] ss:$16 sps:$4 sm:$0xff]   ;;  %v7464_v1 = vld [vmem:[#allocation5 + $0xae8] ss:$16 sps:$4 sm:$0xff]  }
 0x491   :  { %5408 = vmatprep.subr.bf16.mxu1 %v7382_v19  ;;  %v7469_v19 = vld [vmem:[#allocation5 + $0xb04] ss:$16 sps:$4 sm:$0xff]  }
 0x493   :  { %5163 = vmatpush1.bf16.msra.mxu0 %v7377_v59  ;;  %v7472_v59 = vld [vmem:[#allocation5 + $0xb0c] ss:$16 sps:$4 sm:$0xff]  }
 0x494   :  { %5409 = vmatpush1.bf16.msra.mxu1 %v7380_v56  ;;  %5164 = vmatprep.subr.bf16.mxu0 %v7385_v48  ;;  %v7467_v56 = vld [vmem:[#allocation5 + $0xb00] ss:$16 sps:$4 sm:$0xff]   ;;  %v7470_v48 = vld [vmem:[#allocation5 + $0xb08] ss:$16 sps:$4 sm:$0xff]  }
 0x495   :  { %5410 = vmatprep.subr.bf16.mxu1 %v7388_v10  ;;  %v7475_v10 = vld [vmem:[#allocation5 + $0xb24] ss:$16 sps:$4 sm:$0xff]  }
 0x497   :  { %5165 = vmatpush1.bf16.msra.mxu0 %v7383_v20  ;;  %v7478_v20 = vld [vmem:[#allocation5 + $0xb2c] ss:$16 sps:$4 sm:$0xff]  }
 0x498   :  { %5411 = vmatpush1.bf16.msra.mxu1 %v7386_v55  ;;  %5166 = vmatprep.subr.bf16.mxu0 %v7391_v51  ;;  %v7473_v55 = vld [vmem:[#allocation5 + $0xb20] ss:$16 sps:$4 sm:$0xff]   ;;  %v7476_v51 = vld [vmem:[#allocation5 + $0xb28] ss:$16 sps:$4 sm:$0xff]  }
 0x499   :  { %5412 = vmatprep.subr.bf16.mxu1 %v7394_v17  ;;  %v7481_v17 = vld [vmem:[#allocation5 + $0xb44] ss:$16 sps:$4 sm:$0xff]  }
 0x49b   :  { %5167 = vmatpush1.bf16.msra.mxu0 %v7389_v22  ;;  %v7484_v22 = vld [vmem:[#allocation5 + $0xb4c] ss:$16 sps:$4 sm:$0xff]  }
 0x49c   :  { %5413 = vmatpush1.bf16.msra.mxu1 %v7392_v34  ;;  %5168 = vmatprep.subr.bf16.mxu0 %v7397_v62  ;;  %v7479_v34 = vld [vmem:[#allocation5 + $0xb40] ss:$16 sps:$4 sm:$0xff]   ;;  %v7482_v62 = vld [vmem:[#allocation5 + $0xb48] ss:$16 sps:$4 sm:$0xff]  }
 0x49d   :  { %5414 = vmatprep.subr.bf16.mxu1 %v7400_v43  ;;  %v7487_v43 = vld [vmem:[#allocation5 + $0xb64] ss:$16 sps:$4 sm:$0xff]  }
 0x49f   :  { %5169 = vmatpush1.bf16.msra.mxu0 %v7395_v5  ;;  %v7490_v5 = vld [vmem:[#allocation5 + $0xb6c] ss:$16 sps:$4 sm:$0xff]  }
 0x4a0   :  { %5415 = vmatpush1.bf16.msra.mxu1 %v7398_v0  ;;  %5170 = vmatprep.subr.bf16.mxu0 %v7403_v6  ;;  %v7485_v0 = vld [vmem:[#allocation5 + $0xb60] ss:$16 sps:$4 sm:$0xff]   ;;  %v7488_v6 = vld [vmem:[#allocation5 + $0xb68] ss:$16 sps:$4 sm:$0xff]  }
 0x4a1   :  { %5416 = vmatprep.subr.bf16.mxu1 %v7406_v41  ;;  %v7493_v41 = vld [vmem:[#allocation5 + $0xb84] ss:$16 sps:$4 sm:$0xff]  }
 0x4a3   :  { %5171 = vmatpush1.bf16.msra.mxu0 %v7401_v36  ;;  %v7496_v36 = vld [vmem:[#allocation5 + $0xb8c] ss:$16 sps:$4 sm:$0xff]  }
 0x4a4   :  { %5417 = vmatpush1.bf16.msra.mxu1 %v7404_v24  ;;  %5172 = vmatprep.subr.bf16.mxu0 %v7409_v33  ;;  %v7491_v24 = vld [vmem:[#allocation5 + $0xb80] ss:$16 sps:$4 sm:$0xff]   ;;  %v7494_v33 = vld [vmem:[#allocation5 + $0xb88] ss:$16 sps:$4 sm:$0xff]  }
 0x4a5   :  { %5418 = vmatprep.subr.bf16.mxu1 %v7412_v35  ;;  %v7499_v35 = vld [vmem:[#allocation5 + $0xba4] ss:$16 sps:$4 sm:$0xff]  }
 0x4a7   :  { %5173 = vmatpush1.bf16.msra.mxu0 %v7407_v49  ;;  %v7502_v49 = vld [vmem:[#allocation5 + $0xbac] ss:$16 sps:$4 sm:$0xff]  }
 0x4a8   :  { %5419 = vmatpush1.bf16.msra.mxu1 %v7410_v45  ;;  %5174 = vmatprep.subr.bf16.mxu0 %v7415_v27  ;;  %v7497_v45 = vld [vmem:[#allocation5 + $0xba0] ss:$16 sps:$4 sm:$0xff]   ;;  %v7500_v27 = vld [vmem:[#allocation5 + $0xba8] ss:$16 sps:$4 sm:$0xff]  }
 0x4a9   :  { %5420 = vmatprep.subr.bf16.mxu1 %v7418_v13  ;;  %v7505_v13 = vld [vmem:[#allocation5 + $0xbc4] ss:$16 sps:$4 sm:$0xff]  }
 0x4ab   :  { %5175 = vmatpush1.bf16.msra.mxu0 %v7413_v42  ;;  %v7508_v42 = vld [vmem:[#allocation5 + $0xbcc] ss:$16 sps:$4 sm:$0xff]  }
 0x4ac   :  { %5421 = vmatpush1.bf16.msra.mxu1 %v7416_v18  ;;  %5185 = vmatprep.subr.bf16.mxu0 %v7421_v9  ;;  %v7503_v18 = vld [vmem:[#allocation5 + $0xbc0] ss:$16 sps:$4 sm:$0xff]   ;;  %v7506_v9 = vld [vmem:[#allocation5 + $0xbc8] ss:$16 sps:$4 sm:$0xff]  }
 0x4ad   :  { %5431 = vmatprep.subr.bf16.mxu1 %v7424_v15  ;;  %v7511_v15 = vld [vmem:[#allocation5 + $0xbe4] ss:$16 sps:$4 sm:$0xff]  }
 0x4ae   :  { %5177 = vmatmul.mubr.bf16.vlgmr.msra.gmra.mrb[4].mxu0 %v2656_v23 }
 0x4af   :  { %5423 = vmatmul.mubr.bf16.vlgmr.msra.gmra.mrb[8].mxu1 %v2656_v23  ;;  %5186 = vmatpush1.bf16.msra.mxu0 %v7419_v16  ;;  %v7514_v16 = vld [vmem:[#allocation5 + $0xbec] ss:$16 sps:$4 sm:$0xff]   ;;  %v7509_v23 = vld [vmem:[#allocation5 + $0xbe0] ss:$16 sps:$4 sm:$0xff]  }
 0x4b0   :  { %5217 = vmatprep.mubr.bf16.mxu0 %v2659_v57  ;;  %5432 = vmatpush1.bf16.msra.mxu1 %v7422_v32  ;;  %v7512_v32 = vld [vmem:[#allocation5 + $0xbe8] ss:$16 sps:$4 sm:$0xff]  }
 0x4b1   :  { %5463 = vmatprep.mubr.bf16.mxu1 %v2659_v57  ;;  %5187 = vmatprep.subr.bf16.mxu0 %v7427_v44  ;;  %v7517_v44 = vld [vmem:[#allocation7 + $0x204] ss:$8 sps:$4 sm:$0xff]  }
 0x4b2   :  { %5433 = vmatprep.subr.bf16.mxu1 %v7430_v14  ;;  %v7523_v57 = vld [vmem:[#allocation7 + $0x4] ss:$8 sps:$4 sm:$0xff]   ;;  %v7515_v14 = vld [vmem:[#allocation7 + $0x200] ss:$8 sps:$4 sm:$0xff]  }
 0x4b3   :  { %5188 = vmatpush1.bf16.msra.mxu0 %v7425_v52  ;;  %v2658_v52 = vpack.c.bf16 %v10726_v50, %v10726_v50  ;;  %v7526_v50 = vld [vmem:[#allocation7 + $0x104] ss:$8 sps:$4 sm:$0xff]  }
 0x4b4   :  { %5434 = vmatpush1.bf16.msra.mxu1 %v7428_v31  ;;  %5189 = vmatprep.subr.bf16.mxu0 %v7433_v54  ;;  %v7518_v31 = vld [vmem:[#allocation7 + $0x214] ss:$8 sps:$4 sm:$0x3f]   ;;  %v7520_v54 = vld [vmem:[#allocation7 + $0x210] ss:$8 sps:$4 sm:$0x3f]  }
 0x4b5   :  { %5435 = vmatprep.subr.bf16.mxu1 %v7436_v7  ;;  %v7521_v7 = vld [vmem:[#allocation7] ss:$8 sps:$4 sm:$0xff]  }
 0x4b7   :  { %5190 = vmatpush1.bf16.msra.mxu0 %v7431_v4  ;;  %v7529_v4 = vld [vmem:[#allocation7 + $0x14] ss:$8 sps:$4 sm:$0xff]  }
 0x4b8   :  { %5436 = vmatpush1.bf16.msra.mxu1 %v7434_v11  ;;  %5191 = vmatprep.subr.bf16.mxu0 %v7439_v53  ;;  %v5476_v11 = vld [vmem:[%s10784_s1] sm:$0x3]  ;;  %v5574_v53 = vsel %vm5572_vm10, %v7520_v54, 0  ;;  %s7799_s1 = smov [#allocation11]  }
 0x4b9   :  { %5437 = vmatprep.subr.bf16.mxu1 %v7442_v40  ;;  %v7797_v40 = vmov 0   ;;  %v7608_v54 = vld [vmem:[#allocation7 + $0x1e0] ss:$8 sps:$4 sm:$0xff]   ;;  %s6333_s4 = sshll.u32 %s7799_s1, 4  ;;  %s6334_s4 = int_to_ptr.vmem [resolvable:$true] %s6333_s4 }
 0x4ba   :  { %s7755_s24 = scalar_lea.vmem %s6334_s4, 32  ;;  %p7760_p13 = scmp.lt.s32.totalorder %s6334_s4, %s6334_s4 }
 0x4bb   :  { %5192 = vmatpush1.bf16.msra.mxu0 %v7437_v46  ;;  %v7527_v46 = vld [vmem:[#allocation7 + $0x10] ss:$8 sps:$4 sm:$0xff]   ;;  %p7756_p12 = scmp.ne.s32.totalorder %s6334_s4, %s7755_s24  ;;  %p7761_p0 = scmp.lt.s32.totalorder %s7755_s24, %s7755_s24 }
 0x4bc   :  { %5438 = vmatpush1.bf16.msra.mxu1 %v7440_v60  ;;  %5193 = vmatprep.subr.bf16.mxu0 %v7445_v3  ;;  %v5477_v60 = vpack.c.bf16 %v5476_v11, %v5476_v11  ;;  %v7535_v3 = vld [vmem:[#allocation7 + $0x24] ss:$8 sps:$4 sm:$0xff]   ;;  %v7616_v11 = vld [vmem:[#allocation7 + $0x1f4] ss:$8 sps:$4 sm:$0xff]  }
 0x4bd   :  { %5439 = vmatprep.subr.bf16.mxu1 %v7448_v28  ;;  %v7524_v28 = vld [vmem:[#allocation7 + $0x100] ss:$8 sps:$4 sm:$0xff]   ;;  %p7762_p1 = por %p7761_p0, %p7760_p13 }
 0x4bf   :  { %5194 = vmatpush1.bf16.msra.mxu0 %v7443_v47  ;;  %v7532_v47 = vld [vmem:[#allocation7 + $0x114] ss:$8 sps:$4 sm:$0xff]   ;;  %p7763_p2 = pnand %p7762_p1, %p7756_p12 }
 0x4c0   :  { %5440 = vmatpush1.bf16.msra.mxu1 %v7446_v25  ;;  %5195 = vmatprep.subr.bf16.mxu0 %v7451_v8  ;;  %v7533_v25 = vld [vmem:[#allocation7 + $0x20] ss:$8 sps:$4 sm:$0xff]   ;;  %v7541_v8 = vld [vmem:[#allocation7 + $0x34] ss:$8 sps:$4 sm:$0xff]  }
 0x4c1   :  { %5441 = vmatprep.subr.bf16.mxu1 %v7454_v37  ;;  %v7530_v37 = vld [vmem:[#allocation7 + $0x110] ss:$8 sps:$4 sm:$0xff]  }
 0x4c3   :  { %5196 = vmatpush1.bf16.msra.mxu0 %v7449_v63  ;;  %v7538_v63 = vld [vmem:[#allocation7 + $0x124] ss:$8 sps:$4 sm:$0xff]  }
 0x4c4   :  { %5442 = vmatpush1.bf16.msra.mxu1 %v7452_v39  ;;  %5197 = vmatprep.subr.bf16.mxu0 %v7457_v61  ;;  %v7539_v39 = vld [vmem:[#allocation7 + $0x30] ss:$8 sps:$4 sm:$0xff]   ;;  %v7547_v61 = vld [vmem:[#allocation7 + $0x44] ss:$8 sps:$4 sm:$0xff]  }
 0x4c5   :  { %5443 = vmatprep.subr.bf16.mxu1 %v7460_v29  ;;  %v7536_v29 = vld [vmem:[#allocation7 + $0x120] ss:$8 sps:$4 sm:$0xff]  }
 0x4c7   :  { %5198 = vmatpush1.bf16.msra.mxu0 %v7455_v2  ;;  %v7544_v2 = vld [vmem:[#allocation7 + $0x134] ss:$8 sps:$4 sm:$0xff]  }
 0x4c8   :  { %5444 = vmatpush1.bf16.msra.mxu1 %v7458_v12  ;;  %5199 = vmatprep.subr.bf16.mxu0 %v7463_v21  ;;  %v7545_v12 = vld [vmem:[#allocation7 + $0x40] ss:$8 sps:$4 sm:$0xff]   ;;  %v7553_v21 = vld [vmem:[#allocation7 + $0x54] ss:$8 sps:$4 sm:$0xff]  }
 0x4c9   :  { %5445 = vmatprep.subr.bf16.mxu1 %v7466_v26  ;;  %v7542_v26 = vld [vmem:[#allocation7 + $0x130] ss:$8 sps:$4 sm:$0xff]  }
 0x4cb   :  { %5200 = vmatpush1.bf16.msra.mxu0 %v7461_v30  ;;  %v7550_v30 = vld [vmem:[#allocation7 + $0x144] ss:$8 sps:$4 sm:$0xff]  }
 0x4cc   :  { %5446 = vmatpush1.bf16.msra.mxu1 %v7464_v1  ;;  %5201 = vmatprep.subr.bf16.mxu0 %v7469_v19  ;;  %v7551_v1 = vld [vmem:[#allocation7 + $0x50] ss:$8 sps:$4 sm:$0xff]   ;;  %v7559_v19 = vld [vmem:[#allocation7 + $0x64] ss:$8 sps:$4 sm:$0xff]  }
 0x4cd   :  { %5447 = vmatprep.subr.bf16.mxu1 %v7472_v59  ;;  %v7548_v59 = vld [vmem:[#allocation7 + $0x140] ss:$8 sps:$4 sm:$0xff]  }
 0x4cf   :  { %5202 = vmatpush1.bf16.msra.mxu0 %v7467_v56  ;;  %v7556_v56 = vld [vmem:[#allocation7 + $0x154] ss:$8 sps:$4 sm:$0xff]  }
 0x4d0   :  { %5448 = vmatpush1.bf16.msra.mxu1 %v7470_v48  ;;  %5203 = vmatprep.subr.bf16.mxu0 %v7475_v10  ;;  %v7557_v48 = vld [vmem:[#allocation7 + $0x60] ss:$8 sps:$4 sm:$0xff]   ;;  %v7565_v10 = vld [vmem:[#allocation7 + $0x74] ss:$8 sps:$4 sm:$0xff]  }
 0x4d1   :  { %5449 = vmatprep.subr.bf16.mxu1 %v7478_v20  ;;  %v7554_v20 = vld [vmem:[#allocation7 + $0x150] ss:$8 sps:$4 sm:$0xff]  }
 0x4d3   :  { %5204 = vmatpush1.bf16.msra.mxu0 %v7473_v55  ;;  %v7562_v55 = vld [vmem:[#allocation7 + $0x164] ss:$8 sps:$4 sm:$0xff]  }
 0x4d4   :  { %5450 = vmatpush1.bf16.msra.mxu1 %v7476_v51  ;;  %5205 = vmatprep.subr.bf16.mxu0 %v7481_v17  ;;  %v7563_v51 = vld [vmem:[#allocation7 + $0x70] ss:$8 sps:$4 sm:$0xff]   ;;  %v7571_v17 = vld [vmem:[#allocation7 + $0x84] ss:$8 sps:$4 sm:$0xff]  }
 0x4d5   :  { %5451 = vmatprep.subr.bf16.mxu1 %v7484_v22  ;;  %v7560_v22 = vld [vmem:[#allocation7 + $0x160] ss:$8 sps:$4 sm:$0xff]  }
 0x4d7   :  { %5206 = vmatpush1.bf16.msra.mxu0 %v7479_v34  ;;  %v7568_v34 = vld [vmem:[#allocation7 + $0x174] ss:$8 sps:$4 sm:$0xff]  }
 0x4d8   :  { %5452 = vmatpush1.bf16.msra.mxu1 %v7482_v62  ;;  %5207 = vmatprep.subr.bf16.mxu0 %v7487_v43  ;;  %v7569_v62 = vld [vmem:[#allocation7 + $0x80] ss:$8 sps:$4 sm:$0xff]   ;;  %v7577_v43 = vld [vmem:[#allocation7 + $0x94] ss:$8 sps:$4 sm:$0xff]  }
 0x4d9   :  { %5453 = vmatprep.subr.bf16.mxu1 %v7490_v5  ;;  %v7566_v5 = vld [vmem:[#allocation7 + $0x170] ss:$8 sps:$4 sm:$0xff]  }
 0x4db   :  { %5208 = vmatpush1.bf16.msra.mxu0 %v7485_v0  ;;  %v7574_v0 = vld [vmem:[#allocation7 + $0x184] ss:$8 sps:$4 sm:$0xff]  }
 0x4dc   :  { %5454 = vmatpush1.bf16.msra.mxu1 %v7488_v6  ;;  %5209 = vmatprep.subr.bf16.mxu0 %v7493_v41  ;;  %v7575_v6 = vld [vmem:[#allocation7 + $0x90] ss:$8 sps:$4 sm:$0xff]   ;;  %v7583_v41 = vld [vmem:[#allocation7 + $0xa4] ss:$8 sps:$4 sm:$0xff]  }
 0x4dd   :  { %5455 = vmatprep.subr.bf16.mxu1 %v7496_v36  ;;  %v7572_v36 = vld [vmem:[#allocation7 + $0x180] ss:$8 sps:$4 sm:$0xff]  }
 0x4df   :  { %5210 = vmatpush1.bf16.msra.mxu0 %v7491_v24  ;;  %v7580_v24 = vld [vmem:[#allocation7 + $0x194] ss:$8 sps:$4 sm:$0xff]  }
 0x4e0   :  { %5456 = vmatpush1.bf16.msra.mxu1 %v7494_v33  ;;  %5211 = vmatprep.subr.bf16.mxu0 %v7499_v35  ;;  %v7581_v33 = vld [vmem:[#allocation7 + $0xa0] ss:$8 sps:$4 sm:$0xff]   ;;  %v7589_v35 = vld [vmem:[#allocation7 + $0xb4] ss:$8 sps:$4 sm:$0xff]  }
 0x4e1   :  { %5457 = vmatprep.subr.bf16.mxu1 %v7502_v49  ;;  %v7578_v49 = vld [vmem:[#allocation7 + $0x190] ss:$8 sps:$4 sm:$0xff]  }
 0x4e3   :  { %5212 = vmatpush1.bf16.msra.mxu0 %v7497_v45  ;;  %v7586_v45 = vld [vmem:[#allocation7 + $0x1a4] ss:$8 sps:$4 sm:$0xff]  }
 0x4e4   :  { %5458 = vmatpush1.bf16.msra.mxu1 %v7500_v27  ;;  %5213 = vmatprep.subr.bf16.mxu0 %v7505_v13  ;;  %v7587_v27 = vld [vmem:[#allocation7 + $0xb0] ss:$8 sps:$4 sm:$0xff]   ;;  %v7595_v13 = vld [vmem:[#allocation7 + $0xc4] ss:$8 sps:$4 sm:$0xff]  }
 0x4e5   :  { %5459 = vmatprep.subr.bf16.mxu1 %v7508_v42  ;;  %v7584_v42 = vld [vmem:[#allocation7 + $0x1a0] ss:$8 sps:$4 sm:$0xff]  }
 0x4e7   :  { %5214 = vmatpush1.bf16.msra.mxu0 %v7503_v18  ;;  %v7592_v18 = vld [vmem:[#allocation7 + $0x1b4] ss:$8 sps:$4 sm:$0xff]  }
 0x4e8   :  { %5460 = vmatpush1.bf16.msra.mxu1 %v7506_v9  ;;  %5215 = vmatprep.subr.bf16.mxu0 %v7511_v15  ;;  %v7593_v9 = vld [vmem:[#allocation7 + $0xc0] ss:$8 sps:$4 sm:$0xff]   ;;  %v7601_v15 = vld [vmem:[#allocation7 + $0xd4] ss:$8 sps:$4 sm:$0xff]  }
 0x4e9   :  { %5461 = vmatprep.subr.bf16.mxu1 %v7514_v16  ;;  %v7590_v16 = vld [vmem:[#allocation7 + $0x1b0] ss:$8 sps:$4 sm:$0xff]  }
 0x4eb   :  { %5216 = vmatpush1.bf16.msra.mxu0 %v7509_v23  ;;  %v7598_v23 = vld [vmem:[#allocation7 + $0x1c4] ss:$8 sps:$4 sm:$0xff]  }
 0x4ec   :  { %5462 = vmatpush1.bf16.msra.mxu1 %v7512_v32  ;;  %5579 = vmatprep.subr.bf16.mxu0 %v7517_v44  ;;  %v7599_v32 = vld [vmem:[#allocation7 + $0xd0] ss:$8 sps:$4 sm:$0xff]   ;;  %v7596_v44 = vld [vmem:[#allocation7 + $0x1c0] ss:$8 sps:$4 sm:$0xff]  }
 0x4ed   :  { %5940 = vmatprep.subr.bf16.mxu1 %v7523_v57  ;;  %v7604_v57 = vld [vmem:[#allocation7 + $0x1d4] ss:$8 sps:$4 sm:$0xff]  }
 0x4ee   :  { %5218 = vmatmul.mubr.bf16.vlgmr.msra.gmra.mrb[4].mxu0 %v2658_v52 }
 0x4ef   :  { %5464 = vmatmul.mubr.bf16.vlgmr.msra.gmra.mrb[8].mxu1 %v2658_v52  ;;  %5580 = vmatpush1.bf16.msra.mxu0 %v7515_v14  ;;  %v7602_v14 = vld [vmem:[#allocation7 + $0x1d0] ss:$8 sps:$4 sm:$0xff]   ;;  %v7607_v52 = vld [vmem:[#allocation7 + $0xe4] ss:$8 sps:$4 sm:$0xff]  }
 0x4f0   :  { %6738 = vmatprep.subr.msk.bf16.mxu0 %vm5572_vm10, %v7518_v31  ;;  %5611 = vmatprep.mubr.bf16.mxu0 %v7797_v40  ;;  %v7605_v31 = vld [vmem:[#allocation7 + $0xe0] ss:$8 sps:$4 sm:$0xff]   ;;  %v7614_v40 = vld [vmem:[#allocation7 + $0x1f0] ss:$8 sps:$4 sm:$0xff]  }
 0x4f1   :  { %5941 = vmatpush1.bf16.msra.mxu1 %v7521_v7  ;;  %v7610_v7 = vld [vmem:[#allocation7 + $0x1e4] ss:$8 sps:$4 sm:$0xff]  }
 0x4f2   :  { %5942 = vmatprep.subr.bf16.mxu1 %v7529_v4  ;;  %v7613_v4 = vld [vmem:[#allocation7 + $0xf4] ss:$8 sps:$4 sm:$0xff]  }
 0x4f3   :  { %5582 = vmatpush1.bf16.msra.mxu0 %v5574_v53  ;;  %v7611_v53 = vld [vmem:[#allocation7 + $0xf0] ss:$8 sps:$4 sm:$0xff]  }
 0x4f4   :  { %5981 = vmatprep.subr.bf16.mxu0 %v7526_v50  ;;  %v7617_v50 = vld [vmem:[#allocation8 + $0x40] sm:$0xff]  }
 0x4f5   :  { %5943 = vmatpush1.bf16.msra.mxu1 %v7527_v46  ;;  %v10753_v46 = vsub.s32 0, %v10694_v38 }
 0x4f6   :  { %6739 = vmatmul.mubr.msk.bf16.vlgmr.msra.gmra.mrb[8].mxu0 %vm5568_vm11, %v5477_v60  ;;  %5944 = vmatprep.subr.bf16.mxu1 %v7535_v3  ;;  %v103_v60 = vld [vmem:[#allocation10 + $0x60] sm:$0xff]  ;;  %v105_v3 = vld [vmem:[#allocation10 + $0x70] sm:$0xff] }
 0x4f7   :  { %5982 = vmatpush1.bf16.msra.mxu0 %v7524_v28  ;;  %v104_v28 = vld [vmem:[#allocation10 + $0x68] sm:$0xff] }
 0x4f8   :  { %5983 = vmatprep.subr.bf16.mxu0 %v7532_v47  ;;  %v106_v47 = vld [vmem:[#allocation10 + $0x78] sm:$0xff] }
 0x4f9   :  { %5945 = vmatpush1.bf16.msra.mxu1 %v7533_v25  ;;  %v3047_v25 = vrot.slane %v103_v60, %v10753_v46 }
 0x4fa   :  { %5946 = vmatprep.subr.bf16.mxu1 %v7541_v8  ;;  %v3055_v8 = vrot.slane %v105_v3, %v10753_v46 }
 0x4fb   :  { %5984 = vmatpush1.bf16.msra.mxu0 %v7530_v37  ;;  %v3051_v37 = vrot.slane %v104_v28, %v10753_v46 }
 0x4fc   :  { %5985 = vmatprep.subr.bf16.mxu0 %v7538_v63  ;;  %v3059_v63 = vrot.slane %v106_v47, %v10753_v46 }
 0x4fd   :  { %5947 = vmatpush1.bf16.msra.mxu1 %v7539_v39 }
 0x4fe   :  { %5948 = vmatprep.subr.bf16.mxu1 %v7547_v61 }
 0x4ff   :  { %5986 = vmatpush1.bf16.msra.mxu0 %v7536_v29 }
 0x500   :  { %5987 = vmatprep.subr.bf16.mxu0 %v7544_v2 }
 0x501   :  { %5949 = vmatpush1.bf16.msra.mxu1 %v7545_v12 }
 0x502   :  { %5950 = vmatprep.subr.bf16.mxu1 %v7553_v21 }
 0x503   :  { %5988 = vmatpush1.bf16.msra.mxu0 %v7542_v26 }
 0x504   :  { %5989 = vmatprep.subr.bf16.mxu0 %v7550_v30 }
 0x505   :  { %5951 = vmatpush1.bf16.msra.mxu1 %v7551_v1 }
 0x506   :  { %5952 = vmatprep.subr.bf16.mxu1 %v7559_v19 }
 0x507   :  { %5990 = vmatpush1.bf16.msra.mxu0 %v7548_v59 }
 0x508   :  { %5991 = vmatprep.subr.bf16.mxu0 %v7556_v56 }
 0x509   :  { %5953 = vmatpush1.bf16.msra.mxu1 %v7557_v48 }
 0x50a   :  { %5954 = vmatprep.subr.bf16.mxu1 %v7565_v10 }
 0x50b   :  { %5992 = vmatpush1.bf16.msra.mxu0 %v7554_v20 }
 0x50c   :  { %5993 = vmatprep.subr.bf16.mxu0 %v7562_v55 }
 0x50d   :  { %5955 = vmatpush1.bf16.msra.mxu1 %v7563_v51  ;;  %v7618_v51 = vld [vmem:[#allocation8] sm:$0xff]  }
 0x50e   :  { %5956 = vmatprep.subr.bf16.mxu1 %v7571_v17 }
 0x50f   :  { %5994 = vmatpush1.bf16.msra.mxu0 %v7560_v22 }
 0x510   :  { %5995 = vmatprep.subr.bf16.mxu0 %v7568_v34  ;;  %v7619_v34 = vld [vmem:[#allocation8 + $0x48] sm:$0xff]  }
 0x511   :  { %5957 = vmatpush1.bf16.msra.mxu1 %v7569_v62 }
 0x512   :  { %5958 = vmatprep.subr.bf16.mxu1 %v7577_v43 }
 0x513   :  { %5996 = vmatpush1.bf16.msra.mxu0 %v7566_v5 }
 0x514   :  { %5997 = vmatprep.subr.bf16.mxu0 %v7574_v0 }
 0x515   :  { %5959 = vmatpush1.bf16.msra.mxu1 %v7575_v6  ;;  %v7620_v6 = vld [vmem:[#allocation8 + $0x8] sm:$0xff]  }
 0x516   :  { %5960 = vmatprep.subr.bf16.mxu1 %v7583_v41 }
 0x517   :  { %5998 = vmatpush1.bf16.msra.mxu0 %v7572_v36  ;;  %v7621_v36 = vld [vmem:[#allocation8 + $0x50] sm:$0xff]  }
 0x518   :  { %5999 = vmatprep.subr.bf16.mxu0 %v7580_v24  ;;  %v7622_v24 = vld [vmem:[#allocation8 + $0x10] sm:$0xff]  }
 0x519   :  { %5961 = vmatpush1.bf16.msra.mxu1 %v7581_v33  ;;  %v7623_v33 = vld [vmem:[#allocation8 + $0x58] sm:$0xff]  }
 0x51a   :  { %5962 = vmatprep.subr.bf16.mxu1 %v7589_v35  ;;  %v7624_v35 = vld [vmem:[#allocation8 + $0x18] sm:$0xff]  }
 0x51b   :  { %6000 = vmatpush1.bf16.msra.mxu0 %v7578_v49  ;;  %v7625_v49 = vld [vmem:[#allocation8 + $0x60] sm:$0xff]  }
 0x51c   :  { %6001 = vmatprep.subr.bf16.mxu0 %v7586_v45  ;;  %v7626_v45 = vld [vmem:[#allocation8 + $0x20] sm:$0xff]  }
 0x51d   :  { %5963 = vmatpush1.bf16.msra.mxu1 %v7587_v27  ;;  %v7627_v27 = vld [vmem:[#allocation8 + $0x68] sm:$0xff]  }
 0x51e   :  { %5964 = vmatprep.subr.bf16.mxu1 %v7595_v13  ;;  %v7628_v13 = vld [vmem:[#allocation8 + $0x28] sm:$0xff]  }
 0x51f   :  { %6002 = vmatpush1.bf16.msra.mxu0 %v7584_v42  ;;  %v7629_v42 = vld [vmem:[#allocation8 + $0x70] sm:$0xff]  }
 0x520   :  { %6003 = vmatprep.subr.bf16.mxu0 %v7592_v18  ;;  %v7630_v18 = vld [vmem:[#allocation8 + $0x30] sm:$0xff]  }
 0x521   :  { %5965 = vmatpush1.bf16.msra.mxu1 %v7593_v9  ;;  %v7631_v9 = vld [vmem:[#allocation8 + $0x78] sm:$0xff]  }
 0x522   :  { %5966 = vmatprep.subr.bf16.mxu1 %v7601_v15  ;;  %v7632_v15 = vld [vmem:[#allocation8 + $0x38] sm:$0xff]  }
 0x523   :  { %6004 = vmatpush1.bf16.msra.mxu0 %v7590_v16  ;;  %v7633_v16 = vld [vmem:[#allocation8 + $0x80] sm:$0xff]  }
 0x524   :  { %6005 = vmatprep.subr.bf16.mxu0 %v7598_v23  ;;  %v7634_v23 = vld [vmem:[#allocation8 + $0x88] sm:$0xff]  }
 0x525   :  { %5967 = vmatpush1.bf16.msra.mxu1 %v7599_v32  ;;  %v7635_v32 = vld [vmem:[#allocation8 + $0x90] sm:$0xff]  }
 0x526   :  { %5968 = vmatprep.subr.bf16.mxu1 %v7607_v52  ;;  %v107_v52 = vld [vmem:[#allocation10 + $0x80] sm:$0xff] }
 0x527   :  { %6006 = vmatpush1.bf16.msra.mxu0 %v7596_v44  ;;  %v7636_v44 = vld [vmem:[#allocation8 + $0x98] sm:$0xff]  }
 0x528   :  { %6007 = vmatprep.subr.bf16.mxu0 %v7604_v57  ;;  %v7637_v57 = vld [vmem:[#allocation8 + $0xa0] sm:$0xff]  }
 0x529   :  { %5969 = vmatpush1.bf16.msra.mxu1 %v7605_v31  ;;  %v108_v31 = vld [vmem:[#allocation10 + $0x88] sm:$0xff] }
 0x52a   :  { %5970 = vmatprep.subr.bf16.mxu1 %v7613_v4  ;;  %v6029_v60 = vrot.slane %v108_v31, %v10753_v46 }
 0x52b   :  { %6008 = vmatpush1.bf16.msra.mxu0 %v7602_v14  ;;  %v7638_v14 = vld [vmem:[#allocation8 + $0xa8] sm:$0xff]  }
 0x52c   :  { %6009 = vmatprep.subr.bf16.mxu0 %v7610_v7 }
 0x52d   :  { %5971 = vmatpush1.bf16.msra.mxu1 %v7611_v53 }
 0x52e   :  { %6829 = vmatprep.subr.bf16.mxu1 %v7617_v50 }
 0x52f   :  { %6010 = vmatpush1.bf16.msra.mxu0 %v7608_v54 }
 0x530   :  { %6011 = vmatprep.subr.bf16.mxu0 %v7616_v11  ;;  %v6025_v11 = vrot.slane %v107_v52, %v10753_v46 }
 0x533   :  { %6012 = vmatpush1.bf16.msra.mxu0 %v7614_v40 }
 0x534   :  { %6860 = vmatprep.subr.bf16.mxu0 %v7796_v58 }
 0x5c1   :  { %v5219_v39 = vpop.f32.mrb[4].mxu0 }
 0x5c2   :  { %v6880_v61 = vadd.f32 %v5219_v39, %v3047_v25  ;;  %v5465_v29 = vpop.f32.mrb[8].mxu1  ;;  %v5221_v2 = vpop.f32.mrb[5].mxu0 }
 0x5c3   :  { %v6882_v12 = vadd.f32 %v5465_v29, %v3055_v8  ;;  %v6881_v21 = vadd.f32 %v5221_v2, %v3051_v37  ;;  %v5467_v38 = vpop.f32.mrb[9].mxu1  ;;  %v5223_v26 = vpop.f32.mrb[6].mxu0 }
 0x5c4   :  { %v5472_v30 = vmax.f32 %v6880_v61, 0.0  ;;  %v6883_v1 = vadd.f32 %v5467_v38, %v3059_v63  ;;  %v5469_v19 = vpop.f32.mrb[10].mxu1  ;;  %v5224_v59 = vpop.f32.mrb[7].mxu0  ;;  %v7640_v38 = vld [vmem:[#allocation8 + $0xb8] sm:$0xff]   ;;  %v109_v26 = vld [vmem:[#allocation10 + $0x90] sm:$0xff] }
 0x5c5   :  { %v5474_v56 = vmax.f32 %v6882_v12, 0.0  ;;  %v5473_v48 = vmax.f32 %v6881_v21, 0.0  ;;  %v5470_v10 = vpop.f32.mrb[11].mxu1  ;;  %v7639_v21 = vld [vmem:[#allocation8 + $0xb0] sm:$0xff]  }
 0x5c6   :  { %v5475_v20 = vmax.f32 %v6883_v1, 0.0  ;;  %v5478_v17 = vpack.c.bf16 %v5472_v30, %v5472_v30  ;;  %v6071_v1 = vrot.slane %v109_v26, %v10753_v46 }
 0x5c7   :  { %v5479_v55 = vpack.c.bf16 %v5473_v48, %v5473_v48  ;;  %v5480_v62 = vpack.c.bf16 %v5474_v56, %v5474_v56 }
 0x5c8   :  { %v5481_v22 = vpack.c.bf16 %v5475_v20, %v5475_v20 }
 0x5c9   :  { %5972 = vmatprep.mubr.bf16.mxu1 %v5479_v55  ;;  %v5613_v43 = vpop.f32.mrb[8].mxu0  ;;  %v110_v55 = vld [vmem:[#allocation10 + $0x98] sm:$0xff] }
 0x5ca   :  { %6013 = vmatprep.mubr.bf16.mxu0 %v5481_v22  ;;  %5973 = vmatmul.mubr.bf16.vlgmr.msra.gmra.mrb[12].mxu1 %v5478_v17  ;;  %v5615_v5 = vpop.f32.mrb[9].mxu0 }
 0x5cb   :  { %6014 = vmatmul.mubr.bf16.vlgmr.msra.gmra.mrb[12].mxu0 %v5480_v62  ;;  %v5617_v0 = vpop.f32.mrb[10].mxu0  ;;  %6830 = vmatpush3.bf16.msra.mxu1 %v7618_v51  ;;  %v6316_v51 = vrot.slane %v110_v55, %v10753_v46 }
 0x5cc   :  { %v5618_v41 = vpop.f32.mrb[11].mxu0  ;;  %6831 = vmatprep.subr.bf16.mxu1 %v7619_v34  ;;  %6861 = vmatpush3.bf16.msra.mxu0 %v7633_v16 }
 0x5cd   :  { %6862 = vmatprep.subr.bf16.mxu0 %v7796_v58  ;;  %6876 = vmatprep.mubr.msk.bf16.mxu0 %vm7798_vm12, %v7796_v58 }
 0x5cf   :  { %6832 = vmatpush3.bf16.msra.mxu1 %v7620_v6 }
 0x5d0   :  { %6833 = vmatprep.subr.bf16.mxu1 %v7621_v36  ;;  %6863 = vmatpush3.bf16.msra.mxu0 %v7634_v23 }
 0x5d1   :  { %6864 = vmatprep.subr.bf16.mxu0 %v7796_v58 }
 0x5d3   :  { %6834 = vmatpush3.bf16.msra.mxu1 %v7622_v24 }
 0x5d4   :  { %6835 = vmatprep.subr.bf16.mxu1 %v7623_v33  ;;  %6865 = vmatpush3.bf16.msra.mxu0 %v7635_v32 }
 0x5d5   :  { %6866 = vmatprep.subr.bf16.mxu0 %v7796_v58 }
 0x5d7   :  { %6836 = vmatpush3.bf16.msra.mxu1 %v7624_v35 }
 0x5d8   :  { %6837 = vmatprep.subr.bf16.mxu1 %v7625_v49  ;;  %6867 = vmatpush3.bf16.msra.mxu0 %v7636_v44 }
 0x5d9   :  { %6868 = vmatprep.subr.bf16.mxu0 %v7796_v58 }
 0x5db   :  { %6838 = vmatpush3.bf16.msra.mxu1 %v7626_v45 }
 0x5dc   :  { %6839 = vmatprep.subr.bf16.mxu1 %v7627_v27  ;;  %6869 = vmatpush3.bf16.msra.mxu0 %v7637_v57 }
 0x5dd   :  { %6870 = vmatprep.subr.bf16.mxu0 %v7796_v58 }
 0x5df   :  { %6840 = vmatpush3.bf16.msra.mxu1 %v7628_v13 }
 0x5e0   :  { %6841 = vmatprep.subr.bf16.mxu1 %v7629_v42  ;;  %6871 = vmatpush3.bf16.msra.mxu0 %v7638_v14 }
 0x5e1   :  { %6872 = vmatprep.subr.bf16.mxu0 %v7796_v58 }
 0x5e3   :  { %6842 = vmatpush3.bf16.msra.mxu1 %v7630_v18 }
 0x5e4   :  { %6843 = vmatprep.subr.bf16.mxu1 %v7631_v9  ;;  %6873 = vmatpush3.bf16.msra.mxu0 %v7639_v21 }
 0x5e5   :  { %6874 = vmatprep.subr.bf16.mxu0 %v7796_v58 }
 0x5e7   :  { %6844 = vmatpush3.bf16.msra.mxu1 %v7632_v15 }
 0x5e8   :  { %6875 = vmatpush3.bf16.msra.mxu0 %v7640_v38 }
 0x69d   :  { %v5974_v54 = vpop.f32.mrb[12].mxu1 }
 0x69e   :  { %v5975_v7 = vadd.f32 %v5974_v54, %v5613_v43  ;;  %v6015_v4 = vpop.f32.mrb[12].mxu0  ;;  %v5976_v53 = vpop.f32.mrb[13].mxu1 }
 0x69f   :  { %v5977_v40 = vadd.f32 %v5976_v53, %v5615_v5  ;;  %v6017_v50 = vpop.f32.mrb[13].mxu0  ;;  %v5978_v3 = vpop.f32.mrb[14].mxu1 }
 0x6a0   :  { %v6016_v28 = vadd.f32 %v6015_v4, %v5975_v7  ;;  %v6019_v47 = vpop.f32.mrb[14].mxu0  ;;  %v5979_v25 = vpop.f32.mrb[15].mxu1 }
 0x6a1   :  { %v6018_v8 = vadd.f32 %v6017_v50, %v5977_v40  ;;  %v6020_v37 = vpop.f32.mrb[15].mxu0 }
 0x6a2   :  { %v6030_v63 = vadd.f32 %v6025_v11, %v6016_v28 }
 0x6a3   :  { %v6031_v39 = vadd.f32 %v6029_v60, %v6018_v8 }
 0x6a4   :  { %v6032_v61 = vmax.f32 %v6030_v63, 0.0 }
 0x6a5   :  { %v6033_v29 = vmax.f32 %v6031_v39, 0.0 }
 0x6a6   :  { %v6034_v12 = vpack.c.bf16 %v6032_v61, %v6032_v61 }
 0x6a7   :  { %v6035_v2 = vpack.c.bf16 %v6033_v29, %v6033_v29 }
 0x6a9   :  { %6200 = vmatprep.mubr.bf16.mxu1 %v6035_v2 }
 0x6aa   :  { %6201 = vmatmul.mubr.bf16.vlgmr.msra.gmra.mrb[16].mxu1 %v6034_v12 }
 0x77d   :  { %v6845_v30 = vpop.f32.mrb[16].mxu1 }
 0x77e   :  { %v6846_v19 = vpop.f32.mrb[17].mxu1 }
 0x77f   :  { %v6847_v59 = vadd.f32 %v6846_v19, %v6845_v30  ;;  %v6848_v56 = vpop.f32.mrb[18].mxu1 }
 0x780   :  { %v6849_v48 = vpop.f32.mrb[19].mxu1 }
 0x781   :  { %v6203_v10 = vadd.f32 %v6847_v59, %v6071_v1 }
 0x783   :  { %v6208_v20 = vpack.c.bf16 %v6203_v10, %v6203_v10 }
 0x785   :  { %6877 = vmatmul.mubr.bf16.vlgmr.msra.gmra.mrb[16].mxu0 %v6208_v20 }
 0x858   :  { %v6307_v17 = vpop.f32.mrb[16].mxu0 }
 0x859   :  { %v6317_v22 = vadd.f32 %v6316_v51, %v6307_v17  ;;  %v6878_v34 = vpop.f32.mrb[17].mxu0 }
 0x85a   :  { %v6310_v62 = vpop.f32.mrb[18].mxu0 }
 0x85b   :  { %v6318_v43 = vmax.f32 %v6317_v22, 0.0  ;;  %v6879_v58 = vpop.f32.mrb[19].mxu0 }
 0x85d   :  { %v6828_v5 = vmul.f32 -1.442695, %v6318_v43 }
 0x85f   :  { %7641 = vpow2.f32 %v6828_v5 }
 0x869   :  { %v7642_v0 = vpop.eup %7641 }
 0x86a   :  { %v6322_v6 = vadd.f32 1.0, %v7642_v0 }
 0x86c   :  { %7643 = vrcp.f32 %v6322_v6 }
 0x876   :  { %v7644_v41 = vpop.eup %7643 }
 0x877   :  { %6326 = vst.msk [vmem:[#allocation11] sm:$0x3] %vm6325_vm13, %v7644_v41 }
 0x878   :  { %7766 = shalt.err (!%p7763_p2)
}
 0x879   :  { %s7767_s16 = scalar_lea.hbm %s10789_s6, 32 }
 0x87a   :  { %p7768_p3 = scmp.ne.s32.totalorder %s10789_s6, %s7767_s16  ;;  %p7771_p4 = scmp.lt.u32.totalorder %s7767_s16, %s10789_s6 }
 0x87c   :  { %p7773_p5 = pnand %p7771_p4, %p7768_p3 }
 0x87e   :  { %7776 = shalt.err (!%p7773_p5)
}
 0x87f   :  { %6336 = dma.vmem_to_hbm [thread:$0]  %s6334_s4, 32, %s10789_s6, [#allocation4]  }
 0x880   :  { %7783 = dma.done.wait [#allocation4], 32  }
 0x881   :  { %7784 = vsyncadd [#allocation4], 4294967264 }
 0x882   :  { %6340 = vsyncpa [#allocation3], 1 }
 0x883   :  { %6341 = vsyncpa [#allocation6], 1 }
 0x884   :  { %6342 = vsyncpa [#allocation9], 1 }
 0x885   :  { %6343 = vsyncpa [#allocation4], 1 }

</bundles_post_ra>
